<compile_context>
chip_gen: v6e
topology: v6e:2x2x1
jax: 0.10.0
libtpu: 0.0.40
codegen_flags: <defaults>
</compile_context>

<pallas_src>
import functools

import jax
import jax.numpy as jnp
from jax.experimental import pallas as pl
from jax.experimental.pallas import tpu as pltpu


def _round_up(x, m):
    return ((x + m - 1) // m) * m


def _normals_loss_kernel(rec_ref, recn_ref, data_ref, datan_ref, out_ref,
                         best_d_ref, best_val_ref, *, n_true, tile_m, m_resident):
    # Block shapes (batch dim squeezed away by the BlockSpecs):
    #   rec_ref / recn_ref  : (TN, 5)   augmented LHS
    #   data_ref / datan_ref: (5, TM)   streaming, or (5, M_pad) if VMEM-resident
    #   out_ref             : (1, 1)    per-(b, N-tile) partial row sum
    i = pl.program_id(1)                      # N tile
    j = pl.program_id(2)                      # M tile (reduction axis, innermost)

    @pl.when(j == 0)
    def _init():
        best_d_ref[...] = jnp.full_like(best_d_ref, jnp.inf)
        best_val_ref[...] = jnp.zeros_like(best_val_ref)

    rec = rec_ref[...]                        # (TN, 5)
    recn = recn_ref[...]                      # (TN, 5)
    if m_resident:
        col0 = pl.multiple_of(j * tile_m, 128)
        data = data_ref[:, pl.ds(col0, tile_m)]      # (5, TM) window of resident slab
        datan = datan_ref[:, pl.ds(col0, tile_m)]
    else:
        data = data_ref[...]                         # (5, TM)
        datan = datan_ref[...]

    tn = rec.shape[0]
    tm = data.shape[1]

    dn = (((1,), (0,)), ((), ()))             # standard (M,K) x (K,N) MXU orientation
    # Scale, bias and the padded-column mask are prefolded into the operands:
    #   d[n,m]   = ||data_m||^2 - 2 rec_n.data_m      (+1e30 on padded M columns)
    #   nd2[n,m] = ||datan_m - recn_n||^2             (full squared normal distance)
    d = jax.lax.dot_general(rec, data, dn,
                            precision=jax.lax.Precision.HIGHEST,
                            preferred_element_type=jnp.float32)
    nd2 = jax.lax.dot_general(recn, datan, dn,
                              precision=jax.lax.Precision.HIGHEST,
                              preferred_element_type=jnp.float32)

    # Within-tile first-occurrence argmin over columns; pull nd2 at that column.
    lane = jax.lax.broadcasted_iota(jnp.int32, (1, tm), 1)
    tile_min = jnp.min(d, axis=1, keepdims=True)                              # (TN, 1)
    tile_idx = jnp.min(jnp.where(d == tile_min, lane, tm), axis=1, keepdims=True)
    tile_val = jnp.min(jnp.where(lane == tile_idx, nd2, jnp.inf),
                       axis=1, keepdims=True)                                 # (TN, 1)

    # Cross-tile running min; strict '<' keeps the earlier (lower-index) tile on ties.
    take = tile_min < best_d_ref[...]
    best_d_ref[...] = jnp.where(take, tile_min, best_d_ref[...])
    best_val_ref[...] = jnp.where(take, tile_val, best_val_ref[...])

    @pl.when(j == pl.num_programs(2) - 1)
    def _finalize():
        # best_val is already the full squared normal distance; clamp fp cancellation.
        norms = jnp.sqrt(jnp.maximum(best_val_ref[...], 0.0))                 # (TN, 1)
        row = jax.lax.broadcasted_iota(jnp.int32, (tn, 1), 0)
        row_ok = (i * tn + row) < n_true
        out_ref[...] = jnp.sum(jnp.where(row_ok, norms, 0.0), axis=0, keepdims=True)


def normals_loss(rec, data, rec_normals, data_normals, *,
                 tile_n=256, tile_m=2048, resident_m=None):
    """rec/rec_normals: (B, N, 3); data/data_normals: (B, M, 3). Returns scalar f32."""
    B, N, C = rec.shape
    M = data.shape[1]
    assert C == 3 and data.shape[2] == 3

    f32 = jnp.float32

    # --- Tiling --------------------------------------------------------------
    n8 = _round_up(N, 8)
    tn = min(_round_up(tile_n, 8), n8)                     # sublane multiple
    if tn == n8 and n8 >= 16:
        # One tile would swallow all of N; split so the "parallel" N grid axis can
        # shard across both TensorCores on v7x (harmless on single-TC v5e/v6e).
        tn = _round_up(-(-N // 2), 8)
    tm = min(_round_up(tile_m, 128), _round_up(M, 128))    # lane multiple
    n_pad = _round_up(N, tn)
    m_pad = _round_up(M, tm)
    nt = n_pad // tn
    mt = m_pad // tm

    # Keep the M-side operands fully VMEM-resident (DMA'd once per batch instead of
    # once per N tile) when they fit a conservative budget; stream per tile otherwise.
    m_side_bytes = 2 * 2 * 5 * 4 * m_pad          # 2 arrays x 2 buffers x 5 rows x f32
    if resident_m is None:
        resident_m = m_side_bytes <= 16 * 1024 * 1024

    # --- Host-side prepacking: fold scale / bias / padding mask into the matmuls ---
    rec32, recn32 = rec.astype(f32), rec_normals.astype(f32)
    data32, datan32 = data.astype(f32), data_normals.astype(f32)

    ones_n = jnp.ones((B, N, 1), f32)
    zeros_n = jnp.zeros((B, N, 1), f32)
    recn_sq = jnp.sum(recn32 * recn32, axis=-1, keepdims=True)
    # LHS (B, N_pad, 5); padded N rows are all-zero and masked out at finalize.
    rec_aug = jnp.pad(jnp.concatenate([rec32, ones_n, zeros_n], axis=-1),
                      ((0, 0), (0, n_pad - N), (0, 0)))
    recn_aug = jnp.pad(jnp.concatenate([recn32, ones_n, recn_sq], axis=-1),
                       ((0, 0), (0, n_pad - N), (0, 0)))

    # RHS (B, 5, M_pad), lane-dense on M; padded-M mask baked into the bias row.
    mpad_cfg = ((0, 0), (0, 0), (0, m_pad - M))
    data_t = jnp.transpose(data32, (0, 2, 1))              # (B, 3, M)
    datan_t = jnp.transpose(datan32, (0, 2, 1))
    data_sq = jnp.sum(data32 * data32, axis=-1)[:, None, :]     # (B, 1, M)
    datan_sq = jnp.sum(datan32 * datan32, axis=-1)[:, None, :]
    data_aug = jnp.concatenate([
        jnp.pad(-2.0 * data_t, mpad_cfg),
        jnp.pad(data_sq, mpad_cfg, constant_values=1e30),   # padded cols never win argmin
        jnp.zeros((B, 1, m_pad), f32)], axis=1)
    datan_aug = jnp.concatenate([
        jnp.pad(-2.0 * datan_t, mpad_cfg),
        jnp.pad(datan_sq, mpad_cfg),
        jnp.ones((B, 1, m_pad), f32)], axis=1)

    kernel = functools.partial(_normals_loss_kernel,
                               n_true=N, tile_m=tm, m_resident=resident_m)

    if resident_m:
        m_block = (None, 5, m_pad)
        m_index = lambda b, i, j: (b, 0, 0)     # DMA once per batch, stays resident
    else:
        m_block = (None, 5, tm)
        m_index = lambda b, i, j: (b, 0, j)     # stream one M tile per grid step

    partials = pl.pallas_call(
        kernel,
        out_shape=jax.ShapeDtypeStruct((B, nt, 1, 1), jnp.float32),
        grid_spec=pltpu.PrefetchScalarGridSpec(
            num_scalar_prefetch=0,
            grid=(B, nt, mt),
            in_specs=[
                pl.BlockSpec((None, tn, 5), lambda b, i, j: (b, i, 0)),   # rec_aug
                pl.BlockSpec((None, tn, 5), lambda b, i, j: (b, i, 0)),   # recn_aug
                pl.BlockSpec(m_block, m_index),                           # data_aug
                pl.BlockSpec(m_block, m_index),                           # datan_aug
            ],
            out_specs=pl.BlockSpec((None, None, 1, 1), lambda b, i, j: (b, i, 0, 0)),
            scratch_shapes=[
                pltpu.VMEM((tn, 1), jnp.float32),   # running best squared distance
                pltpu.VMEM((tn, 1), jnp.float32),   # normal squared distance at argmin
            ],
        ),
        compiler_params=pltpu.CompilerParams(
            dimension_semantics=("parallel", "parallel", "arbitrary"),
            vmem_limit_bytes=48 * 1024 * 1024,      # safe under v7x's 64 MiB physical
        ),
    )(rec_aug, recn_aug, data_aug, datan_aug)

    # Per-batch mean over N, then mean over batch (identical to torch for B == 1).
    return jnp.sum(partials) / (N * B)


def _reference(rec, data, rec_normals, data_normals):
    d = jnp.sum((rec[:, :, None, :] - data[:, None, :, :]) ** 2, axis=-1)  # (B, N, M)
    idx = jnp.argmin(d, axis=-1)                                           # (B, N)
    gathered = jnp.take_along_axis(data_normals, idx[..., None], axis=1)   # (B, N, 3)
    nrm = jnp.linalg.norm(gathered - rec_normals, axis=2)                  # (B, N)
    return jnp.mean(jnp.mean(nrm, axis=1))


if __name__ == "__main__":
    key = jax.random.PRNGKey(0)
    k1, k2, k3, k4 = jax.random.split(key, 4)

    B, N, M = 1, 200, 300
    rec = jax.random.normal(k1, (B, N, 3), dtype=jnp.float32)
    data = jax.random.normal(k2, (B, M, 3), dtype=jnp.float32)

    def _unit(v):
        return v / jnp.linalg.norm(v, axis=-1, keepdims=True)

    rec_normals = _unit(jax.random.normal(k3, (B, N, 3), dtype=jnp.float32))
    data_normals = _unit(jax.random.normal(k4, (B, M, 3), dtype=jnp.float32))

    ref = _reference(rec, data, rec_normals, data_normals)

    # Default tiles: resident M, two N tiles (megacore split), single M tile.
    loss1 = jax.jit(normals_loss)(rec, data, rec_normals, data_normals)
    jax.block_until_ready(loss1)
    assert jnp.allclose(loss1, ref, rtol=1e-4, atol=1e-4), (loss1, ref)

    # Small tiles, resident M: exercises the in-kernel dynamic lane slice, the
    # multi-tile running min and the baked-in padding mask.
    small = jax.jit(functools.partial(normals_loss, tile_n=64, tile_m=128))
    loss2 = small(rec, data, rec_normals, data_normals)
    jax.block_until_ready(loss2)
    assert jnp.allclose(loss2, ref, rtol=1e-4, atol=1e-4), (loss2, ref)

    # Small tiles, streamed M: exercises the per-tile M BlockSpec path.
    streamed = jax.jit(functools.partial(normals_loss, tile_n=64, tile_m=128,
                                         resident_m=False))
    loss3 = streamed(rec, data, rec_normals, data_normals)
    jax.block_until_ready(loss3)
    assert jnp.allclose(loss3, ref, rtol=1e-4, atol=1e-4), (loss3, ref)

    print("KERNEL_OK")
</pallas_src>

<mosaic_0001>
module attributes {stable_mosaic.version = 11 : i64} {
  func.func @_normals_loss_kernel(%arg0: i32, %arg1: i32, %arg2: i32, %arg3: memref<1x104x5xf32, #tpu.memory_space<vmem>>, %arg4: memref<1x104x5xf32, #tpu.memory_space<vmem>>, %arg5: memref<1x5x384xf32, #tpu.memory_space<vmem>>, %arg6: memref<1x5x384xf32, #tpu.memory_space<vmem>>, %arg7: memref<1x1x1x1xf32, #tpu.memory_space<vmem>>, %arg8: memref<104x1xf32, #tpu.memory_space<vmem>>, %arg9: memref<104x1xf32, #tpu.memory_space<vmem>>) attributes {dimension_semantics = [#tpu.dimension_semantics<parallel>, #tpu.dimension_semantics<parallel>, #tpu.dimension_semantics<arbitrary>], iteration_bounds = array<i64: 1, 2, 1>, scalar_prefetch = 0 : i64, scratch_operands = 2 : i64, tpu.core_type = #tpu.core_type<tc>, window_params = [{transform_indices = @transform_0, window_bounds = array<i64: 1, 104, 5>}, {transform_indices = @transform_1, window_bounds = array<i64: 1, 104, 5>}, {transform_indices = @transform_2, window_bounds = array<i64: 1, 5, 384>}, {transform_indices = @transform_3, window_bounds = array<i64: 1, 5, 384>}, {transform_indices = @transform_4, window_bounds = array<i64: 1, 1, 1, 1>}]} {
    %c0_i32 = arith.constant 0 : i32
    %0 = arith.cmpi eq, %arg2, %c0_i32 : i32
    %1 = arith.extui %0 : i1 to i32
    %c0_i32_0 = arith.constant 0 : i32
    %2 = arith.cmpi ne, %1, %c0_i32_0 : i32
    scf.if %2 {
      %cst_28 = arith.constant 0x7F800000 : f32
      %46 = vector.broadcast %cst_28 : f32 to vector<104x1xf32>
      %c0_29 = arith.constant 0 : index
      %c0_30 = arith.constant 0 : index
      %47 = vector.load %arg8[%c0_29, %c0_30] : memref<104x1xf32, #tpu.memory_space<vmem>>, vector<104x1xf32>
      tpu.vector_store %arg8[%c0_29, %c0_30], %46 {strides = array<i32>} : memref<104x1xf32, #tpu.memory_space<vmem>>, vector<104x1xf32>,
      %cst_31 = arith.constant 0.000000e+00 : f32
      %48 = vector.broadcast %cst_31 : f32 to vector<104x1xf32>
      %c0_32 = arith.constant 0 : index
      %c0_33 = arith.constant 0 : index
      %49 = vector.load %arg9[%c0_32, %c0_33] : memref<104x1xf32, #tpu.memory_space<vmem>>, vector<104x1xf32>
      tpu.vector_store %arg9[%c0_32, %c0_33], %48 {strides = array<i32>} : memref<104x1xf32, #tpu.memory_space<vmem>>, vector<104x1xf32>,
    } else {
    }
    %c0 = arith.constant 0 : index
    %c0_1 = arith.constant 0 : index
    %c0_2 = arith.constant 0 : index
    %3 = vector.load %arg3[%c0, %c0_1, %c0_2] : memref<1x104x5xf32, #tpu.memory_space<vmem>>, vector<1x104x5xf32>
    %4 = vector.shape_cast %3 : vector<1x104x5xf32> to vector<104x5xf32>
    %c0_3 = arith.constant 0 : index
    %c0_4 = arith.constant 0 : index
    %c0_5 = arith.constant 0 : index
    %5 = vector.load %arg4[%c0_3, %c0_4, %c0_5] : memref<1x104x5xf32, #tpu.memory_space<vmem>>, vector<1x104x5xf32>
    %6 = vector.shape_cast %5 : vector<1x104x5xf32> to vector<104x5xf32>
    %c384_i32 = arith.constant 384 : i32
    %7 = arith.muli %arg2, %c384_i32 : i32
    %8 = tpu.assume_multiple %7, 128 : i32
    %c0_6 = arith.constant 0 : index
    %c0_7 = arith.constant 0 : index
    %9 = arith.index_cast %8 : i32 to index
    %10 = vector.load %arg5[%c0_6, %c0_7, %9] : memref<1x5x384xf32, #tpu.memory_space<vmem>>, vector<1x5x384xf32>
    %11 = vector.shape_cast %10 : vector<1x5x384xf32> to vector<5x384xf32>
    %c0_8 = arith.constant 0 : index
    %c0_9 = arith.constant 0 : index
    %12 = arith.index_cast %8 : i32 to index
    %13 = vector.load %arg6[%c0_8, %c0_9, %12] : memref<1x5x384xf32, #tpu.memory_space<vmem>>, vector<1x5x384xf32>
    %14 = vector.shape_cast %13 : vector<1x5x384xf32> to vector<5x384xf32>
    %cst = arith.constant dense<0.000000e+00> : vector<104x384xf32>
    %15 = tpu.matmul %4, %11, %cst {dimension_numbers = #tpu.dot_dimension_numbers<[1], [0], [0], [1], [0, 0, 1, 1], [], []>, precision = #tpu.contract_precision<fp32>} : vector<104x5xf32>, vector<5x384xf32>, vector<104x384xf32> -> vector<104x384xf32>
    %cst_10 = arith.constant dense<0.000000e+00> : vector<104x384xf32>
    %16 = tpu.matmul %6, %14, %cst_10 {dimension_numbers = #tpu.dot_dimension_numbers<[1], [0], [0], [1], [0, 0, 1, 1], [], []>, precision = #tpu.contract_precision<fp32>} : vector<104x5xf32>, vector<5x384xf32>, vector<104x384xf32> -> vector<104x384xf32>
    %17 = tpu.iota {dimensions = array<i32: 1>} : vector<1x384xi32>
    %cst_11 = arith.constant dense<0x7F800000> : vector<104xf32>
    %18 = vector.multi_reduction <minimumf>, %15, %cst_11 [1] : vector<104x384xf32> to vector<104xf32>
    %19 = vector.shape_cast %18 : vector<104xf32> to vector<104x1xf32>
    %20 = vector.broadcast %19 : vector<104x1xf32> to vector<104x384xf32>
    %21 = arith.cmpf oeq, %15, %20 : vector<104x384xf32>
    %c384_i32_12 = arith.constant 384 : i32
    %22 = vector.shape_cast %17 : vector<1x384xi32> to vector<1x384xi32>
    %23 = vector.broadcast %22 : vector<1x384xi32> to vector<104x384xi32>
    %24 = vector.broadcast %c384_i32_12 : i32 to vector<104x384xi32>
    %25 = arith.select %21, %23, %24 : vector<104x384xi1>, vector<104x384xi32>
    %cst_13 = arith.constant dense<2147483647> : vector<104xi32>
    %26 = vector.multi_reduction <minsi>, %25, %cst_13 [1] : vector<104x384xi32> to vector<104xi32>
    %27 = vector.shape_cast %26 : vector<104xi32> to vector<104x1xi32>
    %28 = vector.broadcast %17 : vector<1x384xi32> to vector<104x384xi32>
    %29 = vector.broadcast %27 : vector<104x1xi32> to vector<104x384xi32>
    %30 = arith.cmpi eq, %28, %29 : vector<104x384xi32>
    %cst_14 = arith.constant 0x7F800000 : f32
    %31 = vector.broadcast %cst_14 : f32 to vector<104x384xf32>
    %32 = arith.select %30, %16, %31 : vector<104x384xi1>, vector<104x384xf32>
    %cst_15 = arith.constant dense<0x7F800000> : vector<104xf32>
    %33 = vector.multi_reduction <minimumf>, %32, %cst_15 [1] : vector<104x384xf32> to vector<104xf32>
    %34 = vector.shape_cast %33 : vector<104xf32> to vector<104x1xf32>
    %c0_16 = arith.constant 0 : index
    %c0_17 = arith.constant 0 : index
    %35 = vector.load %arg8[%c0_16, %c0_17] : memref<104x1xf32, #tpu.memory_space<vmem>>, vector<104x1xf32>
    %36 = arith.cmpf olt, %19, %35 : vector<104x1xf32>
    %c0_18 = arith.constant 0 : index
    %c0_19 = arith.constant 0 : index
    %37 = vector.load %arg8[%c0_18, %c0_19] : memref<104x1xf32, #tpu.memory_space<vmem>>, vector<104x1xf32>
    %38 = arith.select %36, %19, %37 : vector<104x1xi1>, vector<104x1xf32>
    %c0_20 = arith.constant 0 : index
    %c0_21 = arith.constant 0 : index
    %39 = vector.load %arg8[%c0_20, %c0_21] : memref<104x1xf32, #tpu.memory_space<vmem>>, vector<104x1xf32>
    tpu.vector_store %arg8[%c0_20, %c0_21], %38 {strides = array<i32>} : memref<104x1xf32, #tpu.memory_space<vmem>>, vector<104x1xf32>,
    %c0_22 = arith.constant 0 : index
    %c0_23 = arith.constant 0 : index
    %40 = vector.load %arg9[%c0_22, %c0_23] : memref<104x1xf32, #tpu.memory_space<vmem>>, vector<104x1xf32>
    %41 = arith.select %36, %34, %40 : vector<104x1xi1>, vector<104x1xf32>
    %c0_24 = arith.constant 0 : index
    %c0_25 = arith.constant 0 : index
    %42 = vector.load %arg9[%c0_24, %c0_25] : memref<104x1xf32, #tpu.memory_space<vmem>>, vector<104x1xf32>
    tpu.vector_store %arg9[%c0_24, %c0_25], %41 {strides = array<i32>} : memref<104x1xf32, #tpu.memory_space<vmem>>, vector<104x1xf32>,
    %c0_i32_26 = arith.constant 0 : i32
    %43 = arith.cmpi eq, %arg2, %c0_i32_26 : i32
    %44 = arith.extui %43 : i1 to i32
    %c0_i32_27 = arith.constant 0 : i32
    %45 = arith.cmpi ne, %44, %c0_i32_27 : i32
    scf.if %45 {
      %c0_28 = arith.constant 0 : index
      %c0_29 = arith.constant 0 : index
      %46 = vector.load %arg9[%c0_28, %c0_29] : memref<104x1xf32, #tpu.memory_space<vmem>>, vector<104x1xf32>
      %cst_30 = arith.constant 0.000000e+00 : f32
      %47 = vector.broadcast %cst_30 : f32 to vector<104x1xf32>
      %48 = arith.maximumf %46, %47 : vector<104x1xf32>
      %49 = math.sqrt %48 : vector<104x1xf32>
      %50 = tpu.iota {dimensions = array<i32: 0>} : vector<104x1xi32>
      %c104_i32 = arith.constant 104 : i32
      %51 = arith.muli %arg1, %c104_i32 : i32
      %52 = vector.broadcast %51 : i32 to vector<104x1xi32>
      %53 = arith.addi %52, %50 : vector<104x1xi32>
      %c200_i32 = arith.constant 200 : i32
      %54 = vector.broadcast %c200_i32 : i32 to vector<104x1xi32>
      %55 = arith.cmpi slt, %53, %54 : vector<104x1xi32>
      %cst_31 = arith.constant 0.000000e+00 : f32
      %56 = vector.broadcast %cst_31 : f32 to vector<104x1xf32>
      %57 = arith.select %55, %49, %56 : vector<104x1xi1>, vector<104x1xf32>
      %cst_32 = arith.constant dense<0.000000e+00> : vector<1xf32>
      %58 = vector.multi_reduction <add>, %57, %cst_32 [0] : vector<104x1xf32> to vector<1xf32>
      %59 = vector.shape_cast %58 : vector<1xf32> to vector<1x1xf32>
      %c0_33 = arith.constant 0 : index
      %c0_34 = arith.constant 0 : index
      %c0_35 = arith.constant 0 : index
      %c0_36 = arith.constant 0 : index
      %60 = vector.load %arg7[%c0_33, %c0_34, %c0_35, %c0_36] : memref<1x1x1x1xf32, #tpu.memory_space<vmem>>, vector<1x1x1x1xf32>
      %61 = vector.shape_cast %60 : vector<1x1x1x1xf32> to vector<1x1xf32>
      %62 = vector.shape_cast %59 : vector<1x1xf32> to vector<1x1x1x1xf32>
      tpu.vector_store %arg7[%c0_33, %c0_34, %c0_35, %c0_36], %62 {strides = array<i32>} : memref<1x1x1x1xf32, #tpu.memory_space<vmem>>, vector<1x1x1x1xf32>,
    } else {
    }
    return
  }
  func.func @transform_0(%arg0: i32, %arg1: i32, %arg2: i32) -> (i32, i32, i32) {
    %c0_i32 = arith.constant 0 : i32
    %c0_i32_0 = arith.constant 0 : i32
    return %arg0, %arg1, %c0_i32 : i32, i32, i32
  }
  func.func @transform_1(%arg0: i32, %arg1: i32, %arg2: i32) -> (i32, i32, i32) {
    %c0_i32 = arith.constant 0 : i32
    %c0_i32_0 = arith.constant 0 : i32
    return %arg0, %arg1, %c0_i32 : i32, i32, i32
  }
  func.func @transform_2(%arg0: i32, %arg1: i32, %arg2: i32) -> (i32, i32, i32) {
    %c0_i32 = arith.constant 0 : i32
    %c0_i32_0 = arith.constant 0 : i32
    %c0_i32_1 = arith.constant 0 : i32
    return %arg0, %c0_i32, %c0_i32_0 : i32, i32, i32
  }
  func.func @transform_3(%arg0: i32, %arg1: i32, %arg2: i32) -> (i32, i32, i32) {
    %c0_i32 = arith.constant 0 : i32
    %c0_i32_0 = arith.constant 0 : i32
    %c0_i32_1 = arith.constant 0 : i32
    return %arg0, %c0_i32, %c0_i32_0 : i32, i32, i32
  }
  func.func @transform_4(%arg0: i32, %arg1: i32, %arg2: i32) -> (i32, i32, i32, i32) {
    %c0_i32 = arith.constant 0 : i32
    %c0_i32_0 = arith.constant 0 : i32
    %c0_i32_1 = arith.constant 0 : i32
    return %arg0, %arg1, %c0_i32, %c0_i32_0 : i32, i32, i32, i32
  }
}

</mosaic_0001>

<bundles_post_ra>
// kernel: normals_loss.1
= control target key start
LH: loop header
LB: loop body
LE: loop exit
PB: predicated region body
PF: predicated region fallthrough
CT: control target
= control target key end

     0   :  { %s6220_s15 = smov 0   ;;  %s6222_s16 = smov 0   ;;  %s9100_s0 = inlined_call_operand.vmem [shape: f32[1,208,5], index: 0, kind: input, shape index: {}]   ;;  %s9101_s1 = inlined_call_operand.vmem [shape: f32[1,208,5], index: 1, kind: input, shape index: {}]   ;;  %s9102_s2 = inlined_call_operand.vmem [shape: f32[1,5,384], index: 2, kind: input, shape index: {}]   ;;  %s9103_s3 = inlined_call_operand.vmem [shape: f32[1,5,384], index: 3, kind: input, shape index: {}]   ;;  %s9104_s4 = inlined_call_operand.vmem [shape: f32[1,2,1,1], index: 4, kind: output, shape index: {}]  }
   0x1   :  { %s6224_s17 = smov 0  }
   0x2 LB: > { %s29_s18 = sadd.s32 1, %s6186_s16  ;;  %p5450_p0 = scmp.ge.s32.totalorder %s6190_s17, 1  ;;  %s6190_s17 = sphi %s6224_s17, %s14_s17   ;;  %s6186_s16 = sphi %s6222_s16, %s9508_s16   ;;  %s6182_s15 = sphi %s6220_s15, %s9507_s15  }
   0x3   : > { %p31_p1 = scmp.ge.s32.totalorder %s29_s18, 2  ;;  %p227_p2 = scmp.lt.s32.totalorder %s6190_s17, 3 }
   0x5   : > { %s9510_s18 = smov (%p31_p1, %s29_s18), 0  ;;  %p228_p3 = pnand %p5450_p0, %p227_p2 }
   0x7   : > { %231 = sbr.rel (%p228_p3) target bundleno = 1160 (0x488), region = 36 }
   0xc   : > { %v378_v0 = vld [vmem:[%s9102_s2 + $0x8] sm:$0x1f]  ;;  %vm425_vm0 = vcmask 1044480   ;;  %v377_v1 = vld [vmem:[%s9102_s2] sm:$0x1f]  ;;  %v9185_v4 = vmov 0.0  }
   0xd   : > { %v430_v2 = vsel %vm425_vm0, %v378_v0, 0  ;;  %v427_v3 = vsel %vm425_vm0, %v377_v1, 0  ;;  %501 = vmatprep.mubr.f32.mxu0 %v9185_v4  ;;  %719 = vmatprep.mubr.f32.mxu1 %v9185_v4  ;;  %s278_s23 = smul.u32 13, %s6182_s15  ;;  %vm385_vm1 = vcmask 39936   ;;  %vm6193_vm2 = vmmov 0   ;;  %p310_p5 = scmp.lt.s32.totalorder %s6182_s15, 1 }
   0xe   : > { %v465_v5 = vand.u32 4294901760, %v430_v2  ;;  %v6251_v6 = vand.u32 4294901760, %v427_v3  ;;  %vm319_vm3 = vcmask 7168   ;;  %s5237_s13 = smul.u32 104, %s6182_s15 }
   0xf   : > { %p281_p4 = scmp.lt.s32.totalorder %s278_s23, 25  ;;  %333 = vst.msk [vmem:[#allocation3] sm:$0xff] %vm319_vm3, %v9185_v4  ;;  %334 = vst.msk [vmem:[#allocation3 + $0x8] sm:$0xff] %vm319_vm3, %v9185_v4  ;;  %s9514_s15 = smov (!%p310_p5, %s6182_s15), 1 }
  0x10   : > { %466 = vmatprep.subr.mxu0 %v465_v5  ;;  %v676_v7 = vsub.f32 %v430_v2, %v465_v5  ;;  %v6254_v8 = vsub.f32 %v427_v3, %v6251_v6  ;;  %335 = vst.msk [vmem:[#allocation3 + $0x10] sm:$0xff] %vm319_vm3, %v9185_v4  ;;  %336 = vst.msk [vmem:[#allocation3 + $0x18] sm:$0xff] %vm319_vm3, %v9185_v4  ;;  %s314_s20 = scalar_lea.vmem %s9104_s4, %s9514_s15 }
  0x11   : > { %468 = vmatpush1.msra.mxu0 %v6251_v6  ;;  %s9512_s23 = smov (!%p281_p4, %s278_s23), 25  ;;  %337 = vst.msk [vmem:[#allocation3 + $0x20] sm:$0xff] %vm319_vm3, %v9185_v4  ;;  %338 = vst.msk [vmem:[#allocation3 + $0x28] sm:$0xff] %vm319_vm3, %v9185_v4 }
  0x12   : > { %v677_v9 = vand.u32 4294901760, %v676_v7  ;;  %v683_v10 = vand.u32 4294901760, %v6254_v8  ;;  %843 = vmatprep.subr.mxu0 %v676_v7  ;;  %s5451_s24 = sshll.u32 %s9512_s23, 3  ;;  %339 = vst.msk [vmem:[#allocation3 + $0x30] sm:$0xff] %vm319_vm3, %v9185_v4  ;;  %340 = vst.msk [vmem:[#allocation3 + $0x38] sm:$0xff] %vm319_vm3, %v9185_v4 }
  0x13   : > { %s6269_s27 = scalar_lea.vmem %s9100_s0, %s5451_s24  ;;  %s6979_s10 = scalar_lea.vmem %s9101_s1, %s5451_s24  ;;  %341 = vst.msk [vmem:[#allocation3 + $0x40] sm:$0xff] %vm319_vm3, %v9185_v4  ;;  %342 = vst.msk [vmem:[#allocation3 + $0x48] sm:$0xff] %vm319_vm3, %v9185_v4 }
  0x14   : > { %v678_v11 = vsub.f32 %v676_v7, %v677_v9  ;;  %v684_v12 = vsub.f32 %v6254_v8, %v683_v10  ;;  %v346_v13 = vld [vmem:[%s6269_s27] sm:$0xff]  ;;  %v347_v14 = vld [vmem:[%s6269_s27 + $0x8] sm:$0xff]  ;;  %v348_v15 = vld [vmem:[%s6269_s27 + $0x10] sm:$0xff]  ;;  %343 = vst.msk [vmem:[#allocation3 + $0x50] sm:$0xff] %vm319_vm3, %v9185_v4 }
  0x15   : > { %v387_v18 = vsel %vm385_vm1, %v346_v13, 0  ;;  %v390_v19 = vsel %vm385_vm1, %v347_v14, 0  ;;  %v349_v20 = vld [vmem:[%s6269_s27 + $0x18] sm:$0xff]  ;;  %v350_v21 = vld [vmem:[%s6269_s27 + $0x20] sm:$0xff]  ;;  %v393_v24 = vsel %vm385_vm1, %v348_v15, 0  ;;  %v351_v31 = vld [vmem:[%s6269_s27 + $0x28] sm:$0xff] }
  0x16   : > { %v679_v16 = vand.u32 4294901760, %v678_v11  ;;  %v685_v17 = vand.u32 4294901760, %v684_v12  ;;  %v6278_v22 = vand.u32 4294901760, %v387_v18  ;;  %v6280_v23 = vand.u32 4294901760, %v390_v19  ;;  %v352_v42 = vld [vmem:[%s6269_s27 + $0x30] sm:$0xff]  ;;  %v353_v48 = vld [vmem:[%s6269_s27 + $0x38] sm:$0xff] }
  0x17   : > { %v396_v25 = vsel %vm385_vm1, %v349_v20, 0  ;;  %v6284_v26 = vand.u32 4294901760, %v393_v24  ;;  %v399_v30 = vsel %vm385_vm1, %v350_v21, 0  ;;  %v402_v36 = vsel %vm385_vm1, %v351_v31, 0  ;;  %v354_v56 = vld [vmem:[%s6269_s27 + $0x40] sm:$0xff]  ;;  %v355_v63 = vld [vmem:[%s6269_s27 + $0x48] sm:$0xff] }
  0x18   : > { %680 = vmatprep.subr.mxu1 %v679_v16  ;;  %v6287_v27 = vsub.f32 %v387_v18, %v6278_v22  ;;  %v6290_v28 = vsub.f32 %v390_v19, %v6280_v23  ;;  %v6292_v29 = vand.u32 4294901760, %v396_v25  ;;  %v6308_v35 = vand.u32 4294901760, %v399_v30  ;;  %344 = vst.msk [vmem:[#allocation3 + $0x58] sm:$0xff] %vm319_vm3, %v9185_v4  ;;  %345 = vst.msk [vmem:[#allocation3 + $0x60] sm:$0xff] %vm319_vm3, %v9185_v4 }
  0x19   : > { %686 = vmatpush1.msra.mxu1 %v685_v17  ;;  %v6298_v32 = vsub.f32 %v393_v24, %v6284_v26  ;;  %v6326_v43 = vand.u32 4294901760, %v402_v36  ;;  %v405_v49 = vsel %vm385_vm1, %v352_v42, 0  ;;  %v408_v51 = vsel %vm385_vm1, %v353_v48, 0  ;;  %v357_v17 = vld [vmem:[%s6269_s27 + $0x58] sm:$0xff] }
  0x1a   : > { %721 = vmatmul.mubr.f32.vlgmr.msra.gmra.mxu1 %v6278_v22  ;;  %1015 = vmatprep.subr.mxu1 %v465_v5  ;;  %v6301_v33 = vand.u32 4294901760, %v6287_v27  ;;  %v6306_v34 = vand.u32 4294901760, %v6290_v28  ;;  %v6319_v40 = vsub.f32 %v396_v25, %v6292_v29  ;;  %v6337_v47 = vsub.f32 %v399_v30, %v6308_v35  ;;  %v358_v25 = vld [vmem:[%s6269_s27 + $0x60] sm:$0xff] }
  0x1b   : > { %1017 = vmatpush1.msra.mxu1 %v6251_v6  ;;  %726 = vmatprep.mubr.f32.mxu1 %v9185_v4  ;;  %v6316_v39 = vand.u32 4294901760, %v6298_v32  ;;  %v6346_v50 = vsub.f32 %v402_v36, %v6326_v43  ;;  %v6357_v55 = vand.u32 4294901760, %v405_v49  ;;  %v6363_v57 = vand.u32 4294901760, %v408_v51 }
  0x1c   : > { %1361 = vmatprep.subr.mxu1 %v465_v5  ;;  %v505_v37 = vsub.f32 %v6287_v27, %v6301_v33  ;;  %v516_v38 = vsub.f32 %v6290_v28, %v6306_v34  ;;  %v6334_v46 = vand.u32 4294901760, %v6319_v40  ;;  %v6355_v54 = vand.u32 4294901760, %v6337_v47 }
  0x1d   : > { %v527_v45 = vsub.f32 %v6298_v32, %v6316_v39  ;;  %v6371_v60 = vand.u32 4294901760, %v6346_v50  ;;  %v6374_v61 = vsub.f32 %v405_v49, %v6357_v55  ;;  %v411_v62 = vsel %vm385_vm1, %v354_v56, 0 }
  0x1e   : > { %728 = vmatmul.mubr.f32.gmra.mxu1 %v6280_v23  ;;  %v6322_v41 = vand.u32 4294901760, %v505_v37  ;;  %v6329_v44 = vand.u32 4294901760, %v516_v38  ;;  %v538_v53 = vsub.f32 %v6319_v40, %v6334_v46  ;;  %v549_v59 = vsub.f32 %v6337_v47, %v6355_v54 }
  0x1f   : > { %733 = vmatprep.mubr.f32.mxu1 %v9185_v4  ;;  %v6350_v52 = vand.u32 4294901760, %v527_v45  ;;  %v6382_v0 = vsub.f32 %v408_v51, %v6363_v57  ;;  %v560_v2 = vsub.f32 %v6346_v50, %v6371_v60  ;;  %v6390_v3 = vand.u32 4294901760, %v6374_v61 }
  0x20   : > { %507 = vmatmul.mubr.f32.vlgmr.msra.gmra.mxu0 %v6322_v41  ;;  %v6366_v58 = vand.u32 4294901760, %v538_v53  ;;  %v6385_v1 = vand.u32 4294901760, %v549_v59  ;;  %v6392_v5 = vand.u32 4294901760, %v411_v62  ;;  %v414_v7 = vsel %vm385_vm1, %v355_v63, 0 }
  0x21   : > { %846 = vmatpush1.msra.mxu0 %v6254_v8  ;;  %512 = vmatprep.mubr.f32.mxu0 %v9185_v4  ;;  %v6400_v11 = vand.u32 4294901760, %v6382_v0  ;;  %v6403_v12 = vand.u32 4294901760, %v560_v2  ;;  %v571_v13 = vsub.f32 %v6374_v61, %v6390_v3  ;;  %v6410_v15 = vand.u32 4294901760, %v414_v7 }
  0x22   : > { %735 = vmatmul.mubr.f32.gmra.mxu1 %v6284_v26  ;;  %1201 = vmatprep.subr.mxu0 %v677_v9  ;;  %v356_v9 = vld [vmem:[%s6269_s27 + $0x50] sm:$0xff]  ;;  %v6408_v14 = vsub.f32 %v411_v62, %v6392_v5  ;;  %v420_v30 = vsel %vm385_vm1, %v357_v17, 0  ;;  %v423_v36 = vsel %vm385_vm1, %v358_v25, 0 }
  0x23   : > { %740 = vmatprep.mubr.f32.mxu1 %v9185_v4  ;;  %v417_v16 = vsel %vm385_vm1, %v356_v9, 0  ;;  %v582_v18 = vsub.f32 %v6382_v0, %v6400_v11  ;;  %v6420_v19 = vand.u32 4294901760, %v571_v13  ;;  %v6426_v21 = vsub.f32 %v414_v7, %v6410_v15 }
  0x24   : > { %518 = vmatmul.mubr.f32.gmra.mxu0 %v6329_v44  ;;  %v6423_v20 = vand.u32 4294901760, %v6408_v14  ;;  %v6428_v24 = vand.u32 4294901760, %v417_v16  ;;  %v6447_v45 = vand.u32 4294901760, %v420_v30  ;;  %v6452_v48 = vand.u32 4294901760, %v423_v36 }
  0x25   : > { %523 = vmatprep.mubr.f32.mxu0 %v9185_v4  ;;  %v6434_v31 = vand.u32 4294901760, %v582_v18  ;;  %v6442_v38 = vand.u32 4294901760, %v6426_v21 }
  0x26   : > { %742 = vmatmul.mubr.f32.gmra.mxu1 %v6292_v29  ;;  %v593_v37 = vsub.f32 %v6408_v14, %v6423_v20  ;;  %v6445_v42 = vsub.f32 %v417_v16, %v6428_v24  ;;  %v6463_v56 = vsub.f32 %v420_v30, %v6447_v45  ;;  %v6477_v2 = vsub.f32 %v423_v36, %v6452_v48 }
  0x27   : > { %747 = vmatprep.mubr.f32.mxu1 %v9185_v4  ;;  %v604_v51 = vsub.f32 %v6426_v21, %v6442_v38 }
  0x28   : > { %529 = vmatmul.mubr.f32.gmra.mxu0 %v6350_v52  ;;  %v6455_v49 = vand.u32 4294901760, %v593_v37  ;;  %v6460_v53 = vand.u32 4294901760, %v6445_v42  ;;  %v6474_v63 = vand.u32 4294901760, %v6463_v56  ;;  %v6488_v13 = vand.u32 4294901760, %v6477_v2 }
  0x29   : > { %534 = vmatprep.mubr.f32.mxu0 %v9185_v4  ;;  %v6469_v59 = vand.u32 4294901760, %v604_v51  ;;  %v383_v51 = vld [vmem:[%s9103_s3 + $0x8] sm:$0x1f] }
  0x2a   : > { %749 = vmatmul.mubr.f32.gmra.mxu1 %v6308_v35  ;;  %v615_v62 = vsub.f32 %v6445_v42, %v6460_v53  ;;  %v626_v9 = vsub.f32 %v6463_v56, %v6474_v63  ;;  %v637_v17 = vsub.f32 %v6477_v2, %v6488_v13 }
  0x2b   : > { %754 = vmatprep.mubr.f32.mxu1 %v9185_v4 }
  0x2c   : > { %540 = vmatmul.mubr.f32.gmra.mxu0 %v6366_v58  ;;  %v6483_v7 = vand.u32 4294901760, %v615_v62  ;;  %v6494_v16 = vand.u32 4294901760, %v626_v9  ;;  %v6502_v18 = vand.u32 4294901760, %v637_v17  ;;  %v2493_v9 = vsel %vm425_vm0, %v383_v51, 0 }
  0x2d   : > { %545 = vmatprep.mubr.f32.mxu0 %v9185_v4 }
  0x2e   : > { %756 = vmatmul.mubr.f32.gmra.mxu1 %v6326_v43 }
  0x2f   : > { %761 = vmatprep.mubr.f32.mxu1 %v9185_v4 }
  0x30   : > { %551 = vmatmul.mubr.f32.gmra.mxu0 %v6385_v1 }
  0x31   : > { %556 = vmatprep.mubr.f32.mxu0 %v9185_v4 }
  0x32   : > { %763 = vmatmul.mubr.f32.gmra.mxu1 %v6357_v55 }
  0x33   : > { %768 = vmatprep.mubr.f32.mxu1 %v9185_v4 }
  0x34   : > { %562 = vmatmul.mubr.f32.gmra.mxu0 %v6403_v12 }
  0x35   : > { %567 = vmatprep.mubr.f32.mxu0 %v9185_v4 }
  0x36   : > { %770 = vmatmul.mubr.f32.gmra.mxu1 %v6363_v57 }
  0x37   : > { %775 = vmatprep.mubr.f32.mxu1 %v9185_v4 }
  0x38   : > { %573 = vmatmul.mubr.f32.gmra.mxu0 %v6420_v19 }
  0x39   : > { %578 = vmatprep.mubr.f32.mxu0 %v9185_v4 }
  0x3a   : > { %777 = vmatmul.mubr.f32.gmra.mxu1 %v6392_v5 }
  0x3b   : > { %782 = vmatprep.mubr.f32.mxu1 %v9185_v4 }
  0x3c   : > { %584 = vmatmul.mubr.f32.gmra.mxu0 %v6434_v31 }
  0x3d   : > { %589 = vmatprep.mubr.f32.mxu0 %v9185_v4 }
  0x3e   : > { %784 = vmatmul.mubr.f32.gmra.mxu1 %v6410_v15 }
  0x3f   : > { %789 = vmatprep.mubr.f32.mxu1 %v9185_v4 }
  0x40   : > { %595 = vmatmul.mubr.f32.gmra.mxu0 %v6455_v49 }
  0x41   : > { %600 = vmatprep.mubr.f32.mxu0 %v9185_v4 }
  0x42   : > { %791 = vmatmul.mubr.f32.gmra.mxu1 %v6428_v24 }
  0x43   : > { %796 = vmatprep.mubr.f32.mxu1 %v9185_v4 }
  0x44   : > { %606 = vmatmul.mubr.f32.gmra.mxu0 %v6469_v59 }
  0x45   : > { %611 = vmatprep.mubr.f32.mxu0 %v9185_v4 }
  0x46   : > { %798 = vmatmul.mubr.f32.gmra.mxu1 %v6447_v45 }
  0x47   : > { %803 = vmatprep.mubr.f32.mxu1 %v9185_v4 }
  0x48   : > { %617 = vmatmul.mubr.f32.gmra.mxu0 %v6483_v7 }
  0x49   : > { %622 = vmatprep.mubr.f32.mxu0 %v9185_v4 }
  0x4a   : > { %805 = vmatmul.mubr.f32.gmra.mxu1 %v6452_v48 }
  0x4b   : > { %1050 = vmatprep.mubr.f32.mxu1 %v9185_v4 }
  0x4c   : > { %628 = vmatmul.mubr.f32.gmra.mxu0 %v6494_v16 }
  0x4d   : > { %633 = vmatprep.mubr.f32.mxu0 %v9185_v4 }
  0x4e   : > { %1054 = vmatmul.mubr.f32.vlgmr.msra.gmra.mxu1 %v6301_v33 }
  0x4f   : > { %1363 = vmatpush1.msra.mxu1 %v6251_v6  ;;  %1059 = vmatprep.mubr.f32.mxu1 %v9185_v4  ;;  %v379_v6 = vld [vmem:[%s9102_s2 + $0x10] sm:$0x1f] }
  0x50   : > { %639 = vmatmul.mubr.f32.gmra.mxu0 %v6502_v18  ;;  %5664 = vmatprep.subr.mxu1 %v9185_v4  ;;  %v433_v8 = vsel %vm425_vm0, %v379_v6, 0  ;;  %v6717_v6 = vand.u32 4294901760, %v2493_v9 }
  0x51   : > { %879 = vmatprep.mubr.f32.mxu0 %v9185_v4 }
  0x52   : > { %1063 = vmatmul.mubr.f32.gmra.mxu1 %v6306_v34 }
  0x53   : > { %1068 = vmatprep.mubr.f32.mxu1 %v9185_v4 }
  0x54   : > { %882 = vmatmul.mubr.f32.vlgmr.msra.gmra.mxu0 %v6287_v27 }
  0x55   : > { %1205 = vmatpush1.msra.mxu0 %v683_v10  ;;  %887 = vmatprep.mubr.f32.mxu0 %v9185_v4  ;;  %v6548_v10 = vand.u32 4294901760, %v433_v8 }
  0x56   : > { %1072 = vmatmul.mubr.f32.gmra.mxu1 %v6316_v39  ;;  %5623 = vmatprep.subr.mxu0 %v9185_v4 }
  0x57   : > { %1077 = vmatprep.mubr.f32.mxu1 %v9185_v4  ;;  %v6555_v25 = vsub.f32 %v433_v8, %v6548_v10 }
  0x58   : > { %890 = vmatmul.mubr.f32.gmra.mxu0 %v6290_v28 }
  0x59   : > { %895 = vmatprep.mubr.f32.mxu0 %v9185_v4  ;;  %v1717_v30 = vand.u32 4294901760, %v6555_v25 }
  0x5a   : > { %1081 = vmatmul.mubr.f32.gmra.mxu1 %v6334_v46 }
  0x5b   : > { %1086 = vmatprep.mubr.f32.mxu1 %v9185_v4  ;;  %v1718_v36 = vsub.f32 %v6555_v25, %v1717_v30 }
  0x5c   : > { %898 = vmatmul.mubr.f32.gmra.mxu0 %v6298_v32 }
  0x5d   : > { %903 = vmatprep.mubr.f32.mxu0 %v9185_v4  ;;  %v1719_v37 = vand.u32 4294901760, %v1718_v36 }
  0x5e   : > { %1090 = vmatmul.mubr.f32.gmra.mxu1 %v6355_v54 }
  0x5f   : > { %1095 = vmatprep.mubr.f32.mxu1 %v9185_v4 }
  0x60   : > { %906 = vmatmul.mubr.f32.gmra.mxu0 %v6319_v40 }
  0x61   : > { %911 = vmatprep.mubr.f32.mxu0 %v9185_v4 }
  0x62   : > { %1099 = vmatmul.mubr.f32.gmra.mxu1 %v6371_v60 }
  0x63   : > { %1104 = vmatprep.mubr.f32.mxu1 %v9185_v4 }
  0x64   : > { %914 = vmatmul.mubr.f32.gmra.mxu0 %v6337_v47 }
  0x65   : > { %919 = vmatprep.mubr.f32.mxu0 %v9185_v4 }
  0x66   : > { %1108 = vmatmul.mubr.f32.gmra.mxu1 %v6390_v3 }
  0x67   : > { %1113 = vmatprep.mubr.f32.mxu1 %v9185_v4 }
  0x68   : > { %922 = vmatmul.mubr.f32.gmra.mxu0 %v6346_v50 }
  0x69   : > { %927 = vmatprep.mubr.f32.mxu0 %v9185_v4 }
  0x6a   : > { %1117 = vmatmul.mubr.f32.gmra.mxu1 %v6400_v11 }
  0x6b   : > { %1122 = vmatprep.mubr.f32.mxu1 %v9185_v4 }
  0x6c   : > { %930 = vmatmul.mubr.f32.gmra.mxu0 %v6374_v61 }
  0x6d   : > { %935 = vmatprep.mubr.f32.mxu0 %v9185_v4 }
  0x6e   : > { %1126 = vmatmul.mubr.f32.gmra.mxu1 %v6423_v20 }
  0x6f   : > { %1131 = vmatprep.mubr.f32.mxu1 %v9185_v4 }
  0x70   : > { %938 = vmatmul.mubr.f32.gmra.mxu0 %v6382_v0 }
  0x71   : > { %943 = vmatprep.mubr.f32.mxu0 %v9185_v4 }
  0x72   : > { %1135 = vmatmul.mubr.f32.gmra.mxu1 %v6442_v38 }
  0x73   : > { %1140 = vmatprep.mubr.f32.mxu1 %v9185_v4 }
  0x74   : > { %946 = vmatmul.mubr.f32.gmra.mxu0 %v6408_v14 }
  0x75   : > { %951 = vmatprep.mubr.f32.mxu0 %v9185_v4 }
  0x76   : > { %1144 = vmatmul.mubr.f32.gmra.mxu1 %v6460_v53 }
  0x77   : > { %1149 = vmatprep.mubr.f32.mxu1 %v9185_v4 }
  0x78   : > { %954 = vmatmul.mubr.f32.gmra.mxu0 %v6426_v21 }
  0x79   : > { %959 = vmatprep.mubr.f32.mxu0 %v9185_v4 }
  0x7a   : > { %1153 = vmatmul.mubr.f32.gmra.mxu1 %v6474_v63 }
  0x7b   : > { %1158 = vmatprep.mubr.f32.mxu1 %v9185_v4 }
  0x7c   : > { %962 = vmatmul.mubr.f32.gmra.mxu0 %v6445_v42 }
  0x7d   : > { %967 = vmatprep.mubr.f32.mxu0 %v9185_v4 }
  0x7e   : > { %1162 = vmatmul.mubr.f32.gmra.mxu1 %v6488_v13 }
  0x7f   : > { %1396 = vmatprep.mubr.f32.mxu1 %v9185_v4 }
  0x80   : > { %970 = vmatmul.mubr.f32.gmra.mxu0 %v6463_v56 }
  0x81   : > { %975 = vmatprep.mubr.f32.mxu0 %v9185_v4 }
  0x82   : > { %1398 = vmatmul.mubr.f32.vlgmr.msra.gmra.mxu1 %v6278_v22 }
  0x83   : > { %5665 = vmatpush3.msra.mxu1 %v1719_v37  ;;  %1403 = vmatprep.mubr.f32.mxu1 %v9185_v4 }
  0x84   : > { %978 = vmatmul.mubr.f32.gmra.mxu0 %v6477_v2  ;;  %5746 = vmatprep.subr.mxu1 %v9185_v4 }
  0x85   : > { %1238 = vmatprep.mubr.f32.mxu0 %v9185_v4 }
  0x86   : > { %1405 = vmatmul.mubr.f32.gmra.mxu1 %v6280_v23 }
  0x87   : > { %1410 = vmatprep.mubr.f32.mxu1 %v9185_v4 }
  0x88   : > { %1240 = vmatmul.mubr.f32.vlgmr.msra.gmra.mxu0 %v6278_v22 }
  0x89   : > { %5624 = vmatpush3.msra.mxu0 %v6548_v10  ;;  %1245 = vmatprep.mubr.f32.mxu0 %v9185_v4 }
  0x8a   : > { %1412 = vmatmul.mubr.f32.gmra.mxu1 %v6284_v26  ;;  %5705 = vmatprep.subr.mxu0 %v9185_v4 }
  0x8b   : > { %1417 = vmatprep.mubr.f32.mxu1 %v9185_v4 }
  0x8c   : > { %1247 = vmatmul.mubr.f32.gmra.mxu0 %v6280_v23 }
  0x8d   : > { %1252 = vmatprep.mubr.f32.mxu0 %v9185_v4 }
  0x8e   : > { %1419 = vmatmul.mubr.f32.gmra.mxu1 %v6292_v29 }
  0x8f   : > { %1424 = vmatprep.mubr.f32.mxu1 %v9185_v4 }
  0x90   : > { %1254 = vmatmul.mubr.f32.gmra.mxu0 %v6284_v26 }
  0x91   : > { %1259 = vmatprep.mubr.f32.mxu0 %v9185_v4 }
  0x92   : > { %1426 = vmatmul.mubr.f32.gmra.mxu1 %v6308_v35 }
  0x93   : > { %1431 = vmatprep.mubr.f32.mxu1 %v9185_v4 }
  0x94   : > { %1261 = vmatmul.mubr.f32.gmra.mxu0 %v6292_v29 }
  0x95   : > { %1266 = vmatprep.mubr.f32.mxu0 %v9185_v4 }
  0x96   : > { %1433 = vmatmul.mubr.f32.gmra.mxu1 %v6326_v43 }
  0x97   : > { %1438 = vmatprep.mubr.f32.mxu1 %v9185_v4 }
  0x98   : > { %1268 = vmatmul.mubr.f32.gmra.mxu0 %v6308_v35 }
  0x99   : > { %1273 = vmatprep.mubr.f32.mxu0 %v9185_v4 }
  0x9a   : > { %1440 = vmatmul.mubr.f32.gmra.mxu1 %v6357_v55 }
  0x9b   : > { %1445 = vmatprep.mubr.f32.mxu1 %v9185_v4 }
  0x9c   : > { %1275 = vmatmul.mubr.f32.gmra.mxu0 %v6326_v43 }
  0x9d   : > { %1280 = vmatprep.mubr.f32.mxu0 %v9185_v4 }
  0x9e   : > { %1447 = vmatmul.mubr.f32.gmra.mxu1 %v6363_v57 }
  0x9f   : > { %1452 = vmatprep.mubr.f32.mxu1 %v9185_v4 }
  0xa0   : > { %1282 = vmatmul.mubr.f32.gmra.mxu0 %v6357_v55 }
  0xa1   : > { %1287 = vmatprep.mubr.f32.mxu0 %v9185_v4 }
  0xa2   : > { %1454 = vmatmul.mubr.f32.gmra.mxu1 %v6392_v5 }
  0xa3   : > { %1459 = vmatprep.mubr.f32.mxu1 %v9185_v4 }
  0xa4   : > { %1289 = vmatmul.mubr.f32.gmra.mxu0 %v6363_v57 }
  0xa5   : > { %1294 = vmatprep.mubr.f32.mxu0 %v9185_v4 }
  0xa6   : > { %1461 = vmatmul.mubr.f32.gmra.mxu1 %v6410_v15 }
  0xa7   : > { %1466 = vmatprep.mubr.f32.mxu1 %v9185_v4 }
  0xa8   : > { %1296 = vmatmul.mubr.f32.gmra.mxu0 %v6392_v5 }
  0xa9   : > { %1301 = vmatprep.mubr.f32.mxu0 %v9185_v4 }
  0xaa   : > { %1468 = vmatmul.mubr.f32.gmra.mxu1 %v6428_v24 }
  0xab   : > { %1473 = vmatprep.mubr.f32.mxu1 %v9185_v4 }
  0xac   : > { %1303 = vmatmul.mubr.f32.gmra.mxu0 %v6410_v15 }
  0xad   : > { %1308 = vmatprep.mubr.f32.mxu0 %v9185_v4 }
  0xae   : > { %1475 = vmatmul.mubr.f32.gmra.mxu1 %v6447_v45 }
  0xaf   : > { %1480 = vmatprep.mubr.f32.mxu1 %v9185_v4 }
  0xb0   : > { %1310 = vmatmul.mubr.f32.gmra.mxu0 %v6428_v24 }
  0xb1   : > { %1315 = vmatprep.mubr.f32.mxu0 %v9185_v4 }
  0xb2   : > { %1482 = vmatmul.mubr.f32.gmra.mxu1 %v6452_v48 }
  0xb3   : > { %5666 = vmatprep.mubr.msk.f32.mxu1 %vm6193_vm2, %v9185_v4 }
  0xb4   : > { %1317 = vmatmul.mubr.f32.gmra.mxu0 %v6447_v45 }
  0xb5   : > { %1322 = vmatprep.mubr.f32.mxu0 %v9185_v4 }
  0xb6   : > { %5667 = vmatmul.mubr.f32.vlgmr.msra.gmra.mxu1 %v6278_v22 }
  0xb7   : > { %5747 = vmatpush3.msra.mxu1 %v6548_v10  ;;  %5669 = vmatprep.mubr.msk.f32.mxu1 %vm6193_vm2, %v9185_v4 }
  0xb8   : > { %1324 = vmatmul.mubr.f32.gmra.mxu0 %v6452_v48  ;;  %5828 = vmatprep.subr.mxu1 %v9185_v4 }
  0xb9   : > { %5625 = vmatprep.mubr.msk.f32.mxu0 %vm6193_vm2, %v9185_v4 }
  0xba   : > { %5670 = vmatmul.mubr.f32.gmra.mxu1 %v6280_v23 }
  0xbb   : > { %5672 = vmatprep.mubr.msk.f32.mxu1 %vm6193_vm2, %v9185_v4 }
  0xbc   : > { %5626 = vmatmul.mubr.f32.vlgmr.msra.gmra.mxu0 %v6322_v41 }
  0xbd   : > { %5706 = vmatpush3.msra.mxu0 %v6555_v25  ;;  %5628 = vmatprep.mubr.msk.f32.mxu0 %vm6193_vm2, %v9185_v4 }
  0xbe   : > { %5673 = vmatmul.mubr.f32.gmra.mxu1 %v6284_v26  ;;  %5787 = vmatprep.subr.mxu0 %v9185_v4 }
  0xbf   : > { %5675 = vmatprep.mubr.msk.f32.mxu1 %vm6193_vm2, %v9185_v4 }
  0xc0   : > { %5629 = vmatmul.mubr.f32.gmra.mxu0 %v6329_v44 }
  0xc1   : > { %5631 = vmatprep.mubr.msk.f32.mxu0 %vm6193_vm2, %v9185_v4 }
  0xc2   : > { %5676 = vmatmul.mubr.f32.gmra.mxu1 %v6292_v29 }
  0xc3   : > { %5678 = vmatprep.mubr.msk.f32.mxu1 %vm6193_vm2, %v9185_v4 }
  0xc4   : > { %5632 = vmatmul.mubr.f32.gmra.mxu0 %v6350_v52 }
  0xc5   : > { %5634 = vmatprep.mubr.msk.f32.mxu0 %vm6193_vm2, %v9185_v4 }
  0xc6   : > { %5679 = vmatmul.mubr.f32.gmra.mxu1 %v6308_v35 }
  0xc7   : > { %5681 = vmatprep.mubr.msk.f32.mxu1 %vm6193_vm2, %v9185_v4 }
  0xc8   : > { %5635 = vmatmul.mubr.f32.gmra.mxu0 %v6366_v58 }
  0xc9   : > { %5637 = vmatprep.mubr.msk.f32.mxu0 %vm6193_vm2, %v9185_v4 }
  0xca   : > { %5682 = vmatmul.mubr.f32.gmra.mxu1 %v6326_v43 }
  0xcb   : > { %5684 = vmatprep.mubr.msk.f32.mxu1 %vm6193_vm2, %v9185_v4 }
  0xcc   : > { %5638 = vmatmul.mubr.f32.gmra.mxu0 %v6385_v1 }
  0xcd   : > { %5640 = vmatprep.mubr.msk.f32.mxu0 %vm6193_vm2, %v9185_v4 }
  0xce   : > { %5685 = vmatmul.mubr.f32.gmra.mxu1 %v6357_v55 }
  0xcf   : > { %5687 = vmatprep.mubr.msk.f32.mxu1 %vm6193_vm2, %v9185_v4 }
  0xd0   : > { %5641 = vmatmul.mubr.f32.gmra.mxu0 %v6403_v12 }
  0xd1   : > { %5643 = vmatprep.mubr.msk.f32.mxu0 %vm6193_vm2, %v9185_v4 }
  0xd2   : > { %5688 = vmatmul.mubr.f32.gmra.mxu1 %v6363_v57 }
  0xd3   : > { %5690 = vmatprep.mubr.msk.f32.mxu1 %vm6193_vm2, %v9185_v4 }
  0xd4   : > { %5644 = vmatmul.mubr.f32.gmra.mxu0 %v6420_v19 }
  0xd5   : > { %5646 = vmatprep.mubr.msk.f32.mxu0 %vm6193_vm2, %v9185_v4 }
  0xd6   : > { %5691 = vmatmul.mubr.f32.gmra.mxu1 %v6392_v5 }
  0xd7   : > { %5693 = vmatprep.mubr.msk.f32.mxu1 %vm6193_vm2, %v9185_v4 }
  0xd8   : > { %5647 = vmatmul.mubr.f32.gmra.mxu0 %v6434_v31 }
  0xd9   : > { %5649 = vmatprep.mubr.msk.f32.mxu0 %vm6193_vm2, %v9185_v4 }
  0xda   : > { %v722_v41 = vpop.f32.mrf.mxu1  ;;  %5694 = vmatmul.mubr.f32.gmra.mxu1 %v6410_v15 }
  0xdb   : > { %5696 = vmatprep.mubr.msk.f32.mxu1 %vm6193_vm2, %v9185_v4 }
  0xdc   : > { %v724_v44 = vpop.f32.mrf.mxu1  ;;  %5650 = vmatmul.mubr.f32.gmra.mxu0 %v6455_v49 }
  0xdd   : > { %5652 = vmatprep.mubr.msk.f32.mxu0 %vm6193_vm2, %v9185_v4 }
  0xde   : > { %v729_v52 = vpop.f32.mrf.mxu1  ;;  %5697 = vmatmul.mubr.f32.gmra.mxu1 %v6428_v24 }
  0xdf   : > { %5699 = vmatprep.mubr.msk.f32.mxu1 %vm6193_vm2, %v9185_v4 }
  0xe0   : > { %v731_v58 = vpop.f32.mrf.mxu1  ;;  %v508_v1 = vpop.f32.mrf.mxu0  ;;  %5653 = vmatmul.mubr.f32.gmra.mxu0 %v6469_v59 }
  0xe1   : > { %v6699_v12 = vadd.f32 %v722_v41, %v508_v1  ;;  %5655 = vmatprep.mubr.msk.f32.mxu0 %vm6193_vm2, %v9185_v4 }
  0xe2   : > { %v510_v19 = vpop.f32.mrf.mxu0  ;;  %v736_v31 = vpop.f32.mrf.mxu1  ;;  %5700 = vmatmul.mubr.f32.gmra.mxu1 %v6447_v45 }
  0xe3   : > { %v6704_v49 = vadd.f32 %v724_v44, %v510_v19  ;;  %5702 = vmatprep.mubr.msk.f32.mxu1 %vm6193_vm2, %v9185_v4 }
  0xe4   : > { %v519_v62 = vpop.f32.mrf.mxu0  ;;  %5656 = vmatmul.mubr.f32.gmra.mxu0 %v6483_v7  ;;  %v738_v59 = vpop.f32.mrf.mxu1  ;;  %v6725_v7 = vsub.f32 %v2493_v9, %v6717_v6 }
  0xe5   : > { %v6713_v17 = vadd.f32 %v729_v52, %v519_v62  ;;  %5658 = vmatprep.mubr.msk.f32.mxu0 %vm6193_vm2, %v9185_v4 }
  0xe6   : > { %v521_v8 = vpop.f32.mrf.mxu0  ;;  %v743_v36 = vpop.f32.mrf.mxu1  ;;  %5703 = vmatmul.mubr.f32.gmra.mxu1 %v6452_v48  ;;  %v2740_v1 = vand.u32 4294901760, %v6725_v7 }
  0xe7   : > { %v6720_v37 = vadd.f32 %v731_v58, %v521_v8  ;;  %5748 = vmatprep.mubr.msk.f32.mxu1 %vm6193_vm2, %v9185_v4 }
  0xe8   : > { %v530_v41 = vpop.f32.mrf.mxu0  ;;  %5659 = vmatmul.mubr.f32.gmra.mxu0 %v6494_v16  ;;  %v745_v44 = vpop.f32.mrf.mxu1  ;;  %v2741_v16 = vsub.f32 %v6725_v7, %v2740_v1 }
  0xe9   : > { %v6728_v52 = vadd.f32 %v736_v31, %v530_v41  ;;  %5661 = vmatprep.mubr.msk.f32.mxu0 %vm6193_vm2, %v9185_v4 }
  0xea   : > { %v532_v19 = vpop.f32.mrf.mxu0  ;;  %v750_v58 = vpop.f32.mrf.mxu1  ;;  %5749 = vmatmul.mubr.f32.vlgmr.msra.gmra.mxu1 %v6301_v33  ;;  %v2742_v33 = vand.u32 4294901760, %v2741_v16 }
  0xeb   : > { %v6734_v51 = vadd.f32 %v738_v59, %v532_v19  ;;  %5829 = vmatpush3.msra.mxu1 %v6548_v10  ;;  %5751 = vmatprep.mubr.msk.f32.mxu1 %vm6193_vm2, %v9185_v4 }
  0xec   : > { %v541_v31 = vpop.f32.mrf.mxu0  ;;  %5662 = vmatmul.mubr.f32.gmra.mxu0 %v6502_v18  ;;  %v752_v62 = vpop.f32.mrf.mxu1  ;;  %2743 = vmatprep.subr.mxu1 %v2742_v33 }
  0xed   : > { %v6743_v9 = vadd.f32 %v743_v36, %v541_v31  ;;  %5707 = vmatprep.mubr.msk.f32.mxu0 %vm6193_vm2, %v9185_v4 }
  0xee   : > { %v543_v59 = vpop.f32.mrf.mxu0  ;;  %v757_v8 = vpop.f32.mrf.mxu1  ;;  %5752 = vmatmul.mubr.f32.gmra.mxu1 %v6306_v34 }
  0xef   : > { %v6748_v10 = vadd.f32 %v745_v44, %v543_v59  ;;  %5754 = vmatprep.mubr.msk.f32.mxu1 %vm6193_vm2, %v9185_v4 }
  0xf0   : > { %v552_v41 = vpop.f32.mrf.mxu0  ;;  %5708 = vmatmul.mubr.f32.vlgmr.msra.gmra.mxu0 %v6287_v27  ;;  %v759_v18 = vpop.f32.mrf.mxu1 }
  0xf1   : > { %v6753_v36 = vadd.f32 %v750_v58, %v552_v41  ;;  %5788 = vmatpush3.msra.mxu0 %v1717_v30  ;;  %5710 = vmatprep.mubr.msk.f32.mxu0 %vm6193_vm2, %v9185_v4 }
  0xf2   : > { %v554_v19 = vpop.f32.mrf.mxu0  ;;  %v764_v34 = vpop.f32.mrf.mxu1  ;;  %5755 = vmatmul.mubr.f32.gmra.mxu1 %v6316_v39  ;;  %2529 = vmatprep.subr.mxu0 %v6717_v6 }
  0xf3   : > { %v6761_v44 = vadd.f32 %v752_v62, %v554_v19  ;;  %5757 = vmatprep.mubr.msk.f32.mxu1 %vm6193_vm2, %v9185_v4 }
  0xf4   : > { %v563_v27 = vpop.f32.mrf.mxu0  ;;  %5711 = vmatmul.mubr.f32.gmra.mxu0 %v6290_v28  ;;  %v766_v58 = vpop.f32.mrf.mxu1 }
  0xf5   : > { %v6766_v25 = vadd.f32 %v757_v8, %v563_v27  ;;  %5713 = vmatprep.mubr.msk.f32.mxu0 %vm6193_vm2, %v9185_v4 }
  0xf6   : > { %v565_v30 = vpop.f32.mrf.mxu0  ;;  %v771_v16 = vpop.f32.mrf.mxu1  ;;  %5758 = vmatmul.mubr.f32.gmra.mxu1 %v6334_v46 }
  0xf7   : > { %v6771_v39 = vadd.f32 %v759_v18, %v565_v30  ;;  %5760 = vmatprep.mubr.msk.f32.mxu1 %vm6193_vm2, %v9185_v4 }
  0xf8   : > { %v574_v31 = vpop.f32.mrf.mxu0  ;;  %5714 = vmatmul.mubr.f32.gmra.mxu0 %v6298_v32  ;;  %v773_v62 = vpop.f32.mrf.mxu1 }
  0xf9   : > { %v6776_v28 = vadd.f32 %v764_v34, %v574_v31  ;;  %5716 = vmatprep.mubr.msk.f32.mxu0 %vm6193_vm2, %v9185_v4 }
  0xfa   : > { %v576_v33 = vpop.f32.mrf.mxu0  ;;  %v778_v59 = vpop.f32.mrf.mxu1  ;;  %5761 = vmatmul.mubr.f32.gmra.mxu1 %v6355_v54 }
  0xfb   : > { %v6781_v8 = vadd.f32 %v766_v58, %v576_v33  ;;  %5763 = vmatprep.mubr.msk.f32.mxu1 %vm6193_vm2, %v9185_v4 }
  0xfc   : > { %v585_v46 = vpop.f32.mrf.mxu0  ;;  %5717 = vmatmul.mubr.f32.gmra.mxu0 %v6319_v40  ;;  %v780_v41 = vpop.f32.mrf.mxu1 }
  0xfd   : > { %v6786_v32 = vadd.f32 %v771_v16, %v585_v46  ;;  %5719 = vmatprep.mubr.msk.f32.mxu0 %vm6193_vm2, %v9185_v4 }
  0xfe   : > { %v587_v18 = vpop.f32.mrf.mxu0  ;;  %v785_v19 = vpop.f32.mrf.mxu1  ;;  %5764 = vmatmul.mubr.f32.gmra.mxu1 %v6371_v60 }
  0xff   : > { %v6791_v34 = vadd.f32 %v773_v62, %v587_v18  ;;  %5766 = vmatprep.mubr.msk.f32.mxu1 %vm6193_vm2, %v9185_v4  ;;  %v382_v62 = vld [vmem:[%s9103_s3] sm:$0x1f] }
 0x100   : > { %v596_v54 = vpop.f32.mrf.mxu0  ;;  %5720 = vmatmul.mubr.f32.gmra.mxu0 %v6337_v47  ;;  %v787_v27 = vpop.f32.mrf.mxu1 }
 0x101   : > { %v6796_v40 = vadd.f32 %v778_v59, %v596_v54  ;;  %5722 = vmatprep.mubr.msk.f32.mxu0 %vm6193_vm2, %v9185_v4 }
 0x102   : > { %v598_v58 = vpop.f32.mrf.mxu0  ;;  %v792_v30 = vpop.f32.mrf.mxu1  ;;  %5767 = vmatmul.mubr.f32.gmra.mxu1 %v6390_v3 }
 0x103   : > { %v6801_v16 = vadd.f32 %v780_v41, %v598_v58  ;;  %5769 = vmatprep.mubr.msk.f32.mxu1 %vm6193_vm2, %v9185_v4  ;;  %v2490_v41 = vsel %vm425_vm0, %v382_v62, 0 }
 0x104   : > { %v607_v60 = vpop.f32.mrf.mxu0  ;;  %5723 = vmatmul.mubr.f32.gmra.mxu0 %v6346_v50  ;;  %v794_v31 = vpop.f32.mrf.mxu1 }
 0x105   : > { %v6806_v47 = vadd.f32 %v785_v19, %v607_v60  ;;  %5725 = vmatprep.mubr.msk.f32.mxu0 %vm6193_vm2, %v9185_v4 }
 0x106   : > { %v609_v33 = vpop.f32.mrf.mxu0  ;;  %v799_v3 = vpop.f32.mrf.mxu1  ;;  %5770 = vmatmul.mubr.f32.gmra.mxu1 %v6400_v11 }
 0x107   : > { %v6814_v59 = vadd.f32 %v787_v27, %v609_v33  ;;  %5772 = vmatprep.mubr.msk.f32.mxu1 %vm6193_vm2, %v9185_v4  ;;  %v6829_v27 = vand.u32 4294901760, %v2490_v41 }
 0x108   : > { %v618_v50 = vpop.f32.mrf.mxu0  ;;  %5726 = vmatmul.mubr.f32.gmra.mxu0 %v6374_v61  ;;  %v801_v46 = vpop.f32.mrf.mxu1 }
 0x109   : > { %v6820_v18 = vadd.f32 %v792_v30, %v618_v50  ;;  %5728 = vmatprep.mubr.msk.f32.mxu0 %vm6193_vm2, %v9185_v4 }
 0x10a   : > { %v620_v19 = vpop.f32.mrf.mxu0  ;;  %v806_v54 = vpop.f32.mrf.mxu1  ;;  %5773 = vmatmul.mubr.f32.gmra.mxu1 %v6423_v20 }
 0x10b   : > { %v6825_v11 = vadd.f32 %v794_v31, %v620_v19  ;;  %5775 = vmatprep.mubr.msk.f32.mxu1 %vm6193_vm2, %v9185_v4  ;;  %v6842_v31 = vsub.f32 %v2490_v41, %v6829_v27 }
 0x10c   : > { %v629_v61 = vpop.f32.mrf.mxu0  ;;  %5729 = vmatmul.mubr.f32.gmra.mxu0 %v6382_v0  ;;  %v808_v58 = vpop.f32.mrf.mxu1 }
 0x10d   : > { %v6832_v30 = vadd.f32 %v799_v3, %v629_v61  ;;  %5731 = vmatprep.mubr.msk.f32.mxu0 %vm6193_vm2, %v9185_v4 }
 0x10e   : > { %v631_v60 = vpop.f32.mrf.mxu0  ;;  %v1055_v62 = vpop.f32.mrf.mxu1  ;;  %5776 = vmatmul.mubr.f32.gmra.mxu1 %v6442_v38 }
 0x10f   : > { %v6837_v20 = vadd.f32 %v801_v46, %v631_v60  ;;  %5778 = vmatprep.mubr.msk.f32.mxu1 %vm6193_vm2, %v9185_v4  ;;  %v9105_v46 = vand.u32 4294901760, %v6842_v31 }
 0x110   : > { %v640_v33 = vpop.f32.mrf.mxu0  ;;  %5732 = vmatmul.mubr.f32.gmra.mxu0 %v6408_v14  ;;  %v1057_v0 = vpop.f32.mrf.mxu1 }
 0x111   : > { %v6845_v3 = vadd.f32 %v806_v54, %v640_v33  ;;  %5734 = vmatprep.mubr.msk.f32.mxu0 %vm6193_vm2, %v9185_v4 }
 0x112   : > { %v642_v50 = vpop.f32.mrf.mxu0  ;;  %v1064_v19 = vpop.f32.mrf.mxu1  ;;  %5779 = vmatmul.mubr.f32.gmra.mxu1 %v6460_v53 }
 0x113   : > { %v6850_v38 = vadd.f32 %v808_v58, %v642_v50  ;;  %5781 = vmatprep.mubr.msk.f32.mxu1 %vm6193_vm2, %v9185_v4 }
 0x114   : > { %v883_v41 = vpop.f32.mrf.mxu0  ;;  %5735 = vmatmul.mubr.f32.gmra.mxu0 %v6426_v21  ;;  %v1066_v14 = vpop.f32.mrf.mxu1  ;;  %v2747_v21 = vsub.f32 %v6842_v31, %v9105_v46 }
 0x115   : > { %v884_v54 = vadd.f32 %v883_v41, %v6699_v12  ;;  %5737 = vmatprep.mubr.msk.f32.mxu0 %vm6193_vm2, %v9185_v4 }
 0x116   : > { %v885_v61 = vpop.f32.mrf.mxu0  ;;  %v1073_v60 = vpop.f32.mrf.mxu1  ;;  %5782 = vmatmul.mubr.f32.gmra.mxu1 %v6474_v63 }
 0x117   : > { %v6860_v53 = vadd.f32 %v1055_v62, %v884_v54  ;;  %v886_v58 = vadd.f32 %v885_v61, %v6704_v49  ;;  %5784 = vmatprep.mubr.msk.f32.mxu1 %vm6193_vm2, %v9185_v4 }
 0x118   : > { %v891_v33 = vpop.f32.mrf.mxu0  ;;  %5738 = vmatmul.mubr.f32.gmra.mxu0 %v6445_v42  ;;  %v1075_v12 = vpop.f32.mrf.mxu1  ;;  %v2748_v42 = vand.u32 4294901760, %v2747_v21 }
 0x119   : > { %v6869_v50 = vadd.f32 %v1057_v0, %v886_v58  ;;  %v892_v41 = vadd.f32 %v891_v33, %v6713_v17  ;;  %5740 = vmatprep.mubr.msk.f32.mxu0 %vm6193_vm2, %v9185_v4 }
 0x11a   : > { %v893_v63 = vpop.f32.mrf.mxu0  ;;  %v1082_v49 = vpop.f32.mrf.mxu1  ;;  %5785 = vmatmul.mubr.f32.gmra.mxu1 %v6488_v13 }
 0x11b   : > { %v6875_v62 = vadd.f32 %v1064_v19, %v892_v41  ;;  %v894_v54 = vadd.f32 %v893_v63, %v6720_v37  ;;  %5830 = vmatprep.mubr.msk.f32.mxu1 %vm6193_vm2, %v9185_v4 }
 0x11c   : > { %v899_v61 = vpop.f32.mrf.mxu0  ;;  %5741 = vmatmul.mubr.f32.gmra.mxu0 %v6463_v56  ;;  %v1084_v0 = vpop.f32.mrf.mxu1 }
 0x11d   : > { %v6881_v17 = vadd.f32 %v1066_v14, %v894_v54  ;;  %v900_v58 = vadd.f32 %v899_v61, %v6728_v52  ;;  %5743 = vmatprep.mubr.msk.f32.mxu0 %vm6193_vm2, %v9185_v4 }
 0x11e   : > { %v901_v13 = vpop.f32.mrf.mxu0  ;;  %v1091_v19 = vpop.f32.mrf.mxu1  ;;  %5831 = vmatmul.mubr.f32.vlgmr.msra.gmra.mxu1 %v6278_v22 }
 0x11f   : > { %v6887_v37 = vadd.f32 %v1073_v60, %v900_v58  ;;  %v902_v33 = vadd.f32 %v901_v13, %v6734_v51  ;;  %5833 = vmatprep.mubr.msk.f32.mxu1 %vm6193_vm2, %v9185_v4  ;;  %2749 = vmatpush1.msra.mxu1 %v2748_v42 }
 0x120   : > { %v907_v56 = vpop.f32.mrf.mxu0  ;;  %5744 = vmatmul.mubr.f32.gmra.mxu0 %v6477_v2  ;;  %v1093_v14 = vpop.f32.mrf.mxu1  ;;  %3078 = vmatprep.subr.mxu1 %v6717_v6 }
 0x121   : > { %v6894_v52 = vadd.f32 %v1075_v12, %v902_v33  ;;  %v908_v21 = vadd.f32 %v907_v56, %v6743_v9  ;;  %5789 = vmatprep.mubr.msk.f32.mxu0 %vm6193_vm2, %v9185_v4 }
 0x122   : > { %v909_v60 = vpop.f32.mrf.mxu0  ;;  %v1100_v41 = vpop.f32.mrf.mxu1  ;;  %5834 = vmatmul.mubr.f32.gmra.mxu1 %v6280_v23 }
 0x123   : > { %v6900_v51 = vadd.f32 %v1082_v49, %v908_v21  ;;  %v910_v63 = vadd.f32 %v909_v60, %v6748_v10  ;;  %5836 = vmatprep.mubr.msk.f32.mxu1 %vm6193_vm2, %v9185_v4 }
 0x124   : > { %v915_v2 = vpop.f32.mrf.mxu0  ;;  %5790 = vmatmul.mubr.f32.vlgmr.msra.gmra.mxu0 %v6278_v22  ;;  %v1102_v12 = vpop.f32.mrf.mxu1 }
 0x125   : > { %v6906_v54 = vadd.f32 %v1084_v0, %v910_v63  ;;  %v916_v9 = vadd.f32 %v915_v2, %v6753_v36  ;;  %5792 = vmatprep.mubr.msk.f32.mxu0 %vm6193_vm2, %v9185_v4  ;;  %2531 = vmatpush1.msra.mxu0 %v6829_v27 }
 0x126   : > { %v917_v49 = vpop.f32.mrf.mxu0  ;;  %v1109_v42 = vpop.f32.mrf.mxu1  ;;  %5837 = vmatmul.mubr.f32.gmra.mxu1 %v6284_v26  ;;  %2906 = vmatprep.subr.mxu0 %v6725_v7 }
 0x127   : > { %v6914_v10 = vadd.f32 %v1091_v19, %v916_v9  ;;  %v918_v22 = vadd.f32 %v917_v49, %v6761_v44  ;;  %5839 = vmatprep.mubr.msk.f32.mxu1 %vm6193_vm2, %v9185_v4 }
 0x128   : > { %v923_v61 = vpop.f32.mrf.mxu0  ;;  %5793 = vmatmul.mubr.f32.gmra.mxu0 %v6280_v23  ;;  %v1111_v36 = vpop.f32.mrf.mxu1 }
 0x129   : > { %v6920_v0 = vadd.f32 %v1093_v14, %v918_v22  ;;  %v924_v58 = vadd.f32 %v923_v61, %v6766_v25  ;;  %5795 = vmatprep.mubr.msk.f32.mxu0 %vm6193_vm2, %v9185_v4 }
 0x12a   : > { %v925_v13 = vpop.f32.mrf.mxu0  ;;  %v1118_v33 = vpop.f32.mrf.mxu1  ;;  %5840 = vmatmul.mubr.f32.gmra.mxu1 %v6292_v29 }
 0x12b   : > { %v6926_v19 = vadd.f32 %v1100_v41, %v924_v58  ;;  %v926_v44 = vadd.f32 %v925_v13, %v6771_v39  ;;  %5842 = vmatprep.mubr.msk.f32.mxu1 %vm6193_vm2, %v9185_v4 }
 0x12c   : > { %v931_v23 = vpop.f32.mrf.mxu0  ;;  %5796 = vmatmul.mubr.f32.gmra.mxu0 %v6284_v26  ;;  %v1120_v56 = vpop.f32.mrf.mxu1 }
 0x12d   : > { %v6932_v14 = vadd.f32 %v1102_v12, %v926_v44  ;;  %v932_v25 = vadd.f32 %v931_v23, %v6776_v28  ;;  %5798 = vmatprep.mubr.msk.f32.mxu0 %vm6193_vm2, %v9185_v4 }
 0x12e   : > { %v933_v21 = vpop.f32.mrf.mxu0  ;;  %v1127_v60 = vpop.f32.mrf.mxu1  ;;  %5843 = vmatmul.mubr.f32.gmra.mxu1 %v6308_v35 }
 0x12f   : > { %v6938_v41 = vadd.f32 %v1109_v42, %v932_v25  ;;  %v934_v39 = vadd.f32 %v933_v21, %v6781_v8  ;;  %5845 = vmatprep.mubr.msk.f32.mxu1 %vm6193_vm2, %v9185_v4 }
 0x130   : > { %v939_v26 = vpop.f32.mrf.mxu0  ;;  %5799 = vmatmul.mubr.f32.gmra.mxu0 %v6292_v29  ;;  %v1129_v63 = vpop.f32.mrf.mxu1 }
 0x131   : > { %v6944_v2 = vadd.f32 %v1111_v36, %v934_v39  ;;  %v940_v28 = vadd.f32 %v939_v26, %v6786_v32  ;;  %5801 = vmatprep.mubr.msk.f32.mxu0 %vm6193_vm2, %v9185_v4 }
 0x132   : > { %v941_v12 = vpop.f32.mrf.mxu0  ;;  %v1136_v9 = vpop.f32.mrf.mxu1  ;;  %5846 = vmatmul.mubr.f32.gmra.mxu1 %v6326_v43 }
 0x133   : > { %v6950_v49 = vadd.f32 %v1118_v33, %v940_v28  ;;  %v942_v8 = vadd.f32 %v941_v12, %v6791_v34  ;;  %5848 = vmatprep.mubr.msk.f32.mxu1 %vm6193_vm2, %v9185_v4 }
 0x134   : > { %v947_v29 = vpop.f32.mrf.mxu0  ;;  %5802 = vmatmul.mubr.f32.gmra.mxu0 %v6308_v35  ;;  %v1138_v42 = vpop.f32.mrf.mxu1 }
 0x135   : > { %v6956_v22 = vadd.f32 %v1120_v56, %v942_v8  ;;  %v948_v32 = vadd.f32 %v947_v29, %v6796_v40  ;;  %5804 = vmatprep.mubr.msk.f32.mxu0 %vm6193_vm2, %v9185_v4 }
 0x136   : > { %v949_v61 = vpop.f32.mrf.mxu0  ;;  %v1145_v36 = vpop.f32.mrf.mxu1  ;;  %5849 = vmatmul.mubr.f32.gmra.mxu1 %v6357_v55 }
 0x137   : > { %v6962_v34 = vadd.f32 %v1127_v60, %v948_v32  ;;  %v950_v58 = vadd.f32 %v949_v61, %v6801_v16  ;;  %5851 = vmatprep.mubr.msk.f32.mxu1 %vm6193_vm2, %v9185_v4 }
 0x138   : > { %v955_v35 = vpop.f32.mrf.mxu0  ;;  %5805 = vmatmul.mubr.f32.gmra.mxu0 %v6326_v43  ;;  %v1147_v13 = vpop.f32.mrf.mxu1 }
 0x139   : > { %v6968_v40 = vadd.f32 %v1129_v63, %v950_v58  ;;  %v956_v33 = vadd.f32 %v955_v35, %v6806_v47  ;;  %5807 = vmatprep.mubr.msk.f32.mxu0 %vm6193_vm2, %v9185_v4 }
 0x13a   : > { %v957_v44 = vpop.f32.mrf.mxu0  ;;  %v1154_v23 = vpop.f32.mrf.mxu1  ;;  %5852 = vmatmul.mubr.f32.gmra.mxu1 %v6363_v57 }
 0x13b   : > { %v6981_v43 = vadd.f32 %v1136_v9, %v956_v33  ;;  %v958_v16 = vadd.f32 %v957_v44, %v6814_v59  ;;  %5854 = vmatprep.mubr.msk.f32.mxu1 %vm6193_vm2, %v9185_v4  ;;  %v359_v59 = vld [vmem:[%s6979_s10] sm:$0xff]  ;;  %v361_v33 = vld [vmem:[%s6979_s10 + $0x10] sm:$0xff] }
 0x13c   : > { %v963_v47 = vpop.f32.mrf.mxu0  ;;  %5808 = vmatmul.mubr.f32.gmra.mxu0 %v6357_v55  ;;  %v1156_v56 = vpop.f32.mrf.mxu1  ;;  %v2451_v9 = vsel %vm385_vm1, %v359_v59, 0 }
 0x13d   : > { %v6987_v25 = vadd.f32 %v1138_v42, %v958_v16  ;;  %v964_v21 = vadd.f32 %v963_v47, %v6820_v18  ;;  %5810 = vmatprep.mubr.msk.f32.mxu0 %vm6193_vm2, %v9185_v4  ;;  %v7014_v61 = vand.u32 4294901760, %v2451_v9 }
 0x13e   : > { %v965_v60 = vpop.f32.mrf.mxu0  ;;  %v1163_v39 = vpop.f32.mrf.mxu1  ;;  %5855 = vmatmul.mubr.f32.gmra.mxu1 %v6392_v5 }
 0x13f   : > { %v6994_v26 = vadd.f32 %v1145_v36, %v964_v21  ;;  %v966_v63 = vadd.f32 %v965_v60, %v6825_v11  ;;  %5857 = vmatprep.mubr.msk.f32.mxu1 %vm6193_vm2, %v9185_v4  ;;  %v360_v11 = vld [vmem:[%s6979_s10 + $0x8] sm:$0xff]  ;;  %v7031_v16 = vsub.f32 %v2451_v9, %v7014_v61  ;;  %v362_v60 = vld [vmem:[%s6979_s10 + $0x18] sm:$0xff] }
 0x140   : > { %v971_v55 = vpop.f32.mrf.mxu0  ;;  %5811 = vmatmul.mubr.f32.gmra.mxu0 %v6363_v57  ;;  %v1165_v18 = vpop.f32.mrf.mxu1  ;;  %v2454_v35 = vsel %vm385_vm1, %v360_v11, 0  ;;  %v363_v11 = vld [vmem:[%s6979_s10 + $0x20] sm:$0xff] }
 0x141   : > { %v7000_v28 = vadd.f32 %v1147_v13, %v966_v63  ;;  %v972_v12 = vadd.f32 %v971_v55, %v6832_v30  ;;  %5813 = vmatprep.mubr.msk.f32.mxu0 %vm6193_vm2, %v9185_v4  ;;  %9226 = vst [vmem:[#allocation4_spill] sm:$0xff] %v7031_v16  ;;  %v7033_v47 = vand.u32 4294901760, %v2454_v35 }
 0x142   : > { %v973_v8 = vpop.f32.mrf.mxu0  ;;  %v1399_v29 = vpop.f32.mrf.mxu1  ;;  %5858 = vmatmul.mubr.f32.gmra.mxu1 %v6410_v15 }
 0x143   : > { %v7008_v42 = vadd.f32 %v1154_v23, %v972_v12  ;;  %v974_v57 = vadd.f32 %v973_v8, %v6837_v20  ;;  %5860 = vmatprep.mubr.msk.f32.mxu1 %vm6193_vm2, %v9185_v4  ;;  %v7053_v12 = vsub.f32 %v2454_v35, %v7033_v47  ;;  %v2460_v8 = vsel %vm385_vm1, %v362_v60, 0  ;;  %v364_v60 = vld [vmem:[%s6979_s10 + $0x28] sm:$0xff] }
 0x144   : > { %v979_v32 = vpop.f32.mrf.mxu0  ;;  %5814 = vmatmul.mubr.f32.gmra.mxu0 %v6392_v5  ;;  %v1401_v30 = vpop.f32.mrf.mxu1  ;;  %v7069_v35 = vand.u32 4294901760, %v2460_v8 }
 0x145   : > { %v7016_v36 = vadd.f32 %v1156_v56, %v974_v57  ;;  %v980_v58 = vadd.f32 %v979_v32, %v6845_v3  ;;  %5816 = vmatprep.mubr.msk.f32.mxu0 %vm6193_vm2, %v9185_v4  ;;  %9228 = vst [vmem:[#allocation6_spill] sm:$0xff] %v7053_v12 }
 0x146   : > { %v981_v13 = vpop.f32.mrf.mxu0  ;;  %v1406_v20 = vpop.f32.mrf.mxu1  ;;  %5861 = vmatmul.mubr.f32.gmra.mxu1 %v6428_v24 }
 0x147   : > { %v7024_v44 = vadd.f32 %v1163_v39, %v980_v58  ;;  %v982_v5 = vadd.f32 %v981_v13, %v6850_v38  ;;  %5863 = vmatprep.mubr.msk.f32.mxu1 %vm6193_vm2, %v9185_v4  ;;  %v2457_v38 = vsel %vm385_vm1, %v361_v33, 0  ;;  %v7075_v33 = vand.u32 4294901760, %v7053_v12 }
 0x148   : > { %v1241_v23 = vpop.f32.mrf.mxu0  ;;  %5817 = vmatmul.mubr.f32.gmra.mxu0 %v6410_v15  ;;  %v1408_v3 = vpop.f32.mrf.mxu1  ;;  %v7055_v9 = vand.u32 4294901760, %v2457_v38 }
 0x149   : > { %v7035_v56 = vadd.f32 %v1165_v18, %v982_v5  ;;  %v1242_v21 = vadd.f32 %v1241_v23, %v6860_v53  ;;  %5819 = vmatprep.mubr.msk.f32.mxu0 %vm6193_vm2, %v9185_v4  ;;  %v7050_v18 = vand.u32 4294901760, %v7031_v16  ;;  %9230 = vst [vmem:[#allocation8_spill] sm:$0xff] %v7075_v33 }
 0x14a   : > { %v1243_v39 = vpop.f32.mrf.mxu0  ;;  %v1413_v59 = vpop.f32.mrf.mxu1  ;;  %5864 = vmatmul.mubr.f32.gmra.mxu1 %v6447_v45 }
 0x14b   : > { %v7043_v15 = vadd.f32 %v1399_v29, %v1242_v21  ;;  %v1244_v63 = vadd.f32 %v1243_v39, %v6869_v50  ;;  %5866 = vmatprep.mubr.msk.f32.mxu1 %vm6193_vm2, %v9185_v4  ;;  %9227 = vst [vmem:[#allocation5_spill] sm:$0xff] %v7050_v18  ;;  %v2568_v13 = vsub.f32 %v7031_v16, %v7050_v18 }
 0x14c   : > { %v1248_v55 = vpop.f32.mrf.mxu0  ;;  %5820 = vmatmul.mubr.f32.gmra.mxu0 %v6428_v24  ;;  %v1415_v53 = vpop.f32.mrf.mxu1 }
 0x14d   : > { %v7058_v29 = vadd.f32 %v1401_v30, %v1244_v63  ;;  %v1249_v50 = vadd.f32 %v1248_v55, %v6875_v62  ;;  %5822 = vmatprep.mubr.msk.f32.mxu0 %vm6193_vm2, %v9185_v4 }
 0x14e   : > { %v1250_v24 = vpop.f32.mrf.mxu0  ;;  %v1420_v57 = vpop.f32.mrf.mxu1  ;;  %5867 = vmatmul.mubr.f32.gmra.mxu1 %v6452_v48 }
 0x14f   : > { %v7065_v32 = vadd.f32 %v1406_v20, %v1249_v50  ;;  %v1251_v58 = vadd.f32 %v1250_v24, %v6881_v17  ;;  %2782 = vmatprep.mubr.f32.mxu1 %v9185_v4  ;;  %v7078_v20 = vsub.f32 %v2457_v38, %v7055_v9  ;;  %v2463_v17 = vsel %vm385_vm1, %v363_v11, 0 }
 0x150   : > { %v1255_v30 = vpop.f32.mrf.mxu0  ;;  %5823 = vmatmul.mubr.f32.gmra.mxu0 %v6447_v45  ;;  %v1422_v62 = vpop.f32.mrf.mxu1  ;;  %v7093_v38 = vsub.f32 %v2460_v8, %v7069_v35  ;;  %v7099_v50 = vand.u32 4294901760, %v2568_v13  ;;  %v2466_v24 = vsel %vm385_vm1, %v364_v60, 0 }
 0x151   : > { %9229 = vst [vmem:[#allocation7_spill] sm:$0xff] %v7065_v32  ;;  %9231 = vst [vmem:[#allocation9_spill] sm:$0xff] %v7078_v20  ;;  %v7081_v5 = vadd.f32 %v1408_v3, %v1251_v58  ;;  %v1256_v23 = vadd.f32 %v1255_v30, %v6887_v37  ;;  %5825 = vmatprep.mubr.msk.f32.mxu0 %vm6193_vm2, %v9185_v4  ;;  %v7095_v3 = vand.u32 4294901760, %v2463_v17  ;;  %v365_v30 = vld [vmem:[%s6979_s10 + $0x30] sm:$0xff] }
 0x152   : > { %v1257_v45 = vpop.f32.mrf.mxu0  ;;  %v1427_v21 = vpop.f32.mrf.mxu1  ;;  %2784 = vmatmul.mubr.f32.vlgmr.msra.gmra.mxu1 %v7014_v61  ;;  %9234 = vst [vmem:[#allocation12_spill] sm:$0xff] %v7093_v38  ;;  %9235 = vst [vmem:[#allocation13_spill] sm:$0xff] %v7099_v50 }
 0x153   : > { %9232 = vst [vmem:[#allocation10_spill] sm:$0xff] %v7081_v5  ;;  %v7088_v39 = vadd.f32 %v1413_v59, %v1256_v23  ;;  %v1258_v63 = vadd.f32 %v1257_v45, %v6894_v52  ;;  %2789 = vmatprep.mubr.f32.mxu1 %v9185_v4  ;;  %3080 = vmatpush1.msra.mxu1 %v6829_v27  ;;  %v7104_v52 = vand.u32 4294901760, %v7078_v20 }
 0x154   : > { %v1262_v37 = vpop.f32.mrf.mxu0  ;;  %5826 = vmatmul.mubr.f32.gmra.mxu0 %v6452_v48  ;;  %v1429_v55 = vpop.f32.mrf.mxu1  ;;  %v2579_v59 = vsub.f32 %v7053_v12, %v7075_v33  ;;  %3424 = vmatprep.subr.mxu1 %v6717_v6  ;;  %v7119_v6 = vand.u32 4294901760, %v7093_v38 }
 0x155   : > { %9233 = vst [vmem:[#allocation11_spill] sm:$0xff] %v7088_v39  ;;  %9236 = vst [vmem:[#allocation14_spill] sm:$0xff] %v7104_v52  ;;  %v7107_v8 = vadd.f32 %v1415_v53, %v1258_v63  ;;  %v1263_v11 = vadd.f32 %v1262_v37, %v6900_v51  ;;  %2564 = vmatprep.mubr.f32.mxu0 %v9185_v4  ;;  %v7122_v51 = vsub.f32 %v2463_v17, %v7095_v3 }
 0x156   : > { %v1264_v48 = vpop.f32.mrf.mxu0  ;;  %v1434_v58 = vpop.f32.mrf.mxu1  ;;  %2791 = vmatmul.mubr.f32.gmra.mxu1 %v7033_v47  ;;  %9239 = vst [vmem:[#allocation17_spill] sm:$0xff] %v7119_v6  ;;  %v7125_v60 = vand.u32 4294901760, %v2579_v59  ;;  %v7129_v63 = vand.u32 4294901760, %v2466_v24  ;;  %v2469_v17 = vsel %vm385_vm1, %v365_v30, 0  ;;  %v366_v59 = vld [vmem:[%s6979_s10 + $0x38] sm:$0xff] }
 0x157   : > { %9237 = vst [vmem:[#allocation15_spill] sm:$0xff] %v7107_v8  ;;  %v7114_v13 = vadd.f32 %v1420_v57, %v1263_v11  ;;  %v1265_v23 = vadd.f32 %v1264_v48, %v6906_v54  ;;  %2796 = vmatprep.mubr.f32.mxu1 %v9185_v4  ;;  %9240 = vst [vmem:[#allocation18_spill] sm:$0xff] %v7122_v51  ;;  %v2590_v57 = vsub.f32 %v7078_v20, %v7104_v52 }
 0x158   : > { %v1269_v53 = vpop.f32.mrf.mxu0  ;;  %v1436_v45 = vpop.f32.mrf.mxu1  ;;  %2570 = vmatmul.mubr.f32.vlgmr.msra.gmra.mxu0 %v7099_v50  ;;  %9241 = vst [vmem:[#allocation19_spill] sm:$0xff] %v7125_v60  ;;  %v7148_v30 = vand.u32 4294901760, %v7122_v51  ;;  %v7154_v7 = vsub.f32 %v2466_v24, %v7129_v63 }
 0x159   : > { %9238 = vst [vmem:[#allocation16_spill] sm:$0xff] %v7114_v13  ;;  %v7131_v54 = vadd.f32 %v1422_v62, %v1265_v23  ;;  %v1270_v37 = vadd.f32 %v1269_v53, %v6914_v10  ;;  %2575 = vmatprep.mubr.f32.mxu0 %v9185_v4  ;;  %2909 = vmatpush1.msra.mxu0 %v6842_v31  ;;  %v7151_v50 = vand.u32 4294901760, %v2590_v57 }
 0x15a   : > { %v1271_v11 = vpop.f32.mrf.mxu0  ;;  %v1441_v48 = vpop.f32.mrf.mxu1  ;;  %2798 = vmatmul.mubr.f32.gmra.mxu1 %v7055_v9  ;;  %3264 = vmatprep.subr.mxu0 %v2740_v1  ;;  %v2601_v10 = vsub.f32 %v7093_v38, %v7119_v6  ;;  %9244 = vst [vmem:[#allocation22_spill] sm:$0xff] %v7148_v30  ;;  %9246 = vst [vmem:[#allocation24_spill] sm:$0xff] %v7154_v7  ;;  %v7156_v1 = vand.u32 4294901760, %v2469_v17 }
 0x15b   : > { %9242 = vst [vmem:[#allocation20_spill] sm:$0xff] %v7131_v54  ;;  %v7141_v46 = vadd.f32 %v1427_v21, %v1270_v37  ;;  %v1272_v62 = vadd.f32 %v1271_v11, %v6920_v0  ;;  %2803 = vmatprep.mubr.f32.mxu1 %v9185_v4  ;;  %9245 = vst [vmem:[#allocation23_spill] sm:$0xff] %v7151_v50  ;;  %v2472_v37 = vsel %vm385_vm1, %v366_v59, 0  ;;  %v367_v11 = vld [vmem:[%s6979_s10 + $0x40] sm:$0xff]  ;;  %v7175_v59 = vand.u32 4294901760, %v7154_v7 }
 0x15c   : > { %v1276_v23 = vpop.f32.mrf.mxu0  ;;  %v1443_v53 = vpop.f32.mrf.mxu1  ;;  %2581 = vmatmul.mubr.f32.gmra.mxu0 %v7125_v60  ;;  %v7168_v60 = vand.u32 4294901760, %v2601_v10 }
 0x15d   : > { %9243 = vst [vmem:[#allocation21_spill] sm:$0xff] %v7141_v46  ;;  %v7158_v0 = vadd.f32 %v1429_v55, %v1272_v62  ;;  %v1277_v21 = vadd.f32 %v1276_v23, %v6926_v19  ;;  %2586 = vmatprep.mubr.f32.mxu0 %v9185_v4  ;;  %v2612_v55 = vsub.f32 %v7122_v51, %v7148_v30  ;;  %9250 = vst [vmem:[#allocation28_spill] sm:$0xff] %v7175_v59 }
 0x15e   : > { %v1278_v46 = vpop.f32.mrf.mxu0  ;;  %v1448_v13 = vpop.f32.mrf.mxu1  ;;  %2805 = vmatmul.mubr.f32.gmra.mxu1 %v7069_v35  ;;  %9249 = vst [vmem:[#allocation27_spill] sm:$0xff] %v7168_v60  ;;  %v7180_v23 = vand.u32 4294901760, %v2472_v37 }
 0x15f   : > { %9247 = vst [vmem:[#allocation25_spill] sm:$0xff] %v7158_v0  ;;  %v7165_v57 = vadd.f32 %v1434_v58, %v1277_v21  ;;  %v1279_v24 = vadd.f32 %v1278_v46, %v6932_v14  ;;  %2810 = vmatprep.mubr.f32.mxu1 %v9185_v4  ;;  %v7178_v58 = vsub.f32 %v2469_v17, %v7156_v1  ;;  %v2475_v46 = vsel %vm385_vm1, %v367_v11, 0 }
 0x160   : > { %v1283_v19 = vpop.f32.mrf.mxu0  ;;  %v1450_v62 = vpop.f32.mrf.mxu1  ;;  %2592 = vmatmul.mubr.f32.gmra.mxu0 %v7151_v50  ;;  %v368_v50 = vld [vmem:[%s6979_s10 + $0x48] sm:$0xff]  ;;  %v7193_v54 = vand.u32 4294901760, %v2475_v46 }
 0x161   : > { %9248 = vst [vmem:[#allocation26_spill] sm:$0xff] %v7165_v57  ;;  %9251 = vst [vmem:[#allocation29_spill] sm:$0xff] %v7178_v58  ;;  %v7183_v14 = vadd.f32 %v1436_v45, %v1279_v24  ;;  %v1284_v10 = vadd.f32 %v1283_v19, %v6938_v41  ;;  %2597 = vmatprep.mubr.f32.mxu0 %v9185_v4  ;;  %v7196_v41 = vand.u32 4294901760, %v2612_v55  ;;  %v7201_v19 = vand.u32 4294901760, %v7178_v58 }
 0x162   : > { %v1285_v21 = vpop.f32.mrf.mxu0  ;;  %v1455_v57 = vpop.f32.mrf.mxu1  ;;  %2812 = vmatmul.mubr.f32.gmra.mxu1 %v7095_v3  ;;  %v2623_v24 = vsub.f32 %v7154_v7, %v7175_v59 }
 0x163   : > { %9252 = vst [vmem:[#allocation30_spill] sm:$0xff] %v7183_v14  ;;  %v7189_v0 = vadd.f32 %v1441_v48, %v1284_v10  ;;  %v1286_v17 = vadd.f32 %v1285_v21, %v6944_v2  ;;  %2817 = vmatprep.mubr.f32.mxu1 %v9185_v4  ;;  %9254 = vst [vmem:[#allocation32_spill] sm:$0xff] %v7196_v41  ;;  %v7204_v48 = vsub.f32 %v2472_v37, %v7180_v23 }
 0x164   : > { %v1290_v45 = vpop.f32.mrf.mxu0  ;;  %v1457_v11 = vpop.f32.mrf.mxu1  ;;  %2603 = vmatmul.mubr.f32.gmra.mxu0 %v7168_v60  ;;  %9255 = vst [vmem:[#allocation33_spill] sm:$0xff] %v7201_v19  ;;  %v2478_v21 = vsel %vm385_vm1, %v368_v50, 0  ;;  %v7221_v50 = vand.u32 4294901760, %v2623_v24  ;;  %v370_v24 = vld [vmem:[%s6979_s10 + $0x58] sm:$0xff] }
 0x165   : > { %9253 = vst [vmem:[#allocation31_spill] sm:$0xff] %v7189_v0  ;;  %9256 = vst [vmem:[#allocation34_spill] sm:$0xff] %v7204_v48  ;;  %v7206_v2 = vadd.f32 %v1443_v53, %v1286_v17  ;;  %v1291_v10 = vadd.f32 %v1290_v45, %v6950_v49  ;;  %2608 = vmatprep.mubr.f32.mxu0 %v9185_v4  ;;  %v369_v0 = vld [vmem:[%s6979_s10 + $0x50] sm:$0xff]  ;;  %v7218_v53 = vsub.f32 %v2475_v46, %v7193_v54 }
 0x166   : > { %v1292_v60 = vpop.f32.mrf.mxu0  ;;  %v1462_v55 = vpop.f32.mrf.mxu1  ;;  %2819 = vmatmul.mubr.f32.gmra.mxu1 %v7129_v63  ;;  %9260 = vst [vmem:[#allocation38_spill] sm:$0xff] %v7221_v50  ;;  %v2634_v17 = vsub.f32 %v7178_v58, %v7201_v19  ;;  %v7228_v45 = vand.u32 4294901760, %v2478_v21  ;;  %v2481_v46 = vsel %vm385_vm1, %v369_v0, 0 }
 0x167   : > { %9257 = vst [vmem:[#allocation35_spill] sm:$0xff] %v7206_v2  ;;  %v7213_v14 = vadd.f32 %v1448_v13, %v1291_v10  ;;  %v1293_v39 = vadd.f32 %v1292_v60, %v6956_v22  ;;  %2824 = vmatprep.mubr.f32.mxu1 %v9185_v4  ;;  %9259 = vst [vmem:[#allocation37_spill] sm:$0xff] %v7218_v53  ;;  %v7226_v13 = vand.u32 4294901760, %v7204_v48 }
 0x168   : > { %v1297_v49 = vpop.f32.mrf.mxu0  ;;  %v1464_v37 = vpop.f32.mrf.mxu1  ;;  %2614 = vmatmul.mubr.f32.gmra.mxu0 %v7196_v41  ;;  %v7245_v0 = vand.u32 4294901760, %v2634_v17  ;;  %v371_v17 = vld [vmem:[%s6979_s10 + $0x60] sm:$0xff] }
 0x169   : > { %9258 = vst [vmem:[#allocation36_spill] sm:$0xff] %v7213_v14  ;;  %9261 = vst [vmem:[#allocation39_spill] sm:$0xff] %v7226_v13  ;;  %v7230_v22 = vadd.f32 %v1450_v62, %v1293_v39  ;;  %v1298_v60 = vadd.f32 %v1297_v49, %v6962_v34  ;;  %2619 = vmatprep.mubr.f32.mxu0 %v9185_v4  ;;  %v7242_v39 = vand.u32 4294901760, %v7218_v53 }
 0x16a   : > { %v1299_v10 = vpop.f32.mrf.mxu0  ;;  %v1469_v41 = vpop.f32.mrf.mxu1  ;;  %2826 = vmatmul.mubr.f32.gmra.mxu1 %v7156_v1  ;;  %9265 = vst [vmem:[#allocation43_spill] sm:$0xff] %v7245_v0  ;;  %v2645_v49 = vsub.f32 %v7204_v48, %v7226_v13 }
 0x16b   : > { %9262 = vst [vmem:[#allocation40_spill] sm:$0xff] %v7230_v22  ;;  %v7237_v14 = vadd.f32 %v1455_v57, %v1298_v60  ;;  %v1300_v2 = vadd.f32 %v1299_v10, %v6968_v40  ;;  %2831 = vmatprep.mubr.f32.mxu1 %v9185_v4  ;;  %9264 = vst [vmem:[#allocation42_spill] sm:$0xff] %v7242_v39  ;;  %v7250_v57 = vsub.f32 %v2478_v21, %v7228_v45 }
 0x16c   : > { %v1304_v34 = vpop.f32.mrf.mxu0  ;;  %v1471_v62 = vpop.f32.mrf.mxu1  ;;  %2625 = vmatmul.mubr.f32.gmra.mxu0 %v7221_v50  ;;  %v7252_v60 = vand.u32 4294901760, %v2481_v46  ;;  %v2656_v32 = vsub.f32 %v7218_v53, %v7242_v39 }
 0x16d   : > { %9263 = vst [vmem:[#allocation41_spill] sm:$0xff] %v7237_v14  ;;  %9266 = vst [vmem:[#allocation44_spill] sm:$0xff] %v7250_v57  ;;  %v7254_v40 = vadd.f32 %v1457_v11, %v1300_v2  ;;  %v1305_v10 = vadd.f32 %v1304_v34, %v6981_v43  ;;  %2630 = vmatprep.mubr.f32.mxu0 %v9185_v4  ;;  %v2484_v14 = vsel %vm385_vm1, %v370_v24, 0  ;;  %v7268_v2 = vand.u32 4294901760, %v2645_v49 }
 0x16e   : > { %v1306_v22 = vpop.f32.mrf.mxu0  ;;  %v1476_v50 = vpop.f32.mrf.mxu1  ;;  %2833 = vmatmul.mubr.f32.gmra.mxu1 %v7180_v23  ;;  %v7271_v24 = vand.u32 4294901760, %v7250_v57  ;;  %v7274_v34 = vsub.f32 %v2481_v46, %v7252_v60  ;;  %v7287_v46 = vand.u32 4294901760, %v2656_v32 }
 0x16f   : > { %9267 = vst [vmem:[#allocation45_spill] sm:$0xff] %v7254_v40  ;;  %v7261_v8 = vadd.f32 %v1462_v55, %v1305_v10  ;;  %v1307_v21 = vadd.f32 %v1306_v22, %v6987_v25  ;;  %2838 = vmatprep.mubr.f32.mxu1 %v9185_v4  ;;  %9269 = vst [vmem:[#allocation47_spill] sm:$0xff] %v7268_v2  ;;  %v7276_v55 = vand.u32 4294901760, %v2484_v14  ;;  %v2487_v10 = vsel %vm385_vm1, %v371_v17, 0 }
 0x170   : > { %v1311_v11 = vpop.f32.mrf.mxu0  ;;  %v1478_v43 = vpop.f32.mrf.mxu1  ;;  %2636 = vmatmul.mubr.f32.gmra.mxu0 %v7245_v0  ;;  %9270 = vst [vmem:[#allocation48_spill] sm:$0xff] %v7271_v24  ;;  %9271 = vst [vmem:[#allocation49_spill] sm:$0xff] %v7274_v34  ;;  %v7294_v17 = vand.u32 4294901760, %v7274_v34 }
 0x171   : > { %9268 = vst [vmem:[#allocation46_spill] sm:$0xff] %v7261_v8  ;;  %9272 = vst [vmem:[#allocation50_spill] sm:$0xff] %v7276_v55  ;;  %v7278_v25 = vadd.f32 %v1464_v37, %v1307_v21  ;;  %v1312_v22 = vadd.f32 %v1311_v11, %v6994_v26  ;;  %2641 = vmatprep.mubr.f32.mxu0 %v9185_v4  ;;  %v2667_v26 = vsub.f32 %v7250_v57, %v7271_v24 }
 0x172   : > { %v1313_v8 = vpop.f32.mrf.mxu0  ;;  %v1483_v0 = vpop.f32.mrf.mxu1  ;;  %2840 = vmatmul.mubr.f32.gmra.mxu1 %v7193_v54  ;;  %9275 = vst [vmem:[#allocation53_spill] sm:$0xff] %v7287_v46  ;;  %9276 = vst [vmem:[#allocation54_spill] sm:$0xff] %v7294_v17  ;;  %v7297_v11 = vsub.f32 %v2484_v14, %v7276_v55 }
 0x173   : > { %9273 = vst [vmem:[#allocation51_spill] sm:$0xff] %v7278_v25  ;;  %v7284_v49 = vadd.f32 %v1469_v41, %v1312_v22  ;;  %v1314_v40 = vadd.f32 %v1313_v8, %v7000_v28  ;;  %2845 = vmatprep.mubr.f32.mxu1 %v9185_v4  ;;  %v7299_v41 = vand.u32 4294901760, %v2487_v10 }
 0x174   : > { %v1318_v37 = vpop.f32.mrf.mxu0  ;;  %v1485_v21 = vpop.f32.mrf.mxu1  ;;  %2647 = vmatmul.mubr.f32.gmra.mxu0 %v7268_v2  ;;  %9277 = vst [vmem:[#allocation55_spill] sm:$0xff] %v7297_v11 }
 0x175   : > { %9274 = vst [vmem:[#allocation52_spill] sm:$0xff] %v7284_v49  ;;  %9278 = vst [vmem:[#allocation56_spill] sm:$0xff] %v7299_v41  ;;  %v7301_v28 = vadd.f32 %v1471_v62, %v1314_v40  ;;  %v1319_v32 = vadd.f32 %v1318_v37, %v7008_v42  ;;  %2652 = vmatprep.mubr.f32.mxu0 %v9185_v4  ;;  %v7311_v62 = vand.u32 4294901760, %v2667_v26  ;;  %v7316_v40 = vand.u32 4294901760, %v7297_v11 }
 0x176   : > { %v1320_v8 = vpop.f32.mrf.mxu0  ;;  %v1756_v22 = vpop.f32.mrf.mxu1  ;;  %2847 = vmatmul.mubr.f32.gmra.mxu1 %v7228_v45  ;;  %v2678_v42 = vsub.f32 %v7274_v34, %v7294_v17  ;;  %v7319_v37 = vsub.f32 %v2487_v10, %v7299_v41 }
 0x177   : > { %9279 = vst [vmem:[#allocation57_spill] sm:$0xff] %v7301_v28  ;;  %v7306_v2 = vadd.f32 %v1476_v50, %v1319_v32  ;;  %v1321_v49 = vadd.f32 %v1320_v8, %v7016_v36  ;;  %2852 = vmatprep.mubr.f32.mxu1 %v9185_v4  ;;  %9281 = vst [vmem:[#allocation59_spill] sm:$0xff] %v7311_v62 }
 0x178   : > { %v1325_v14 = vpop.f32.mrf.mxu0  ;;  %v5668_v25 = vpop.f32.mrf.mxu1  ;;  %2658 = vmatmul.mubr.f32.gmra.mxu0 %v7287_v46  ;;  %9282 = vst [vmem:[#allocation60_spill] sm:$0xff] %v7316_v40  ;;  %9283 = vst [vmem:[#allocation61_spill] sm:$0xff] %v7319_v37  ;;  %v7336_v10 = vand.u32 4294901760, %v7319_v37 }
 0x179   : > { %9280 = vst [vmem:[#allocation58_spill] sm:$0xff] %v7306_v2  ;;  %v7321_v50 = vadd.f32 %v1478_v43, %v1321_v49  ;;  %v1326_v36 = vadd.f32 %v1325_v14, %v7024_v44  ;;  %2663 = vmatprep.mubr.f32.mxu0 %v9185_v4  ;;  %v7331_v43 = vand.u32 4294901760, %v2678_v42  ;;  %v2689_v44 = vsub.f32 %v7297_v11, %v7316_v40 }
 0x17a   : > { %v1327_v25 = vpop.f32.mrf.mxu0  ;;  %v1762_v32 = vpop.f32.mrf.mxu1  ;;  %2854 = vmatmul.mubr.f32.gmra.mxu1 %v7252_v60  ;;  %9287 = vst [vmem:[#allocation65_spill] sm:$0xff] %v7336_v10 }
 0x17b   : > { %9284 = vst [vmem:[#allocation62_spill] sm:$0xff] %v7321_v50  ;;  %v7326_v26 = vadd.f32 %v1483_v0, %v1326_v36  ;;  %v1328_v8 = vadd.f32 %v1327_v25, %v7035_v56  ;;  %2859 = vmatprep.mubr.f32.mxu1 %v9185_v4  ;;  %9286 = vst [vmem:[#allocation64_spill] sm:$0xff] %v7331_v43  ;;  %v7346_v36 = vand.u32 4294901760, %v2689_v44 }
 0x17c   : > { %v1560_v46 = vpop.f32.mrf.mxu0  ;;  %v5671_v2 = vpop.f32.mrf.mxu1  ;;  %2669 = vmatmul.mubr.f32.gmra.mxu0 %v7311_v62 }
 0x17d   : > { %9285 = vst [vmem:[#allocation63_spill] sm:$0xff] %v7326_v26  ;;  %v7338_v49 = vadd.f32 %v1485_v21, %v1328_v8  ;;  %v7340_v0 = vadd.f32 %v1756_v22, %v1560_v46  ;;  %2674 = vmatprep.mubr.f32.mxu0 %v9185_v4  ;;  %9289 = vst [vmem:[#allocation67_spill] sm:$0xff] %v7346_v36  ;;  %v2700_v21 = vsub.f32 %v7319_v37, %v7336_v10 }
 0x17e   : > { %v5627_v56 = vpop.f32.mrf.mxu0  ;;  %v1768_v14 = vpop.f32.mrf.mxu1  ;;  %2861 = vmatmul.mubr.f32.gmra.mxu1 %v7276_v55 }
 0x17f   : > { %9288 = vst [vmem:[#allocation66_spill] sm:$0xff] %v7338_v49  ;;  %2866 = vmatprep.mubr.f32.mxu1 %v9185_v4 }
 0x180   : > { %v1570_v2 = vpop.f32.mrf.mxu0  ;;  %v5674_v42 = vpop.f32.mrf.mxu1  ;;  %2680 = vmatmul.mubr.f32.gmra.mxu0 %v7331_v43 }
 0x181   : > { %v7350_v25 = vadd.f32 %v1762_v32, %v1570_v2  ;;  %2685 = vmatprep.mubr.f32.mxu0 %v9185_v4  ;;  %v7356_v42 = vand.u32 4294901760, %v2700_v21 }
 0x182   : > { %v5630_v46 = vpop.f32.mrf.mxu0  ;;  %v1774_v22 = vpop.f32.mrf.mxu1  ;;  %2868 = vmatmul.mubr.f32.gmra.mxu1 %v7299_v41 }
 0x183   : > { %3113 = vmatprep.mubr.f32.mxu1 %v9185_v4  ;;  %9290 = vst [vmem:[#allocation68_spill] sm:$0xff] %v7356_v42 }
 0x184   : > { %v1580_v8 = vpop.f32.mrf.mxu0  ;;  %v5677_v56 = vpop.f32.mrf.mxu1  ;;  %2691 = vmatmul.mubr.f32.gmra.mxu0 %v7346_v36 }
 0x185   : > { %v7358_v44 = vadd.f32 %v1768_v14, %v1580_v8  ;;  %2696 = vmatprep.mubr.f32.mxu0 %v9185_v4 }
 0x186   : > { %v5633_v32 = vpop.f32.mrf.mxu0  ;;  %v1780_v2 = vpop.f32.mrf.mxu1  ;;  %3117 = vmatmul.mubr.f32.vlgmr.msra.gmra.mxu1 %v7050_v18 }
 0x187   : > { %3122 = vmatprep.mubr.f32.mxu1 %v9185_v4  ;;  %3426 = vmatpush1.msra.mxu1 %v6829_v27 }
 0x188   : > { %v1590_v46 = vpop.f32.mrf.mxu0  ;;  %v5680_v43 = vpop.f32.mrf.mxu1  ;;  %2702 = vmatmul.mubr.f32.gmra.mxu0 %v7356_v42  ;;  %5910 = vmatprep.subr.mxu1 %v9185_v4 }
 0x189   : > { %v7366_v21 = vadd.f32 %v1774_v22, %v1590_v46  ;;  %2942 = vmatprep.mubr.f32.mxu0 %v9185_v4  ;;  %v9291_v43 = vand.u32 4294901760, %v6842_v31 }
 0x18a   : > { %v5636_v14 = vpop.f32.mrf.mxu0  ;;  %v1786_v8 = vpop.f32.mrf.mxu1  ;;  %3126 = vmatmul.mubr.f32.gmra.mxu1 %v7075_v33 }
 0x18b   : > { %3131 = vmatprep.mubr.f32.mxu1 %v9185_v4 }
 0x18c   : > { %v1600_v56 = vpop.f32.mrf.mxu0  ;;  %v5683_v32 = vpop.f32.mrf.mxu1  ;;  %2945 = vmatmul.mubr.f32.vlgmr.msra.gmra.mxu0 %v7031_v16 }
 0x18d   : > { %v7372_v27 = vadd.f32 %v1780_v2, %v1600_v56  ;;  %2950 = vmatprep.mubr.f32.mxu0 %v9185_v4  ;;  %3268 = vmatpush1.msra.mxu0 %v9291_v43 }
 0x18e   : > { %v5639_v22 = vpop.f32.mrf.mxu0  ;;  %v1792_v46 = vpop.f32.mrf.mxu1  ;;  %3135 = vmatmul.mubr.f32.gmra.mxu1 %v7104_v52  ;;  %5869 = vmatprep.subr.mxu0 %v9185_v4 }
 0x18f   : > { %3140 = vmatprep.mubr.f32.mxu1 %v9185_v4 }
 0x190   : > { %v1610_v14 = vpop.f32.mrf.mxu0  ;;  %v5686_v33 = vpop.f32.mrf.mxu1  ;;  %2953 = vmatmul.mubr.f32.gmra.mxu0 %v7053_v12 }
 0x191   : > { %v7381_v32 = vadd.f32 %v1786_v8, %v1610_v14  ;;  %2958 = vmatprep.mubr.f32.mxu0 %v9185_v4 }
 0x192   : > { %v5642_v2 = vpop.f32.mrf.mxu0  ;;  %v1798_v56 = vpop.f32.mrf.mxu1  ;;  %3144 = vmatmul.mubr.f32.gmra.mxu1 %v7119_v6 }
 0x193   : > { %3149 = vmatprep.mubr.f32.mxu1 %v9185_v4 }
 0x194   : > { %v1620_v31 = vpop.f32.mrf.mxu0  ;;  %v5689_v43 = vpop.f32.mrf.mxu1  ;;  %2961 = vmatmul.mubr.f32.gmra.mxu0 %v7078_v20 }
 0x195   : > { %v7387_v22 = vadd.f32 %v1792_v46, %v1620_v31  ;;  %2966 = vmatprep.mubr.f32.mxu0 %v9185_v4 }
 0x196   : > { %v5645_v33 = vpop.f32.mrf.mxu0  ;;  %v1804_v12 = vpop.f32.mrf.mxu1  ;;  %3153 = vmatmul.mubr.f32.gmra.mxu1 %v7148_v30 }
 0x197   : > { %3158 = vmatprep.mubr.f32.mxu1 %v9185_v4 }
 0x198   : > { %v1630_v8 = vpop.f32.mrf.mxu0  ;;  %v5692_v14 = vpop.f32.mrf.mxu1  ;;  %2969 = vmatmul.mubr.f32.gmra.mxu0 %v7093_v38 }
 0x199   : > { %v7393_v2 = vadd.f32 %v1798_v56, %v1630_v8  ;;  %2974 = vmatprep.mubr.f32.mxu0 %v9185_v4 }
 0x19a   : > { %v5648_v43 = vpop.f32.mrf.mxu0  ;;  %v1810_v20 = vpop.f32.mrf.mxu1  ;;  %3162 = vmatmul.mubr.f32.gmra.mxu1 %v7175_v59 }
 0x19b   : > { %3167 = vmatprep.mubr.f32.mxu1 %v9185_v4 }
 0x19c   : > { %v1640_v46 = vpop.f32.mrf.mxu0  ;;  %v5695_v31 = vpop.f32.mrf.mxu1  ;;  %2977 = vmatmul.mubr.f32.gmra.mxu0 %v7122_v51 }
 0x19d   : > { %v7399_v33 = vadd.f32 %v1804_v12, %v1640_v46  ;;  %2982 = vmatprep.mubr.f32.mxu0 %v9185_v4  ;;  %v384_v12 = vld [vmem:[%s9103_s3 + $0x10] sm:$0x1f] }
 0x19e   : > { %v5651_v14 = vpop.f32.mrf.mxu0  ;;  %v1816_v38 = vpop.f32.mrf.mxu1  ;;  %3171 = vmatmul.mubr.f32.gmra.mxu1 %v7201_v19 }
 0x19f   : > { %3176 = vmatprep.mubr.f32.mxu1 %v9185_v4 }
 0x1a0   : > { %v1650_v56 = vpop.f32.mrf.mxu0  ;;  %v5698_v8 = vpop.f32.mrf.mxu1  ;;  %2985 = vmatmul.mubr.f32.gmra.mxu0 %v7154_v7 }
 0x1a1   : > { %v7405_v43 = vadd.f32 %v1810_v20, %v1650_v56  ;;  %2990 = vmatprep.mubr.f32.mxu0 %v9185_v4  ;;  %v2496_v8 = vsel %vm425_vm0, %v384_v12, 0 }
 0x1a2   : > { %v5654_v46 = vpop.f32.mrf.mxu0  ;;  %v1822_v31 = vpop.f32.mrf.mxu1  ;;  %3180 = vmatmul.mubr.f32.gmra.mxu1 %v7226_v13 }
 0x1a3   : > { %3185 = vmatprep.mubr.f32.mxu1 %v9185_v4  ;;  %v7420_v46 = vand.u32 4294901760, %v2496_v8 }
 0x1a4   : > { %v1660_v14 = vpop.f32.mrf.mxu0  ;;  %v5701_v19 = vpop.f32.mrf.mxu1  ;;  %2993 = vmatmul.mubr.f32.gmra.mxu0 %v7178_v58 }
 0x1a5   : > { %v7415_v20 = vadd.f32 %v1816_v38, %v1660_v14  ;;  %2998 = vmatprep.mubr.f32.mxu0 %v9185_v4  ;;  %v7431_v14 = vsub.f32 %v2496_v8, %v7420_v46 }
 0x1a6   : > { %v5657_v56 = vpop.f32.mrf.mxu0  ;;  %v1828_v7 = vpop.f32.mrf.mxu1  ;;  %3189 = vmatmul.mubr.f32.gmra.mxu1 %v7242_v39 }
 0x1a7   : > { %3194 = vmatprep.mubr.f32.mxu1 %v9185_v4 }
 0x1a8   : > { %v1670_v13 = vpop.f32.mrf.mxu0  ;;  %v5704_v51 = vpop.f32.mrf.mxu1  ;;  %3001 = vmatmul.mubr.f32.gmra.mxu0 %v7204_v48 }
 0x1a9   : > { %v7423_v19 = vadd.f32 %v1822_v31, %v1670_v13  ;;  %3006 = vmatprep.mubr.f32.mxu0 %v9185_v4 }
 0x1aa   : > { %v5660_v38 = vpop.f32.mrf.mxu0  ;;  %v7426_v12 = vpop.f32.mrf.mxu1  ;;  %3198 = vmatmul.mubr.f32.gmra.mxu1 %v7271_v24 }
 0x1ab   : > { %3203 = vmatprep.mubr.f32.mxu1 %v9185_v4  ;;  %v9149_v38 = vand.u32 4294901760, %v7431_v14 }
 0x1ac   : > { %v1680_v56 = vpop.f32.mrf.mxu0  ;;  %v5750_v39 = vpop.f32.mrf.mxu1  ;;  %3009 = vmatmul.mubr.f32.gmra.mxu0 %v7218_v53 }
 0x1ad   : > { %v7434_v51 = vadd.f32 %v1828_v7, %v1680_v56  ;;  %3014 = vmatprep.mubr.f32.mxu0 %v9185_v4  ;;  %v3781_v56 = vsub.f32 %v7431_v14, %v9149_v38 }
 0x1ae   : > { %v5663_v13 = vpop.f32.mrf.mxu0  ;;  %v7437_v31 = vpop.f32.mrf.mxu1  ;;  %3207 = vmatmul.mubr.f32.gmra.mxu1 %v7294_v17 }
 0x1af   : > { %9292 = vst [vmem:[#allocation69_spill] sm:$0xff] %v7434_v51  ;;  %3212 = vmatprep.mubr.f32.mxu1 %v9185_v4 }
 0x1b0   : > { %v7442_v24 = vpop.f32.mrf.mxu0  ;;  %v5753_v8 = vpop.f32.mrf.mxu1  ;;  %3017 = vmatmul.mubr.f32.gmra.mxu0 %v7250_v57 }
 0x1b1   : > { %3022 = vmatprep.mubr.f32.mxu0 %v9185_v4 }
 0x1b2   : > { %v5709_v7 = vpop.f32.mrf.mxu0  ;;  %v7446_v39 = vpop.f32.mrf.mxu1  ;;  %3216 = vmatmul.mubr.f32.gmra.mxu1 %v7316_v40 }
 0x1b3   : > { %3221 = vmatprep.mubr.f32.mxu1 %v9185_v4  ;;  %v3782_v7 = vand.u32 4294901760, %v3781_v56 }
 0x1b4   : > { %v7453_v13 = vpop.f32.mrf.mxu0  ;;  %v5756_v17 = vpop.f32.mrf.mxu1  ;;  %3025 = vmatmul.mubr.f32.gmra.mxu0 %v7274_v34 }
 0x1b5   : > { %3030 = vmatprep.mubr.f32.mxu0 %v9185_v4  ;;  %v1910_v51 = vadd.f32 %v7453_v13, %v7350_v25  ;;  %v4517_v25 = vmin.f32 %v7043_v15, %v7058_v29 }
 0x1b6   : > { %v5712_v8 = vpop.f32.mrf.mxu0  ;;  %v7457_v57 = vpop.f32.mrf.mxu1  ;;  %3225 = vmatmul.mubr.f32.gmra.mxu1 %v7336_v10 }
 0x1b7   : > { %3459 = vmatprep.mubr.f32.mxu1 %v9185_v4 }
 0x1b8   : > { %v7461_v40 = vpop.f32.mrf.mxu0  ;;  %v5759_v53 = vpop.f32.mrf.mxu1  ;;  %3033 = vmatmul.mubr.f32.gmra.mxu0 %v7297_v11 }
 0x1b9   : > { %3038 = vmatprep.mubr.f32.mxu0 %v9185_v4 }
 0x1ba   : > { %v5715_v17 = vpop.f32.mrf.mxu0  ;;  %v7465_v38 = vpop.f32.mrf.mxu1  ;;  %3461 = vmatmul.mubr.f32.vlgmr.msra.gmra.mxu1 %v7014_v61 }
 0x1bb   : > { %3466 = vmatprep.mubr.f32.mxu1 %v9185_v4  ;;  %5911 = vmatpush3.msra.mxu1 %v3782_v7 }
 0x1bc   : > { %v7469_v8 = vpop.f32.mrf.mxu0  ;;  %v5762_v10 = vpop.f32.mrf.mxu1  ;;  %3041 = vmatmul.mubr.f32.gmra.mxu0 %v7319_v37  ;;  %5992 = vmatprep.subr.mxu1 %v9185_v4 }
 0x1bd   : > { %3301 = vmatprep.mubr.f32.mxu0 %v9185_v4 }
 0x1be   : > { %v5718_v53 = vpop.f32.mrf.mxu0  ;;  %v7474_v56 = vpop.f32.mrf.mxu1  ;;  %3468 = vmatmul.mubr.f32.gmra.mxu1 %v7033_v47 }
 0x1bf   : > { %3473 = vmatprep.mubr.f32.mxu1 %v9185_v4 }
 0x1c0   : > { %v7478_v17 = vpop.f32.mrf.mxu0  ;;  %v5765_v11 = vpop.f32.mrf.mxu1  ;;  %3303 = vmatmul.mubr.f32.vlgmr.msra.gmra.mxu0 %v7014_v61 }
 0x1c1   : > { %3308 = vmatprep.mubr.f32.mxu0 %v9185_v4  ;;  %5870 = vmatpush3.msra.mxu0 %v7420_v46 }
 0x1c2   : > { %v5721_v10 = vpop.f32.mrf.mxu0  ;;  %v7483_v7 = vpop.f32.mrf.mxu1  ;;  %3475 = vmatmul.mubr.f32.gmra.mxu1 %v7055_v9  ;;  %5951 = vmatprep.subr.mxu0 %v9185_v4 }
 0x1c3   : > { %3480 = vmatprep.mubr.f32.mxu1 %v9185_v4 }
 0x1c4   : > { %v7488_v53 = vpop.f32.mrf.mxu0  ;;  %v5768_v37 = vpop.f32.mrf.mxu1  ;;  %3310 = vmatmul.mubr.f32.gmra.mxu0 %v7033_v47 }
 0x1c5   : > { %3315 = vmatprep.mubr.f32.mxu0 %v9185_v4 }
 0x1c6   : > { %v5724_v11 = vpop.f32.mrf.mxu0  ;;  %v7492_v34 = vpop.f32.mrf.mxu1  ;;  %3482 = vmatmul.mubr.f32.gmra.mxu1 %v7069_v35 }
 0x1c7   : > { %3487 = vmatprep.mubr.f32.mxu1 %v9185_v4 }
 0x1c8   : > { %v7496_v10 = vpop.f32.mrf.mxu0  ;;  %v5771_v48 = vpop.f32.mrf.mxu1  ;;  %3317 = vmatmul.mubr.f32.gmra.mxu0 %v7055_v9 }
 0x1c9   : > { %3322 = vmatprep.mubr.f32.mxu0 %v9185_v4 }
 0x1ca   : > { %v5727_v58 = vpop.f32.mrf.mxu0  ;;  %v7500_v37 = vpop.f32.mrf.mxu1  ;;  %3489 = vmatmul.mubr.f32.gmra.mxu1 %v7095_v3 }
 0x1cb   : > { %3494 = vmatprep.mubr.f32.mxu1 %v9185_v4 }
 0x1cc   : > { %v7504_v11 = vpop.f32.mrf.mxu0  ;;  %v5774_v59 = vpop.f32.mrf.mxu1  ;;  %3324 = vmatmul.mubr.f32.gmra.mxu0 %v7069_v35 }
 0x1cd   : > { %3329 = vmatprep.mubr.f32.mxu0 %v9185_v4 }
 0x1ce   : > { %v5730_v30 = vpop.f32.mrf.mxu0  ;;  %v7508_v48 = vpop.f32.mrf.mxu1  ;;  %3496 = vmatmul.mubr.f32.gmra.mxu1 %v7129_v63 }
 0x1cf   : > { %3501 = vmatprep.mubr.f32.mxu1 %v9185_v4 }
 0x1d0   : > { %v7512_v58 = vpop.f32.mrf.mxu0  ;;  %v5777_v6 = vpop.f32.mrf.mxu1  ;;  %3331 = vmatmul.mubr.f32.gmra.mxu0 %v7095_v3 }
 0x1d1   : > { %3336 = vmatprep.mubr.f32.mxu0 %v9185_v4 }
 0x1d2   : > { %v5733_v52 = vpop.f32.mrf.mxu0  ;;  %v7516_v59 = vpop.f32.mrf.mxu1  ;;  %3503 = vmatmul.mubr.f32.gmra.mxu1 %v7156_v1 }
 0x1d3   : > { %3508 = vmatprep.mubr.f32.mxu1 %v9185_v4 }
 0x1d4   : > { %v7520_v30 = vpop.f32.mrf.mxu0  ;;  %v5780_v16 = vpop.f32.mrf.mxu1  ;;  %3338 = vmatmul.mubr.f32.gmra.mxu0 %v7129_v63 }
 0x1d5   : > { %3343 = vmatprep.mubr.f32.mxu0 %v9185_v4 }
 0x1d6   : > { %v5736_v42 = vpop.f32.mrf.mxu0  ;;  %v7524_v6 = vpop.f32.mrf.mxu1  ;;  %3510 = vmatmul.mubr.f32.gmra.mxu1 %v7180_v23 }
 0x1d7   : > { %9293 = vst [vmem:[#allocation70_spill] sm:$0xff] %v7524_v6  ;;  %3515 = vmatprep.mubr.f32.mxu1 %v9185_v4 }
 0x1d8   : > { %v7528_v52 = vpop.f32.mrf.mxu0  ;;  %v5783_v18 = vpop.f32.mrf.mxu1  ;;  %3345 = vmatmul.mubr.f32.gmra.mxu0 %v7156_v1 }
 0x1d9   : > { %3350 = vmatprep.mubr.f32.mxu0 %v9185_v4 }
 0x1da   : > { %v5739_v36 = vpop.f32.mrf.mxu0  ;;  %v7532_v16 = vpop.f32.mrf.mxu1  ;;  %3517 = vmatmul.mubr.f32.gmra.mxu1 %v7193_v54 }
 0x1db   : > { %9294 = vst [vmem:[#allocation71_spill] sm:$0xff] %v7532_v16  ;;  %3522 = vmatprep.mubr.f32.mxu1 %v9185_v4  ;;  %v1903_v36 = vadd.f32 %v7442_v24, %v7340_v0 }
 0x1dc   : > { %v7536_v42 = vpop.f32.mrf.mxu0  ;;  %v5786_v62 = vpop.f32.mrf.mxu1  ;;  %3352 = vmatmul.mubr.f32.gmra.mxu0 %v7180_v23 }
 0x1dd   : > { %3357 = vmatprep.mubr.f32.mxu0 %v9185_v4 }
 0x1de   : > { %v5742_v26 = vpop.f32.mrf.mxu0  ;;  %v2374_v18 = vpop.f32.mrf.mxu1  ;;  %3524 = vmatmul.mubr.f32.gmra.mxu1 %v7228_v45 }
 0x1df   : > { %3529 = vmatprep.mubr.f32.mxu1 %v9185_v4  ;;  %v2061_v26 = vadd.f32 %v7426_v12, %v1903_v36  ;;  %v1917_v12 = vadd.f32 %v7461_v40, %v7358_v44 }
 0x1e0   : > { %v7544_v49 = vpop.f32.mrf.mxu0  ;;  %v5832_v50 = vpop.f32.mrf.mxu1  ;;  %3359 = vmatmul.mubr.f32.gmra.mxu0 %v7193_v54 }
 0x1e1   : > { %9295 = vst [vmem:[#allocation72_spill] sm:$0xff] %v7544_v49  ;;  %3364 = vmatprep.mubr.f32.mxu0 %v9185_v4 }
 0x1e2   : > { %v5745_v62 = vpop.f32.mrf.mxu0  ;;  %v2380_v16 = vpop.f32.mrf.mxu1  ;;  %3531 = vmatmul.mubr.f32.gmra.mxu1 %v7252_v60 }
 0x1e3   : > { %3536 = vmatprep.mubr.f32.mxu1 %v9185_v4  ;;  %v2069_v62 = vadd.f32 %v7437_v31, %v1910_v51  ;;  %v9296_v31 = vld [vmem:[#allocation7_spill] sm:$0xff] }
 0x1e4   : > { %v2230_v24 = vpop.f32.mrf.mxu0  ;;  %v5835_v0 = vpop.f32.mrf.mxu1  ;;  %3366 = vmatmul.mubr.f32.gmra.mxu0 %v7228_v45  ;;  %v4521_v40 = vmin.f32 %v9296_v31, %v7081_v5 }
 0x1e5   : > { %v2231_v50 = vadd.f32 %v2230_v24, %v2061_v26  ;;  %3371 = vmatprep.mubr.f32.mxu0 %v9185_v4  ;;  %v1924_v0 = vadd.f32 %v7469_v8, %v7366_v21 }
 0x1e6   : > { %v5791_v49 = vpop.f32.mrf.mxu0  ;;  %v2386_v6 = vpop.f32.mrf.mxu1  ;;  %3538 = vmatmul.mubr.f32.gmra.mxu1 %v7276_v55 }
 0x1e7   : > { %v7559_v36 = vadd.f32 %v2374_v18, %v2231_v50  ;;  %3543 = vmatprep.mubr.f32.mxu1 %v9185_v4  ;;  %v2077_v18 = vadd.f32 %v7446_v39, %v1917_v12  ;;  %v9297_v39 = vld [vmem:[#allocation15_spill] sm:$0xff]  ;;  %v2085_v8 = vadd.f32 %v7457_v57, %v1924_v0 }
 0x1e8   : > { %v2236_v13 = vpop.f32.mrf.mxu0  ;;  %v5838_v26 = vpop.f32.mrf.mxu1  ;;  %3373 = vmatmul.mubr.f32.gmra.mxu0 %v7252_v60  ;;  %v9298_v12 = vld [vmem:[#allocation11_spill] sm:$0xff] }
 0x1e9   : > { %v2237_v49 = vadd.f32 %v2236_v13, %v2069_v62  ;;  %v4518_v24 = vmin.f32 %v4517_v25, %v7559_v36  ;;  %3378 = vmatprep.mubr.f32.mxu0 %v9185_v4  ;;  %v4525_v5 = vmin.f32 %v9298_v12, %v9297_v39 }
 0x1ea   : > { %v5794_v51 = vpop.f32.mrf.mxu0  ;;  %v2392_v44 = vpop.f32.mrf.mxu1  ;;  %3545 = vmatmul.mubr.f32.gmra.mxu1 %v7299_v41 }
 0x1eb   : > { %v7573_v50 = vadd.f32 %v2380_v16, %v2237_v49  ;;  %4519 = vmin.xlane.f32.xlu0 %v4518_v24  ;;  %5912 = vmatprep.mubr.msk.f32.mxu1 %vm6193_vm2, %v9185_v4  ;;  %v1931_v16 = vadd.f32 %v7478_v17, %v7372_v27  ;;  %v9299_v27 = vld [vmem:[#allocation20_spill] sm:$0xff] }
 0x1ec   : > { %v2242_v62 = vpop.f32.mrf.mxu0  ;;  %v5841_v25 = vpop.f32.mrf.mxu1  ;;  %3380 = vmatmul.mubr.f32.gmra.mxu0 %v7276_v55  ;;  %v9300_v17 = vld [vmem:[#allocation16_spill] sm:$0xff] }
 0x1ed   : > { %v2243_v13 = vadd.f32 %v2242_v62, %v2077_v18  ;;  %v4522_v26 = vmin.f32 %v4521_v40, %v7573_v50  ;;  %3385 = vmatprep.mubr.f32.mxu0 %v9185_v4  ;;  %v2093_v25 = vadd.f32 %v7465_v38, %v1931_v16 }
 0x1ee   : > { %v5797_v51 = vpop.f32.mrf.mxu0  ;;  %v2398_v21 = vpop.f32.mrf.mxu1  ;;  %5913 = vmatmul.mubr.f32.vlgmr.msra.gmra.mxu1 %v7014_v61 }
 0x1ef   : > { %v7586_v49 = vadd.f32 %v2386_v6, %v2243_v13  ;;  %4523 = vmin.xlane.f32.xlu0 %v4522_v26  ;;  %5915 = vmatprep.mubr.msk.f32.mxu1 %vm6193_vm2, %v9185_v4  ;;  %v4529_v6 = vmin.f32 %v9300_v17, %v9299_v27  ;;  %v1938_v13 = vadd.f32 %v7488_v53, %v7381_v32  ;;  %v9303_v32 = vld [vmem:[#allocation25_spill] sm:$0xff] }
 0x1f0   : > { %v2248_v24 = vpop.f32.mrf.mxu0  ;;  %v5844_v40 = vpop.f32.mrf.mxu1  ;;  %3387 = vmatmul.mubr.f32.gmra.mxu0 %v7299_v41  ;;  %5993 = vmatpush3.msra.mxu1 %v7420_v46  ;;  %v9304_v53 = vld [vmem:[#allocation21_spill] sm:$0xff] }
 0x1f1   : > { %v2249_v18 = vadd.f32 %v2248_v24, %v2085_v8  ;;  %v4526_v62 = vmin.f32 %v4525_v5, %v7586_v49  ;;  %5871 = vmatprep.mubr.msk.f32.mxu0 %vm6193_vm2, %v9185_v4  ;;  %6074 = vmatprep.subr.mxu1 %v9185_v4  ;;  %v9302_v8 = vld [vmem:[#allocation13_spill] sm:$0xff] }
 0x1f2   : > { %v5800_v57 = vpop.f32.mrf.mxu0  ;;  %v2404_v0 = vpop.f32.mrf.mxu1  ;;  %5916 = vmatmul.mubr.f32.gmra.mxu1 %v7033_v47 }
 0x1f3   : > { %v7602_v26 = vadd.f32 %v2392_v44, %v2249_v18  ;;  %4527 = vmin.xlane.f32.xlu1 %v4526_v62  ;;  %5918 = vmatprep.mubr.msk.f32.mxu1 %vm6193_vm2, %v9185_v4  ;;  %v4533_v44 = vmin.f32 %v9304_v53, %v9303_v32  ;;  %v2101_v18 = vadd.f32 %v7474_v56, %v1938_v13  ;;  %v9307_v13 = vld [vmem:[#allocation30_spill] sm:$0xff]  ;;  %v9367_v32 = vld [vmem:[#allocation60_spill] sm:$0xff]  ;;  %v9368_v53 = vld [vmem:[#allocation49_spill] sm:$0xff] }
 0x1f4   : > { %v2254_v5 = vpop.f32.mrf.mxu0  ;;  %v5847_v51 = vpop.f32.mrf.mxu1  ;;  %5872 = vmatmul.mubr.f32.vlgmr.msra.gmra.mxu0 %v9302_v8  ;;  %v1945_v62 = vadd.f32 %v7496_v10, %v7387_v22 }
 0x1f5   : > { %9301 = vst [vmem:[#allocation7_spill] sm:$0xff] %v7602_v26  ;;  %v2255_v24 = vadd.f32 %v2254_v5, %v2093_v25  ;;  %v4530_v40 = vmin.f32 %v4529_v6, %v7602_v26  ;;  %5874 = vmatprep.mubr.msk.f32.mxu0 %vm6193_vm2, %v9185_v4  ;;  %5952 = vmatpush3.msra.mxu0 %v7431_v14  ;;  %v9306_v5 = vld [vmem:[#allocation19_spill] sm:$0xff]  ;;  %v9369_v26 = vld [vmem:[#allocation65_spill] sm:$0xff] }
 0x1f6   : > { %v5803_v38 = vpop.f32.mrf.mxu0  ;;  %v2410_v16 = vpop.f32.mrf.mxu1  ;;  %5919 = vmatmul.mubr.f32.gmra.mxu1 %v7055_v9  ;;  %6033 = vmatprep.subr.mxu0 %v9185_v4 }
 0x1f7   : > { %v7618_v57 = vadd.f32 %v2398_v21, %v2255_v24  ;;  %4531 = vmin.xlane.f32.xlu1 %v4530_v40  ;;  %5921 = vmatprep.mubr.msk.f32.mxu1 %vm6193_vm2, %v9185_v4  ;;  %v9308_v38 = vld [vmem:[#allocation26_spill] sm:$0xff]  ;;  %v2109_v21 = vadd.f32 %v7483_v7, %v1945_v62  ;;  %v1952_v24 = vadd.f32 %v7504_v11, %v7393_v2  ;;  %v9311_v62 = vld [vmem:[#allocation35_spill] sm:$0xff] }
 0x1f8   : > { %v2260_v6 = vpop.f32.mrf.mxu0  ;;  %v5850_v25 = vpop.f32.mrf.mxu1  ;;  %5875 = vmatmul.mubr.f32.gmra.mxu0 %v9306_v5  ;;  %v4537_v22 = vmin.f32 %v9308_v38, %v9307_v13  ;;  %v9363_v13 = vld [vmem:[#allocation48_spill] sm:$0xff] }
 0x1f9   : > { %9305 = vst [vmem:[#allocation15_spill] sm:$0xff] %v7618_v57  ;;  %v2261_v51 = vadd.f32 %v2260_v6, %v2101_v18  ;;  %v4534_v8 = vmin.f32 %v4533_v44, %v7618_v57  ;;  %5877 = vmatprep.mubr.msk.f32.mxu0 %vm6193_vm2, %v9185_v4  ;;  %v9310_v6 = vld [vmem:[#allocation23_spill] sm:$0xff] }
 0x1fa   : > { %v5806_v56 = vpop.f32.mrf.mxu0  ;;  %v2416_v10 = vpop.f32.mrf.mxu1  ;;  %5922 = vmatmul.mubr.f32.gmra.mxu1 %v7069_v35 }
 0x1fb   : > { %v7632_v40 = vadd.f32 %v2404_v0, %v2261_v51  ;;  %4535 = vmin.xlane.f32.xlu0 %v4534_v8  ;;  %5924 = vmatprep.mubr.msk.f32.mxu1 %vm6193_vm2, %v9185_v4  ;;  %v9312_v56 = vld [vmem:[#allocation31_spill] sm:$0xff]  ;;  %v2117_v0 = vadd.f32 %v7492_v34, %v1952_v24  ;;  %v1959_v51 = vadd.f32 %v7512_v58, %v7399_v33  ;;  %v9315_v24 = vld [vmem:[#allocation40_spill] sm:$0xff] }
 0x1fc   : > { %v2266_v44 = vpop.f32.mrf.mxu0  ;;  %v5853_v18 = vpop.f32.mrf.mxu1  ;;  %5878 = vmatmul.mubr.f32.gmra.mxu0 %v9310_v6  ;;  %v4541_v2 = vmin.f32 %v9312_v56, %v9311_v62  ;;  %v9361_v56 = vld [vmem:[#allocation42_spill] sm:$0xff] }
 0x1fd   : > { %9309 = vst [vmem:[#allocation11_spill] sm:$0xff] %v7632_v40  ;;  %v2267_v25 = vadd.f32 %v2266_v44, %v2109_v21  ;;  %v4538_v5 = vmin.f32 %v4537_v22, %v7632_v40  ;;  %5880 = vmatprep.mubr.msk.f32.mxu0 %vm6193_vm2, %v9185_v4  ;;  %v9314_v44 = vld [vmem:[#allocation27_spill] sm:$0xff] }
 0x1fe   : > { %v5809_v7 = vpop.f32.mrf.mxu0  ;;  %v2422_v11 = vpop.f32.mrf.mxu1  ;;  %5925 = vmatmul.mubr.f32.gmra.mxu1 %v7095_v3 }
 0x1ff   : > { %v7646_v8 = vadd.f32 %v2410_v16, %v2267_v25  ;;  %4539 = vmin.xlane.f32.xlu1 %v4538_v5  ;;  %5927 = vmatprep.mubr.msk.f32.mxu1 %vm6193_vm2, %v9185_v4  ;;  %v9316_v7 = vld [vmem:[#allocation36_spill] sm:$0xff]  ;;  %v2125_v16 = vadd.f32 %v7500_v37, %v1959_v51  ;;  %v1966_v25 = vadd.f32 %v7520_v30, %v7405_v43  ;;  %v9319_v51 = vld [vmem:[#allocation45_spill] sm:$0xff] }
 0x200   : > { %v2272_v22 = vpop.f32.mrf.mxu0  ;;  %v5856_v21 = vpop.f32.mrf.mxu1  ;;  %5881 = vmatmul.mubr.f32.gmra.mxu0 %v9314_v44  ;;  %v4545_v33 = vmin.f32 %v9316_v7, %v9315_v24  ;;  %v9357_v24 = vld [vmem:[#allocation33_spill] sm:$0xff] }
 0x201   : > { %9313 = vst [vmem:[#allocation20_spill] sm:$0xff] %v7646_v8  ;;  %v2273_v18 = vadd.f32 %v2272_v22, %v2117_v0  ;;  %v4542_v6 = vmin.f32 %v4541_v2, %v7646_v8  ;;  %5883 = vmatprep.mubr.msk.f32.mxu0 %vm6193_vm2, %v9185_v4  ;;  %v9318_v22 = vld [vmem:[#allocation32_spill] sm:$0xff]  ;;  %v9359_v8 = vld [vmem:[#allocation39_spill] sm:$0xff] }
 0x202   : > { %v5812_v34 = vpop.f32.mrf.mxu0  ;;  %v2428_v58 = vpop.f32.mrf.mxu1  ;;  %5928 = vmatmul.mubr.f32.gmra.mxu1 %v7129_v63 }
 0x203   : > { %v7660_v5 = vadd.f32 %v2416_v10, %v2273_v18  ;;  %4543 = vmin.xlane.f32.xlu0 %v4542_v6  ;;  %5930 = vmatprep.mubr.msk.f32.mxu1 %vm6193_vm2, %v9185_v4  ;;  %v9320_v34 = vld [vmem:[#allocation41_spill] sm:$0xff]  ;;  %v2133_v10 = vadd.f32 %v7508_v48, %v1966_v25  ;;  %v1973_v18 = vadd.f32 %v7528_v52, %v7415_v20  ;;  %v9323_v25 = vld [vmem:[#allocation51_spill] sm:$0xff] }
 0x204   : > { %v2278_v2 = vpop.f32.mrf.mxu0  ;;  %v5859_v0 = vpop.f32.mrf.mxu1  ;;  %5884 = vmatmul.mubr.f32.gmra.mxu0 %v9318_v22  ;;  %v4549_v43 = vmin.f32 %v9320_v34, %v9319_v51  ;;  %v9355_v34 = vld [vmem:[#allocation28_spill] sm:$0xff] }
 0x205   : > { %9317 = vst [vmem:[#allocation16_spill] sm:$0xff] %v7660_v5  ;;  %v2279_v21 = vadd.f32 %v2278_v2, %v2125_v16  ;;  %v4546_v44 = vmin.f32 %v4545_v33, %v7660_v5  ;;  %5886 = vmatprep.mubr.msk.f32.mxu0 %vm6193_vm2, %v9185_v4  ;;  %v9322_v2 = vld [vmem:[#allocation38_spill] sm:$0xff] }
 0x206   : > { %v5815_v37 = vpop.f32.mrf.mxu0  ;;  %v2434_v30 = vpop.f32.mrf.mxu1  ;;  %5931 = vmatmul.mubr.f32.gmra.mxu1 %v7156_v1 }
 0x207   : > { %v7674_v6 = vadd.f32 %v2422_v11, %v2279_v21  ;;  %4547 = vmin.xlane.f32.xlu1 %v4546_v44  ;;  %5933 = vmatprep.mubr.msk.f32.mxu1 %vm6193_vm2, %v9185_v4  ;;  %v9324_v37 = vld [vmem:[#allocation46_spill] sm:$0xff]  ;;  %v2141_v11 = vadd.f32 %v7516_v59, %v1973_v18  ;;  %v1980_v21 = vadd.f32 %v7536_v42, %v7423_v19  ;;  %v9327_v18 = vld [vmem:[#allocation52_spill] sm:$0xff] }
 0x208   : > { %v2284_v33 = vpop.f32.mrf.mxu0  ;;  %v5862_v16 = vpop.f32.mrf.mxu1  ;;  %5887 = vmatmul.mubr.f32.gmra.mxu0 %v9322_v2  ;;  %v4553_v20 = vmin.f32 %v9324_v37, %v9323_v25  ;;  %v4557_v19 = vmin.f32 %v9327_v18, %v7301_v28  ;;  %v9346_v28 = vld [vmem:[#allocation8_spill] sm:$0xff] }
 0x209   : > { %9321 = vst [vmem:[#allocation13_spill] sm:$0xff] %v7674_v6  ;;  %v2285_v0 = vadd.f32 %v2284_v33, %v2133_v10  ;;  %v4550_v22 = vmin.f32 %v4549_v43, %v7674_v6  ;;  %5889 = vmatprep.mubr.msk.f32.mxu0 %vm6193_vm2, %v9185_v4  ;;  %v9326_v33 = vld [vmem:[#allocation43_spill] sm:$0xff]  ;;  %v9353_v6 = vld [vmem:[#allocation22_spill] sm:$0xff] }
 0x20a   : > { %v5818_v48 = vpop.f32.mrf.mxu0  ;;  %v2440_v52 = vpop.f32.mrf.mxu1  ;;  %5934 = vmatmul.mubr.f32.gmra.mxu1 %v7180_v23 }
 0x20b   : > { %v7688_v44 = vadd.f32 %v2428_v58, %v2285_v0  ;;  %4551 = vmin.xlane.f32.xlu0 %v4550_v22  ;;  %5936 = vmatprep.mubr.msk.f32.mxu1 %vm6193_vm2, %v9185_v4  ;;  %v9328_v58 = vld [vmem:[#allocation70_spill] sm:$0xff]  ;;  %v9329_v22 = vld [vmem:[#allocation69_spill] sm:$0xff]  ;;  %v9330_v48 = vld [vmem:[#allocation72_spill] sm:$0xff] }
 0x20c   : > { %v2290_v43 = vpop.f32.mrf.mxu0  ;;  %v5865_v10 = vpop.f32.mrf.mxu1  ;;  %5890 = vmatmul.mubr.f32.gmra.mxu0 %v9326_v33  ;;  %v2149_v0 = vadd.f32 %v9328_v58, %v1980_v21 }
 0x20d   : > { %9325 = vst [vmem:[#allocation19_spill] sm:$0xff] %v7688_v44  ;;  %v2291_v16 = vadd.f32 %v2290_v43, %v2141_v11  ;;  %v4554_v2 = vmin.f32 %v4553_v20, %v7688_v44  ;;  %5892 = vmatprep.mubr.msk.f32.mxu0 %vm6193_vm2, %v9185_v4  ;;  %v1987_v10 = vadd.f32 %v9330_v48, %v9329_v22  ;;  %v9332_v43 = vld [vmem:[#allocation47_spill] sm:$0xff]  ;;  %v9335_v22 = vld [vmem:[#allocation62_spill] sm:$0xff]  ;;  %v9351_v44 = vld [vmem:[#allocation17_spill] sm:$0xff] }
 0x20e   : > { %v5821_v59 = vpop.f32.mrf.mxu0  ;;  %v2446_v42 = vpop.f32.mrf.mxu1  ;;  %5937 = vmatmul.mubr.f32.gmra.mxu1 %v7193_v54  ;;  %v9336_v48 = vld [vmem:[#allocation58_spill] sm:$0xff] }
 0x20f   : > { %v7702_v25 = vadd.f32 %v2434_v30, %v2291_v16  ;;  %4555 = vmin.xlane.f32.xlu1 %v4554_v2  ;;  %5939 = vmatprep.mubr.msk.f32.mxu1 %vm6193_vm2, %v9185_v4  ;;  %v9333_v30 = vld [vmem:[#allocation71_spill] sm:$0xff] }
 0x210   : > { %v2296_v20 = vpop.f32.mrf.mxu0  ;;  %v5868_v11 = vpop.f32.mrf.mxu1  ;;  %5893 = vmatmul.mubr.f32.gmra.mxu0 %v9332_v43  ;;  %v2157_v16 = vadd.f32 %v9333_v30, %v1987_v10  ;;  %v9340_v30 = vld [vmem:[#allocation63_spill] sm:$0xff] }
 0x211   : > { %9331 = vst [vmem:[#allocation23_spill] sm:$0xff] %v7702_v25  ;;  %v2297_v33 = vadd.f32 %v2296_v20, %v2149_v0  ;;  %v4558_v59 = vmin.f32 %v4557_v19, %v7702_v25  ;;  %5895 = vmatprep.mubr.msk.f32.mxu0 %vm6193_vm2, %v9185_v4  ;;  %v4561_v11 = vmin.f32 %v9336_v48, %v9335_v22  ;;  %v9337_v19 = vld [vmem:[#allocation53_spill] sm:$0xff] }
 0x212   : > { %v5824_v21 = vpop.f32.mrf.mxu0  ;;  %v2785_v58 = vpop.f32.mrf.mxu1  ;;  %5940 = vmatmul.mubr.f32.gmra.mxu1 %v7228_v45 }
 0x213   : > { %v7712_v2 = vadd.f32 %v2440_v52, %v2297_v33  ;;  %4559 = vmin.xlane.f32.xlu0 %v4558_v59  ;;  %5942 = vmatprep.mubr.msk.f32.mxu1 %vm6193_vm2, %v9185_v4  ;;  %v9339_v59 = vld [vmem:[#allocation66_spill] sm:$0xff] }
 0x214   : > { %v2302_v0 = vpop.f32.mrf.mxu0  ;;  %5896 = vmatmul.mubr.f32.gmra.mxu0 %v9337_v19  ;;  %v2787_v20 = vpop.f32.mrf.mxu1  ;;  %v4565_v22 = vmin.f32 %v9340_v30, %v9339_v59 }
 0x215   : > { %9334 = vst [vmem:[#allocation27_spill] sm:$0xff] %v7712_v2  ;;  %v2303_v43 = vadd.f32 %v2302_v0, %v2157_v16  ;;  %v4562_v21 = vmin.f32 %v4561_v11, %v7712_v2  ;;  %5898 = vmatprep.mubr.msk.f32.mxu0 %vm6193_vm2, %v9185_v4  ;;  %v9341_v16 = vld [vmem:[#allocation59_spill] sm:$0xff]  ;;  %v9344_v2 = vld [vmem:[#allocation5_spill] sm:$0xff] }
 0x216   : > { %v5827_v10 = vpop.f32.mrf.mxu0  ;;  %v2792_v52 = vpop.f32.mrf.mxu1  ;;  %5943 = vmatmul.mubr.f32.gmra.mxu1 %v7252_v60 }
 0x217   : > { %v7723_v33 = vadd.f32 %v2446_v42, %v2303_v43  ;;  %4563 = vmin.xlane.f32.xlu1 %v4562_v21  ;;  %5945 = vmatprep.mubr.msk.f32.mxu1 %vm6193_vm2, %v9185_v4  ;;  %v6194_v42 = vmov inf  }
 0x218   : > { %v2571_v19 = vpop.f32.mrf.mxu0  ;;  %5899 = vmatmul.mubr.f32.gmra.mxu0 %v9341_v16  ;;  %v2794_v11 = vpop.f32.mrf.mxu1  ;;  %320 = vst.msk [vmem:[#allocation2] sm:$0xff] %vm319_vm3, %v6194_v42  ;;  %321 = vst.msk [vmem:[#allocation2 + $0x8] sm:$0xff] %vm319_vm3, %v6194_v42 }
 0x219   : > { %9338 = vst [vmem:[#allocation32_spill] sm:$0xff] %v7723_v33  ;;  %v4566_v0 = vmin.f32 %v4565_v22, %v7723_v33  ;;  %v7731_v10 = vadd.f32 %v2785_v58, %v2571_v19  ;;  %5901 = vmatprep.mubr.msk.f32.mxu0 %vm6193_vm2, %v9185_v4  ;;  %322 = vst.msk [vmem:[#allocation2 + $0x10] sm:$0xff] %vm319_vm3, %v6194_v42  ;;  %v9342_v19 = vld [vmem:[#allocation64_spill] sm:$0xff] }
 0x21a   : > { %323 = vst.msk [vmem:[#allocation2 + $0x18] sm:$0xff] %vm319_vm3, %v6194_v42  ;;  %324 = vst.msk [vmem:[#allocation2 + $0x20] sm:$0xff] %vm319_vm3, %v6194_v42  ;;  %v2573_v58 = vpop.f32.mrf.mxu0  ;;  %v2799_v22 = vpop.f32.mrf.mxu1  ;;  %5946 = vmatmul.mubr.f32.gmra.mxu1 %v7276_v55 }
 0x21b   : > { %325 = vst.msk [vmem:[#allocation2 + $0x28] sm:$0xff] %vm319_vm3, %v6194_v42  ;;  %326 = vst.msk [vmem:[#allocation2 + $0x30] sm:$0xff] %vm319_vm3, %v6194_v42  ;;  %4567 = vmin.xlane.f32.xlu0 %v4566_v0  ;;  %v7775_v43 = vadd.f32 %v2787_v20, %v2573_v58  ;;  %5948 = vmatprep.mubr.msk.f32.mxu1 %vm6193_vm2, %v9185_v4  ;;  %v9343_v0 = vld [vmem:[#allocation67_spill] sm:$0xff] }
 0x21c   : > { %327 = vst.msk [vmem:[#allocation2 + $0x38] sm:$0xff] %vm319_vm3, %v6194_v42  ;;  %328 = vst.msk [vmem:[#allocation2 + $0x40] sm:$0xff] %vm319_vm3, %v6194_v42  ;;  %v2582_v21 = vpop.f32.mrf.mxu0  ;;  %5902 = vmatmul.mubr.f32.gmra.mxu0 %v9342_v19  ;;  %v2801_v16 = vpop.f32.mrf.mxu1 }
 0x21d   : > { %329 = vst.msk [vmem:[#allocation2 + $0x48] sm:$0xff] %vm319_vm3, %v6194_v42  ;;  %330 = vst.msk [vmem:[#allocation2 + $0x50] sm:$0xff] %vm319_vm3, %v6194_v42  ;;  %5904 = vmatprep.mubr.msk.f32.mxu0 %vm6193_vm2, %v9185_v4 }
 0x21e   : > { %331 = vst.msk [vmem:[#allocation2 + $0x58] sm:$0xff] %vm319_vm3, %v6194_v42  ;;  %332 = vst.msk [vmem:[#allocation2 + $0x60] sm:$0xff] %vm319_vm3, %v6194_v42  ;;  %v7780_v42 = vadd.f32 %v2792_v52, %v2582_v21  ;;  %v2584_v33 = vpop.f32.mrf.mxu0  ;;  %v2806_v59 = vpop.f32.mrf.mxu1  ;;  %5949 = vmatmul.mubr.f32.gmra.mxu1 %v7299_v41  ;;  %v9365_v41 = vld [vmem:[#allocation54_spill] sm:$0xff] }
 0x21f   : > { %v7785_v30 = vadd.f32 %v2794_v11, %v2584_v33  ;;  %5994 = vmatprep.mubr.msk.f32.mxu1 %vm6193_vm2, %v9185_v4  ;;  %v9345_v11 = vld [vmem:[#allocation68_spill] sm:$0xff] }
 0x220   : > { %v2593_v20 = vpop.f32.mrf.mxu0  ;;  %5905 = vmatmul.mubr.f32.gmra.mxu0 %v9343_v0  ;;  %v2808_v58 = vpop.f32.mrf.mxu1 }
 0x221   : > { %v7790_v19 = vadd.f32 %v2799_v22, %v2593_v20  ;;  %5907 = vmatprep.mubr.msk.f32.mxu0 %vm6193_vm2, %v9185_v4 }
 0x222   : > { %v2595_v52 = vpop.f32.mrf.mxu0  ;;  %v2813_v21 = vpop.f32.mrf.mxu1  ;;  %5995 = vmatmul.mubr.f32.vlgmr.msra.gmra.mxu1 %v9344_v2 }
 0x223   : > { %v7795_v48 = vadd.f32 %v2801_v16, %v2595_v52  ;;  %5997 = vmatprep.mubr.msk.f32.mxu1 %vm6193_vm2, %v9185_v4  ;;  %6075 = vmatpush3.msra.mxu1 %v7420_v46  ;;  %v9347_v46 = vld [vmem:[#allocation4_spill] sm:$0xff] }
 0x224   : > { %v2604_v33 = vpop.f32.mrf.mxu0  ;;  %5908 = vmatmul.mubr.f32.gmra.mxu0 %v9345_v11  ;;  %v2815_v0 = vpop.f32.mrf.mxu1 }
 0x225   : > { %v7801_v22 = vadd.f32 %v2806_v59, %v2604_v33  ;;  %5953 = vmatprep.mubr.msk.f32.mxu0 %vm6193_vm2, %v9185_v4  ;;  %v9348_v59 = vand.u32 4294901760, %v7431_v14 }
 0x226   : > { %v2606_v20 = vpop.f32.mrf.mxu0  ;;  %v2820_v25 = vpop.f32.mrf.mxu1  ;;  %5998 = vmatmul.mubr.f32.gmra.mxu1 %v9346_v28  ;;  %v9349_v28 = vld [vmem:[#allocation14_spill] sm:$0xff] }
 0x227   : > { %v7806_v2 = vadd.f32 %v2808_v58, %v2606_v20  ;;  %6000 = vmatprep.mubr.msk.f32.mxu1 %vm6193_vm2, %v9185_v4 }
 0x228   : > { %v2615_v16 = vpop.f32.mrf.mxu0  ;;  %5954 = vmatmul.mubr.f32.vlgmr.msra.gmra.mxu0 %v9347_v46  ;;  %v2822_v52 = vpop.f32.mrf.mxu1  ;;  %v9350_v46 = vld [vmem:[#allocation6_spill] sm:$0xff] }
 0x229   : > { %v7811_v11 = vadd.f32 %v2813_v21, %v2615_v16  ;;  %5956 = vmatprep.mubr.msk.f32.mxu0 %vm6193_vm2, %v9185_v4  ;;  %6034 = vmatpush3.msra.mxu0 %v9348_v59 }
 0x22a   : > { %v2617_v33 = vpop.f32.mrf.mxu0  ;;  %v2827_v18 = vpop.f32.mrf.mxu1  ;;  %6001 = vmatmul.mubr.f32.gmra.mxu1 %v9349_v28 }
 0x22b   : > { %v7818_v58 = vadd.f32 %v2815_v0, %v2617_v33  ;;  %6003 = vmatprep.mubr.msk.f32.mxu1 %vm6193_vm2, %v9185_v4  ;;  %v9352_v33 = vld [vmem:[#allocation9_spill] sm:$0xff] }
 0x22c   : > { %v2626_v20 = vpop.f32.mrf.mxu0  ;;  %5957 = vmatmul.mubr.f32.gmra.mxu0 %v9350_v46  ;;  %v2829_v21 = vpop.f32.mrf.mxu1 }
 0x22d   : > { %v7823_v16 = vadd.f32 %v2820_v25, %v2626_v20  ;;  %5959 = vmatprep.mubr.msk.f32.mxu0 %vm6193_vm2, %v9185_v4 }
 0x22e   : > { %v2628_v14 = vpop.f32.mrf.mxu0  ;;  %v2834_v59 = vpop.f32.mrf.mxu1  ;;  %6004 = vmatmul.mubr.f32.gmra.mxu1 %v9351_v44 }
 0x22f   : > { %v7828_v37 = vadd.f32 %v2822_v52, %v2628_v14  ;;  %6006 = vmatprep.mubr.msk.f32.mxu1 %vm6193_vm2, %v9185_v4  ;;  %v9354_v52 = vld [vmem:[#allocation12_spill] sm:$0xff] }
 0x230   : > { %v2637_v0 = vpop.f32.mrf.mxu0  ;;  %5960 = vmatmul.mubr.f32.gmra.mxu0 %v9352_v33  ;;  %v2836_v28 = vpop.f32.mrf.mxu1 }
 0x231   : > { %v7833_v46 = vadd.f32 %v2827_v18, %v2637_v0  ;;  %5962 = vmatprep.mubr.msk.f32.mxu0 %vm6193_vm2, %v9185_v4 }
 0x232   : > { %v2639_v25 = vpop.f32.mrf.mxu0  ;;  %v2841_v20 = vpop.f32.mrf.mxu1  ;;  %6007 = vmatmul.mubr.f32.gmra.mxu1 %v9353_v6 }
 0x233   : > { %v7838_v51 = vadd.f32 %v2829_v21, %v2639_v25  ;;  %6009 = vmatprep.mubr.msk.f32.mxu1 %vm6193_vm2, %v9185_v4  ;;  %v9356_v21 = vld [vmem:[#allocation18_spill] sm:$0xff] }
 0x234   : > { %v2648_v44 = vpop.f32.mrf.mxu0  ;;  %5963 = vmatmul.mubr.f32.gmra.mxu0 %v9354_v52  ;;  %v2843_v14 = vpop.f32.mrf.mxu1 }
 0x235   : > { %v7843_v33 = vadd.f32 %v2834_v59, %v2648_v44  ;;  %5965 = vmatprep.mubr.msk.f32.mxu0 %vm6193_vm2, %v9185_v4 }
 0x236   : > { %v2650_v18 = vpop.f32.mrf.mxu0  ;;  %v2848_v0 = vpop.f32.mrf.mxu1  ;;  %6010 = vmatmul.mubr.f32.gmra.mxu1 %v9355_v34 }
 0x237   : > { %v7848_v5 = vadd.f32 %v2836_v28, %v2650_v18  ;;  %6012 = vmatprep.mubr.msk.f32.mxu1 %vm6193_vm2, %v9185_v4  ;;  %v9358_v28 = vld [vmem:[#allocation24_spill] sm:$0xff] }
 0x238   : > { %v2659_v6 = vpop.f32.mrf.mxu0  ;;  %5966 = vmatmul.mubr.f32.gmra.mxu0 %v9356_v21  ;;  %v2850_v25 = vpop.f32.mrf.mxu1 }
 0x239   : > { %v7853_v52 = vadd.f32 %v2841_v20, %v2659_v6  ;;  %5968 = vmatprep.mubr.msk.f32.mxu0 %vm6193_vm2, %v9185_v4 }
 0x23a   : > { %v2661_v59 = vpop.f32.mrf.mxu0  ;;  %v2855_v44 = vpop.f32.mrf.mxu1  ;;  %6013 = vmatmul.mubr.f32.gmra.mxu1 %v9357_v24 }
 0x23b   : > { %v7858_v7 = vadd.f32 %v2843_v14, %v2661_v59  ;;  %6015 = vmatprep.mubr.msk.f32.mxu1 %vm6193_vm2, %v9185_v4  ;;  %v9360_v14 = vld [vmem:[#allocation29_spill] sm:$0xff] }
 0x23c   : > { %v2670_v34 = vpop.f32.mrf.mxu0  ;;  %5969 = vmatmul.mubr.f32.gmra.mxu0 %v9358_v28  ;;  %v2857_v18 = vpop.f32.mrf.mxu1 }
 0x23d   : > { %v7863_v21 = vadd.f32 %v2848_v0, %v2670_v34  ;;  %5971 = vmatprep.mubr.msk.f32.mxu0 %vm6193_vm2, %v9185_v4 }
 0x23e   : > { %v2672_v20 = vpop.f32.mrf.mxu0  ;;  %v2862_v6 = vpop.f32.mrf.mxu1  ;;  %6016 = vmatmul.mubr.f32.gmra.mxu1 %v9359_v8 }
 0x23f   : > { %v7868_v62 = vadd.f32 %v2850_v25, %v2672_v20  ;;  %6018 = vmatprep.mubr.msk.f32.mxu1 %vm6193_vm2, %v9185_v4  ;;  %v9362_v25 = vld [vmem:[#allocation34_spill] sm:$0xff] }
 0x240   : > { %v2681_v24 = vpop.f32.mrf.mxu0  ;;  %5972 = vmatmul.mubr.f32.gmra.mxu0 %v9360_v14  ;;  %v2864_v59 = vpop.f32.mrf.mxu1 }
 0x241   : > { %v7873_v28 = vadd.f32 %v2855_v44, %v2681_v24  ;;  %5974 = vmatprep.mubr.msk.f32.mxu0 %vm6193_vm2, %v9185_v4 }
 0x242   : > { %v2683_v0 = vpop.f32.mrf.mxu0  ;;  %v2869_v34 = vpop.f32.mrf.mxu1  ;;  %6019 = vmatmul.mubr.f32.gmra.mxu1 %v9361_v56 }
 0x243   : > { %v7878_v40 = vadd.f32 %v2857_v18, %v2683_v0  ;;  %6021 = vmatprep.mubr.msk.f32.mxu1 %vm6193_vm2, %v9185_v4  ;;  %v9364_v18 = vld [vmem:[#allocation37_spill] sm:$0xff] }
 0x244   : > { %v2692_v8 = vpop.f32.mrf.mxu0  ;;  %5975 = vmatmul.mubr.f32.gmra.mxu0 %v9362_v25  ;;  %v2871_v20 = vpop.f32.mrf.mxu1 }
 0x245   : > { %v7883_v14 = vadd.f32 %v2862_v6, %v2692_v8  ;;  %5977 = vmatprep.mubr.msk.f32.mxu0 %vm6193_vm2, %v9185_v4 }
 0x246   : > { %v2694_v44 = vpop.f32.mrf.mxu0  ;;  %v3118_v24 = vpop.f32.mrf.mxu1  ;;  %6022 = vmatmul.mubr.f32.gmra.mxu1 %v9363_v13 }
 0x247   : > { %v7888_v38 = vadd.f32 %v2864_v59, %v2694_v44  ;;  %6024 = vmatprep.mubr.msk.f32.mxu1 %vm6193_vm2, %v9185_v4  ;;  %v9366_v59 = vld [vmem:[#allocation44_spill] sm:$0xff] }
 0x248   : > { %v2703_v56 = vpop.f32.mrf.mxu0  ;;  %5978 = vmatmul.mubr.f32.gmra.mxu0 %v9364_v18  ;;  %v3120_v0 = vpop.f32.mrf.mxu1 }
 0x249   : > { %v7893_v25 = vadd.f32 %v2869_v34, %v2703_v56  ;;  %5980 = vmatprep.mubr.msk.f32.mxu0 %vm6193_vm2, %v9185_v4 }
 0x24a   : > { %v2705_v6 = vpop.f32.mrf.mxu0  ;;  %v3127_v8 = vpop.f32.mrf.mxu1  ;;  %6025 = vmatmul.mubr.f32.gmra.mxu1 %v9365_v41 }
 0x24b   : > { %v7898_v57 = vadd.f32 %v2871_v20, %v2705_v6  ;;  %6027 = vmatprep.mubr.msk.f32.mxu1 %vm6193_vm2, %v9185_v4 }
 0x24c   : > { %v2946_v13 = vpop.f32.mrf.mxu0  ;;  %5981 = vmatmul.mubr.f32.gmra.mxu0 %v9366_v59  ;;  %v3129_v44 = vpop.f32.mrf.mxu1 }
 0x24d   : > { %v2947_v18 = vadd.f32 %v2946_v13, %v7731_v10  ;;  %5983 = vmatprep.mubr.msk.f32.mxu0 %vm6193_vm2, %v9185_v4 }
 0x24e   : > { %v2948_v34 = vpop.f32.mrf.mxu0  ;;  %v3136_v56 = vpop.f32.mrf.mxu1  ;;  %6028 = vmatmul.mubr.f32.gmra.mxu1 %v9367_v32 }
 0x24f   : > { %v2949_v41 = vadd.f32 %v2948_v34, %v7775_v43  ;;  %v7908_v20 = vadd.f32 %v3118_v24, %v2947_v18  ;;  %6030 = vmatprep.mubr.msk.f32.mxu1 %vm6193_vm2, %v9185_v4  ;;  %v9370_v18 = vld [vmem:[#allocation55_spill] sm:$0xff] }
 0x250   : > { %v2954_v6 = vpop.f32.mrf.mxu0  ;;  %5984 = vmatmul.mubr.f32.gmra.mxu0 %v9368_v53  ;;  %v3138_v59 = vpop.f32.mrf.mxu1 }
 0x251   : > { %v2955_v10 = vadd.f32 %v2954_v6, %v7780_v42  ;;  %v7914_v13 = vadd.f32 %v3120_v0, %v2949_v41  ;;  %5986 = vmatprep.mubr.msk.f32.mxu0 %vm6193_vm2, %v9185_v4  ;;  %v9371_v6 = vld [vmem:[#allocation61_spill] sm:$0xff] }
 0x252   : > { %v2956_v55 = vpop.f32.mrf.mxu0  ;;  %v3145_v32 = vpop.f32.mrf.mxu1  ;;  %6031 = vmatmul.mubr.f32.gmra.mxu1 %v9369_v26 }
 0x253   : > { %v2957_v43 = vadd.f32 %v2956_v55, %v7785_v30  ;;  %v7920_v24 = vadd.f32 %v3127_v8, %v2955_v10  ;;  %6076 = vmatprep.mubr.msk.f32.mxu1 %vm6193_vm2, %v9185_v4 }
 0x254   : > { %v2962_v53 = vpop.f32.mrf.mxu0  ;;  %5987 = vmatmul.mubr.f32.gmra.mxu0 %v9370_v18  ;;  %v3147_v42 = vpop.f32.mrf.mxu1 }
 0x255   : > { %v2963_v0 = vadd.f32 %v2962_v53, %v7790_v19  ;;  %v7926_v34 = vadd.f32 %v3129_v44, %v2957_v43  ;;  %5989 = vmatprep.mubr.msk.f32.mxu0 %vm6193_vm2, %v9185_v4 }
 0x256   : > { %v2964_v41 = vpop.f32.mrf.mxu0  ;;  %v3154_v26 = vpop.f32.mrf.mxu1  ;;  %6077 = vmatmul.mubr.f32.vlgmr.msra.gmra.mxu1 %v7014_v61 }
 0x257   : > { %v2965_v55 = vadd.f32 %v2964_v41, %v7795_v48  ;;  %v7932_v30 = vadd.f32 %v3136_v56, %v2963_v0  ;;  %6079 = vmatprep.mubr.msk.f32.mxu1 %vm6193_vm2, %v9185_v4 }
 0x258   : > { %v2970_v8 = vpop.f32.mrf.mxu0  ;;  %5990 = vmatmul.mubr.f32.gmra.mxu0 %v9371_v6  ;;  %v3156_v19 = vpop.f32.mrf.mxu1 }
 0x259   : > { %v2971_v44 = vadd.f32 %v2970_v8, %v7801_v22  ;;  %v7938_v10 = vadd.f32 %v3138_v59, %v2965_v55  ;;  %6035 = vmatprep.mubr.msk.f32.mxu0 %vm6193_vm2, %v9185_v4 }
 0x25a   : > { %v2972_v43 = vpop.f32.mrf.mxu0  ;;  %v3163_v53 = vpop.f32.mrf.mxu1  ;;  %6080 = vmatmul.mubr.f32.gmra.mxu1 %v7033_v47 }
 0x25b   : > { %v2973_v48 = vadd.f32 %v2972_v43, %v7806_v2  ;;  %v7944_v56 = vadd.f32 %v3145_v32, %v2971_v44  ;;  %6082 = vmatprep.mubr.msk.f32.mxu1 %vm6193_vm2, %v9185_v4 }
 0x25c   : > { %v2978_v18 = vpop.f32.mrf.mxu0  ;;  %6036 = vmatmul.mubr.f32.vlgmr.msra.gmra.mxu0 %v7014_v61  ;;  %v3165_v22 = vpop.f32.mrf.mxu1 }
 0x25d   : > { %v2979_v59 = vadd.f32 %v2978_v18, %v7811_v11  ;;  %v7950_v0 = vadd.f32 %v3147_v42, %v2973_v48  ;;  %6038 = vmatprep.mubr.msk.f32.mxu0 %vm6193_vm2, %v9185_v4 }
 0x25e   : > { %v2980_v41 = vpop.f32.mrf.mxu0  ;;  %v3172_v55 = vpop.f32.mrf.mxu1  ;;  %6083 = vmatmul.mubr.f32.gmra.mxu1 %v7055_v9 }
 0x25f   : > { %v2981_v2 = vadd.f32 %v2980_v41, %v7818_v58  ;;  %v7956_v32 = vadd.f32 %v3154_v26, %v2979_v59  ;;  %6085 = vmatprep.mubr.msk.f32.mxu1 %vm6193_vm2, %v9185_v4  ;;  %v9184_v41 = vlaneseq }
 0x260   : > { %v2986_v61 = vpop.f32.mrf.mxu0  ;;  %6039 = vmatmul.mubr.f32.gmra.mxu0 %v7033_v47  ;;  %v3174_v11 = vpop.f32.mrf.mxu1 }
 0x261   : > { %v2987_v42 = vadd.f32 %v2986_v61, %v7823_v16  ;;  %v7962_v8 = vadd.f32 %v3156_v19, %v2981_v2  ;;  %6041 = vmatprep.mubr.msk.f32.mxu0 %vm6193_vm2, %v9185_v4 }
 0x262   : > { %v2988_v6 = vpop.f32.mrf.mxu0  ;;  %v3181_v44 = vpop.f32.mrf.mxu1  ;;  %6086 = vmatmul.mubr.f32.gmra.mxu1 %v7069_v35 }
 0x263   : > { %v2989_v58 = vadd.f32 %v2988_v6, %v7828_v37  ;;  %v7968_v26 = vadd.f32 %v3163_v53, %v2987_v42  ;;  %6088 = vmatprep.mubr.msk.f32.mxu1 %vm6193_vm2, %v9185_v4  ;;  %v8003_v6 = vand.u32 127, %v9184_v41 }
 0x264   : > { %v2994_v47 = vpop.f32.mrf.mxu0  ;;  %6042 = vmatmul.mubr.f32.gmra.mxu0 %v7055_v9  ;;  %v3183_v16 = vpop.f32.mrf.mxu1 }
 0x265   : > { %v2995_v19 = vadd.f32 %v2994_v47, %v7833_v46  ;;  %v7974_v43 = vadd.f32 %v3165_v22, %v2989_v58  ;;  %6044 = vmatprep.mubr.msk.f32.mxu0 %vm6193_vm2, %v9185_v4  ;;  %9372 = vst [vmem:[#allocation38_spill] sm:$0xff] %v8003_v6 }
 0x266   : > { %v2996_v48 = vpop.f32.mrf.mxu0  ;;  %v3190_v18 = vpop.f32.mrf.mxu1  ;;  %6089 = vmatmul.mubr.f32.gmra.mxu1 %v7095_v3 }
 0x267   : > { %v2997_v37 = vadd.f32 %v2996_v48, %v7838_v51  ;;  %v7980_v53 = vadd.f32 %v3172_v55, %v2995_v19  ;;  %6091 = vmatprep.mubr.msk.f32.mxu1 %vm6193_vm2, %v9185_v4  ;;  %v8018_v48 = vadd.s32 128, %v8003_v6 }
 0x268   : > { %v3002_v9 = vpop.f32.mrf.mxu0  ;;  %6045 = vmatmul.mubr.f32.gmra.mxu0 %v7069_v35  ;;  %v3192_v46 = vpop.f32.mrf.mxu1 }
 0x269   : > { %v3003_v22 = vadd.f32 %v3002_v9, %v7843_v33  ;;  %v7986_v59 = vadd.f32 %v3174_v11, %v2997_v37  ;;  %6047 = vmatprep.mubr.msk.f32.mxu0 %vm6193_vm2, %v9185_v4  ;;  %9373 = vst [vmem:[#allocation43_spill] sm:$0xff] %v8018_v48 }
 0x26a   : > { %v3004_v2 = vpop.f32.mrf.mxu0  ;;  %v3199_v61 = vpop.f32.mrf.mxu1  ;;  %6092 = vmatmul.mubr.f32.gmra.mxu1 %v7129_v63 }
 0x26b   : > { %v3005_v51 = vadd.f32 %v3004_v2, %v7848_v5  ;;  %v7992_v55 = vadd.f32 %v3181_v44, %v3003_v22  ;;  %6094 = vmatprep.mubr.msk.f32.mxu1 %vm6193_vm2, %v9185_v4  ;;  %v8034_v22 = vld [vmem:[#allocation2] sm:$0xff] }
 0x26c   : > { %v3010_v35 = vpop.f32.mrf.mxu0  ;;  %6048 = vmatmul.mubr.f32.gmra.mxu0 %v7095_v3  ;;  %v3201_v33 = vpop.f32.mrf.mxu1  ;;  %9376 = vst [vmem:[#allocation72_spill] sm:$0xff] %v8034_v22 }
 0x26d   : > { %v3011_v11 = vadd.f32 %v3010_v35, %v7853_v52  ;;  %v7998_v42 = vadd.f32 %v3183_v16, %v3005_v51  ;;  %6050 = vmatprep.mubr.msk.f32.mxu0 %vm6193_vm2, %v9185_v4 }
 0x26e   : > { %v3012_v5 = vpop.f32.mrf.mxu0  ;;  %v3208_v44 = vpop.f32.mrf.mxu1  ;;  %6095 = vmatmul.mubr.f32.gmra.mxu1 %v7156_v1 }
 0x26f   : > { %v3013_v58 = vadd.f32 %v3012_v5, %v7858_v7  ;;  %v8007_v47 = vadd.f32 %v3190_v18, %v3011_v11  ;;  %6097 = vmatprep.mubr.msk.f32.mxu1 %vm6193_vm2, %v9185_v4 }
 0x270   : > { %v3018_v3 = vpop.f32.mrf.mxu0  ;;  %6051 = vmatmul.mubr.f32.gmra.mxu0 %v7129_v63  ;;  %v3210_v52 = vpop.f32.mrf.mxu1 }
 0x271   : > { %v3019_v16 = vadd.f32 %v3018_v3, %v7863_v21  ;;  %v8013_v19 = vadd.f32 %v3192_v46, %v3013_v58  ;;  %6053 = vmatprep.mubr.msk.f32.mxu0 %vm6193_vm2, %v9185_v4  ;;  %v8031_v21 = vadd.s32 256, %v8003_v6 }
 0x272   : > { %v3020_v7 = vpop.f32.mrf.mxu0  ;;  %v8020_v18 = vpop.f32.mrf.mxu1  ;;  %6098 = vmatmul.mubr.f32.gmra.mxu1 %v7180_v23 }
 0x273   : > { %v3021_v37 = vadd.f32 %v3020_v7, %v7868_v62  ;;  %v8024_v9 = vadd.f32 %v3199_v61, %v3019_v16  ;;  %6100 = vmatprep.mubr.msk.f32.mxu1 %vm6193_vm2, %v9185_v4  ;;  %9375 = vst [vmem:[#allocation69_spill] sm:$0xff] %v8031_v21 }
 0x274   : > { %v8028_v63 = vpop.xlane.xlu0 %4519  ;;  %v3026_v46 = vpop.f32.mrf.mxu0  ;;  %6054 = vmatmul.mubr.f32.gmra.mxu0 %v7156_v1 }
 0x275   : > { %9374 = vst [vmem:[#allocation70_spill] sm:$0xff] %v8028_v63  ;;  %vm4569_vm4 = vcmp.eq.f32.partialorder %v7043_v15, %v8028_v63  ;;  %vm4570_vm5 = vcmp.eq.f32.partialorder %v7058_v29, %v8028_v63  ;;  %vm4571_vm6 = vcmp.eq.f32.partialorder %v7559_v36, %v8028_v63  ;;  %v3027_v62 = vadd.f32 %v3026_v46, %v7873_v28  ;;  %v8045_v2 = vpop.f32.mrf.mxu1 }
 0x276   : > { %6056 = vmatprep.mubr.msk.f32.mxu0 %vm6193_vm2, %v9185_v4  ;;  %v4608_v1 = vsel %vm4569_vm4, %v8003_v6, 384  ;;  %v4609_v61 = vsel %vm4570_vm5, %v8018_v48, 384  ;;  %v8049_v51 = vadd.f32 %v3201_v33, %v3021_v37  ;;  %v3028_v15 = vpop.f32.mrf.mxu0  ;;  %6101 = vmatmul.mubr.f32.gmra.mxu1 %v7193_v54  ;;  %vm5024_vm8 = vcmp.lt.f32.partialorder %v8028_v63, %v8034_v22 }
 0x277   : > { %vm4647_vm7 = vcmp.lt.s32.totalorder %v4608_v1, %v4609_v61  ;;  %v3029_v29 = vadd.f32 %v3028_v15, %v7878_v40  ;;  %v8053_v35 = vadd.f32 %v3208_v44, %v3027_v62  ;;  %v8055_v28 = vpop.f32.mrf.mxu1  ;;  %6103 = vmatprep.mubr.msk.f32.mxu1 %vm6193_vm2, %v9185_v4  ;;  %v4610_v33 = vsel %vm4571_vm6, %v8031_v21, 384  ;;  %v9377_v44 = vld [vmem:[#allocation10_spill] sm:$0xff] }
 0x278   : > { %v8061_v11 = vpop.xlane.xlu0 %4523  ;;  %v4648_v5 = vsel %vm4647_vm7, %v4608_v1, %v4609_v61  ;;  %v3034_v58 = vpop.f32.mrf.mxu0  ;;  %6057 = vmatmul.mubr.f32.gmra.mxu0 %v7180_v23  ;;  %v5037_v40 = vsel %vm5024_vm8, %v8028_v63, %v8034_v22 }
 0x279   : > { %vm4649_vm9 = vcmp.lt.s32.totalorder %v4648_v5, %v4610_v33  ;;  %vm4572_vm10 = vcmp.eq.f32.partialorder %v9296_v31, %v8061_v11  ;;  %vm4573_vm11 = vcmp.eq.f32.partialorder %v9377_v44, %v8061_v11  ;;  %vm4574_vm12 = vcmp.eq.f32.partialorder %v7573_v50, %v8061_v11  ;;  %6059 = vmatprep.mubr.msk.f32.mxu0 %vm6193_vm2, %v9185_v4  ;;  %v8081_v23 = vpop.f32.mrf.mxu1 }
 0x27a   : > { %5051 = vst.msk [vmem:[#allocation2] sm:$0xff] %vm319_vm3, %v5037_v40  ;;  %v8084_v36 = vsel %vm4649_vm9, %v4648_v5, %v4610_v33  ;;  %v4611_v3 = vsel %vm4572_vm10, %v8003_v6, 384  ;;  %v4612_v16 = vsel %vm4573_vm11, %v8018_v48, 384  ;;  %v3036_v31 = vpop.f32.mrf.mxu0  ;;  %6104 = vmatmul.mubr.f32.gmra.mxu1 %v7228_v45  ;;  %v3035_v37 = vadd.f32 %v3034_v58, %v7883_v14 }
 0x27b   : > { %v4652_v7 = vshra.s32 %v8084_v36, 16  ;;  %vm4665_vm13 = vcmp.lt.s32.totalorder %v4611_v3, %v4612_v16  ;;  %v8091_v46 = vadd.f32 %v3210_v52, %v3029_v29  ;;  %v8093_v62 = vpop.f32.mrf.mxu1  ;;  %6106 = vmatprep.mubr.msk.f32.mxu1 %vm6193_vm2, %v9185_v4  ;;  %v4613_v61 = vsel %vm4574_vm12, %v8031_v21, 384 }
 0x27c   : > { %v8097_v1 = vpop.xlane.xlu1 %4527  ;;  %v4666_v15 = vsel %vm4665_vm13, %v4611_v3, %v4612_v16  ;;  %v3037_v33 = vadd.f32 %v3036_v31, %v7888_v38  ;;  %v3042_v5 = vpop.f32.mrf.mxu0  ;;  %6060 = vmatmul.mubr.f32.gmra.mxu0 %v7193_v54  ;;  %v8126_v58 = vadd.f32 %v8020_v18, %v3035_v37 }
 0x27d   : > { %9378 = vst [vmem:[#allocation47_spill] sm:$0xff] %v8097_v1  ;;  %v8105_v14 = vcvt.s32.f32 %v4652_v7  ;;  %vm4667_vm14 = vcmp.lt.s32.totalorder %v4666_v15, %v4613_v61  ;;  %vm4575_vm15 = vcmp.eq.f32.partialorder %v9298_v12, %v8097_v1  ;;  %vm4576_vm0 = vcmp.eq.f32.partialorder %v9297_v39, %v8097_v1  ;;  %6062 = vmatprep.mubr.msk.f32.mxu0 %vm6193_vm2, %v9185_v4  ;;  %v8113_v50 = vpop.f32.mrf.mxu1 }
 0x27e   : > { %v8115_v52 = vsel %vm4667_vm14, %v4666_v15, %v4613_v61  ;;  %vm4577_vm1 = vcmp.eq.f32.partialorder %v7586_v49, %v8097_v1  ;;  %v4614_v54 = vsel %vm4575_vm15, %v8003_v6, 384  ;;  %v4615_v38 = vsel %vm4576_vm0, %v8018_v48, 384  ;;  %v3044_v29 = vpop.f32.mrf.mxu0  ;;  %6107 = vmatmul.mubr.f32.gmra.mxu1 %v7252_v60  ;;  %v9381_v15 = vld [vmem:[#allocation50_spill] sm:$0xff] }
 0x27f   : > { %4655 = vmin.xlane.f32.xlu1 %v8105_v14  ;;  %v4670_v39 = vshra.s32 %v8115_v52, 16  ;;  %v4616_v12 = vsel %vm4577_vm1, %v8031_v21, 384  ;;  %vm4683_vm4 = vcmp.lt.s32.totalorder %v4614_v54, %v4615_v38  ;;  %v8128_v40 = vpop.f32.mrf.mxu1  ;;  %6109 = vmatprep.mubr.msk.f32.mxu1 %vm6193_vm2, %v9185_v4  ;;  %v3043_v3 = vadd.f32 %v3042_v5, %v7893_v25 }
 0x280   : > { %v8132_v49 = vpop.xlane.xlu1 %4531  ;;  %v4684_v44 = vsel %vm4683_vm4, %v4614_v54, %v4615_v38  ;;  %v8136_v16 = vadd.f32 %v8045_v2, %v3037_v33  ;;  %v3045_v31 = vadd.f32 %v3044_v29, %v7898_v57  ;;  %v3304_v7 = vpop.f32.mrf.mxu0  ;;  %6063 = vmatmul.mubr.f32.gmra.mxu0 %v7228_v45  ;;  %v9380_v57 = vld [vmem:[#allocation7_spill] sm:$0xff] }
 0x281   : > { %9379 = vst [vmem:[#allocation71_spill] sm:$0xff] %v8132_v49  ;;  %v8140_v18 = vcvt.s32.f32 %v4670_v39  ;;  %vm4685_vm5 = vcmp.lt.s32.totalorder %v4684_v44, %v4616_v12  ;;  %vm4578_vm6 = vcmp.eq.f32.partialorder %v9300_v17, %v8132_v49  ;;  %vm4579_vm7 = vcmp.eq.f32.partialorder %v9299_v27, %v8132_v49  ;;  %6065 = vmatprep.mubr.msk.f32.mxu0 %vm6193_vm2, %v9185_v4  ;;  %v8148_v25 = vpop.f32.mrf.mxu1 }
 0x282   : > { %v8150_v2 = vsel %vm4685_vm5, %v4684_v44, %v4616_v12  ;;  %vm4580_vm9 = vcmp.eq.f32.partialorder %v9380_v57, %v8132_v49  ;;  %v4617_v45 = vsel %vm4578_vm6, %v8003_v6, 384  ;;  %v4618_v37 = vsel %vm4579_vm7, %v8018_v48, 384  ;;  %v3306_v61 = vpop.f32.mrf.mxu0  ;;  %6110 = vmatmul.mubr.f32.gmra.mxu1 %v9381_v15  ;;  %v9384_v57 = vld [vmem:[#allocation25_spill] sm:$0xff] }
 0x283   : > { %4673 = vmin.xlane.f32.xlu0 %v8140_v18  ;;  %v4688_v27 = vshra.s32 %v8150_v2, 16  ;;  %v4619_v17 = vsel %vm4580_vm9, %v8031_v21, 384  ;;  %vm4701_vm10 = vcmp.lt.s32.totalorder %v4617_v45, %v4618_v37  ;;  %v8161_v33 = vadd.f32 %v8055_v28, %v3043_v3  ;;  %v8163_v5 = vpop.f32.mrf.mxu1  ;;  %6112 = vmatprep.mubr.msk.f32.mxu1 %vm6193_vm2, %v9185_v4  ;;  %v9383_v3 = vld [vmem:[#allocation21_spill] sm:$0xff] }
 0x284   : > { %v8167_v54 = vpop.xlane.xlu0 %4535  ;;  %v4702_v38 = vsel %vm4701_vm10, %v4617_v45, %v4618_v37  ;;  %v8170_v29 = vadd.f32 %v8081_v23, %v3045_v31  ;;  %v3305_v39 = vadd.f32 %v3304_v7, %v7908_v20  ;;  %v3307_v12 = vadd.f32 %v3306_v61, %v7914_v13  ;;  %v3311_v44 = vpop.f32.mrf.mxu0  ;;  %6066 = vmatmul.mubr.f32.gmra.mxu0 %v7252_v60  ;;  %v9385_v13 = vld [vmem:[#allocation15_spill] sm:$0xff]  ;;  %v9386_v45 = vld [vmem:[#allocation56_spill] sm:$0xff] }
 0x285   : > { %9382 = vst [vmem:[#allocation53_spill] sm:$0xff] %v8167_v54  ;;  %v8175_v28 = vcvt.s32.f32 %v4688_v27  ;;  %vm4703_vm11 = vcmp.lt.s32.totalorder %v4702_v38, %v4619_v17  ;;  %vm4581_vm12 = vcmp.eq.f32.partialorder %v9383_v3, %v8167_v54  ;;  %vm4582_vm13 = vcmp.eq.f32.partialorder %v9384_v57, %v8167_v54  ;;  %6068 = vmatprep.mubr.msk.f32.mxu0 %vm6193_vm2, %v9185_v4  ;;  %v8183_v23 = vpop.f32.mrf.mxu1 }
 0x286   : > { %v8185_v20 = vsel %vm4703_vm11, %v4702_v38, %v4619_v17  ;;  %vm4583_vm14 = vcmp.eq.f32.partialorder %v9385_v13, %v8167_v54  ;;  %v4620_v60 = vsel %vm4581_vm12, %v8003_v6, 384  ;;  %v4621_v31 = vsel %vm4582_vm13, %v8018_v48, 384  ;;  %v3313_v7 = vpop.f32.mrf.mxu0  ;;  %6113 = vmatmul.mubr.f32.gmra.mxu1 %v9386_v45 }
 0x287   : > { %4691 = vmin.xlane.f32.xlu1 %v8175_v28  ;;  %v4706_v37 = vshra.s32 %v8185_v20, 16  ;;  %v4622_v61 = vsel %vm4583_vm14, %v8031_v21, 384  ;;  %vm4719_vm15 = vcmp.lt.s32.totalorder %v4620_v60, %v4621_v31  ;;  %v8196_v27 = vadd.f32 %v8093_v62, %v3305_v39  ;;  %v8198_v17 = vpop.f32.mrf.mxu1  ;;  %v9390_v62 = vld [vmem:[#allocation26_spill] sm:$0xff] }
 0x288   : > { %v8200_v38 = vpop.xlane.xlu1 %4539  ;;  %v4720_v3 = vsel %vm4719_vm15, %v4620_v60, %v4621_v31  ;;  %v3312_v57 = vadd.f32 %v3311_v44, %v7920_v24  ;;  %v8204_v13 = vadd.f32 %v8113_v50, %v3307_v12  ;;  %v3314_v41 = vadd.f32 %v3313_v7, %v7926_v34  ;;  %v3318_v4 = vpop.f32.mrf.mxu0  ;;  %6069 = vmatmul.mubr.f32.gmra.mxu0 %v9381_v15  ;;  %v9391_v39 = vld [vmem:[#allocation30_spill] sm:$0xff]  ;;  %v9393_v34 = vld [vmem:[#allocation11_spill] sm:$0xff] }
 0x289   : > { %9387 = vst [vmem:[#allocation59_spill] sm:$0xff] %v8196_v27  ;;  %9388 = vst [vmem:[#allocation64_spill] sm:$0xff] %v8200_v38  ;;  %v8208_v22 = vcvt.s32.f32 %v4706_v37  ;;  %vm4721_vm0 = vcmp.lt.s32.totalorder %v4720_v3, %v4622_v61  ;;  %vm4584_vm1 = vcmp.eq.f32.partialorder %v9390_v62, %v8200_v38  ;;  %vm4585_vm4 = vcmp.eq.f32.partialorder %v9391_v39, %v8200_v38  ;;  %v3485_v24 = vpop.f32.mrf.mxu1  ;;  %v9404_v27 = vld [vmem:[#allocation36_spill] sm:$0xff] }
 0x28a   : > { %9389 = vst [vmem:[#allocation67_spill] sm:$0xff] %v8204_v13  ;;  %v9392_v60 = vmov 0.0   ;;  %v8216_v50 = vsel %vm4721_vm0, %v4720_v3, %v4622_v61  ;;  %vm4586_vm5 = vcmp.eq.f32.partialorder %v9393_v34, %v8200_v38  ;;  %v4623_v15 = vsel %vm4584_vm1, %v8003_v6, 384  ;;  %v3320_v44 = vpop.f32.mrf.mxu0 }
 0x28b   : > { %6071 = vmatprep.mubr.msk.f32.mxu0 %vm6193_vm2, %v9392_v60  ;;  %v4624_v12 = vsel %vm4585_vm4, %v8018_v48, 384  ;;  %4709 = vmin.xlane.f32.xlu0 %v8208_v22  ;;  %v4724_v31 = vshra.s32 %v8216_v50, 16  ;;  %v4625_v7 = vsel %vm4586_vm5, %v8031_v21, 384  ;;  %v8226_v37 = vadd.f32 %v8128_v40, %v3312_v57  ;;  %v8228_v61 = vpop.f32.mrf.mxu1  ;;  %v9397_v40 = vld [vmem:[#allocation31_spill] sm:$0xff] }
 0x28c   : > { %vm4737_vm6 = vcmp.lt.s32.totalorder %v4623_v15, %v4624_v12  ;;  %v8230_v3 = vpop.xlane.xlu0 %4543  ;;  %v3319_v39 = vadd.f32 %v3318_v4, %v7932_v30  ;;  %v8234_v60 = vadd.f32 %v8148_v25, %v3314_v41  ;;  %v3321_v34 = vadd.f32 %v3320_v44, %v7938_v10  ;;  %v3325_v63 = vpop.f32.mrf.mxu0  ;;  %6072 = vmatmul.mubr.f32.gmra.mxu0 %v9386_v45  ;;  %v9398_v57 = vld [vmem:[#allocation35_spill] sm:$0xff]  ;;  %v9399_v4 = vld [vmem:[#allocation20_spill] sm:$0xff] }
 0x28d   : > { %9394 = vst [vmem:[#allocation5_spill] sm:$0xff] %v8226_v37  ;;  %9395 = vst [vmem:[#allocation68_spill] sm:$0xff] %v8230_v3  ;;  %v4738_v62 = vsel %vm4737_vm6, %v4623_v15, %v4624_v12  ;;  %v8238_v13 = vcvt.s32.f32 %v4724_v31  ;;  %vm4587_vm7 = vcmp.eq.f32.partialorder %v9397_v40, %v8230_v3  ;;  %vm4588_vm9 = vcmp.eq.f32.partialorder %v9398_v57, %v8230_v3  ;;  %v3492_v15 = vpop.f32.mrf.mxu1 }
 0x28e   : > { %9396 = vst [vmem:[#allocation8_spill] sm:$0xff] %v8234_v60  ;;  %vm4739_vm2 = vcmp.lt.s32.totalorder %v4738_v62, %v4625_v7  ;;  %vm4589_vm10 = vcmp.eq.f32.partialorder %v9399_v4, %v8230_v3  ;;  %v4626_v30 = vsel %vm4587_vm7, %v8003_v6, 384  ;;  %v4627_v10 = vsel %vm4588_vm9, %v8018_v48, 384  ;;  %v3327_v41 = vpop.f32.mrf.mxu0 }
 0x28f   : > { %v8244_v12 = vsel %vm4739_vm2, %v4738_v62, %v4625_v7  ;;  %4727 = vmin.xlane.f32.xlu1 %v8238_v13  ;;  %v4628_v45 = vsel %vm4589_vm10, %v8031_v21, 384  ;;  %vm4755_vm11 = vcmp.lt.s32.totalorder %v4626_v30, %v4627_v10  ;;  %v8254_v44 = vadd.f32 %v8163_v5, %v3319_v39  ;;  %v8256_v31 = vpop.f32.mrf.mxu1  ;;  %v9405_v5 = vld [vmem:[#allocation40_spill] sm:$0xff] }
 0x290   : > { %v4742_v25 = vshra.s32 %v8244_v12, 16  ;;  %v8258_v7 = vpop.xlane.xlu1 %4547  ;;  %v4756_v62 = vsel %vm4755_vm11, %v4626_v30, %v4627_v10  ;;  %v3326_v40 = vadd.f32 %v3325_v63, %v7944_v56  ;;  %v8262_v57 = vadd.f32 %v8183_v23, %v3321_v34  ;;  %v3332_v60 = vpop.f32.mrf.mxu0  ;;  %v9406_v56 = vld [vmem:[#allocation16_spill] sm:$0xff] }
 0x291   : > { %9400 = vst [vmem:[#allocation4_spill] sm:$0xff] %v8254_v44  ;;  %9401 = vst [vmem:[#allocation14_spill] sm:$0xff] %v8258_v7  ;;  %v3328_v4 = vadd.f32 %v3327_v41, %v7950_v0  ;;  %vm4757_vm12 = vcmp.lt.s32.totalorder %v4756_v62, %v4628_v45  ;;  %vm4590_vm13 = vcmp.eq.f32.partialorder %v9404_v27, %v8258_v7  ;;  %v3499_v39 = vpop.f32.mrf.mxu1 }
 0x292   : > { %9402 = vst [vmem:[#allocation6_spill] sm:$0xff] %v8262_v57  ;;  %v8265_v37 = vcvt.s32.f32 %v4742_v25  ;;  %vm4591_vm14 = vcmp.eq.f32.partialorder %v9405_v5, %v8258_v7  ;;  %v8271_v44 = vsel %vm4757_vm12, %v4756_v62, %v4628_v45  ;;  %vm4592_vm15 = vcmp.eq.f32.partialorder %v9406_v56, %v8258_v7  ;;  %v3334_v23 = vpop.f32.mrf.mxu0 }
 0x293   : > { %v4629_v63 = vsel %vm4590_vm13, %v8003_v6, 384  ;;  %v4630_v0 = vsel %vm4591_vm14, %v8018_v48, 384  ;;  %v4760_v34 = vshra.s32 %v8271_v44, 16  ;;  %v4631_v27 = vsel %vm4592_vm15, %v8031_v21, 384  ;;  %v8283_v10 = vpop.f32.mrf.mxu1 }
 0x294   : > { %9403 = vst [vmem:[#allocation17_spill] sm:$0xff] %v8265_v37  ;;  %4745 = vmin.xlane.f32.xlu0 %v8265_v37  ;;  %vm4773_vm0 = vcmp.lt.s32.totalorder %v4629_v63, %v4630_v0  ;;  %v8281_v30 = vadd.f32 %v8198_v17, %v3326_v40  ;;  %v8285_v41 = vpop.xlane.xlu0 %4551  ;;  %v3333_v45 = vadd.f32 %v3332_v60, %v7956_v32  ;;  %v3339_v56 = vpop.f32.mrf.mxu0  ;;  %v9411_v37 = vld [vmem:[#allocation41_spill] sm:$0xff] }
 0x295   : > { %9408 = vst [vmem:[#allocation22_spill] sm:$0xff] %v8285_v41  ;;  %v4774_v25 = vsel %vm4773_vm0, %v4629_v63, %v4630_v0  ;;  %v8288_v62 = vadd.f32 %v3485_v24, %v3328_v4  ;;  %v3335_v5 = vadd.f32 %v3334_v23, %v7962_v8  ;;  %v8291_v57 = vcvt.s32.f32 %v4760_v34  ;;  %v9412_v17 = vld [vmem:[#allocation45_spill] sm:$0xff]  ;;  %v3506_v40 = vpop.f32.mrf.mxu1 }
 0x296   : > { %9407 = vst [vmem:[#allocation9_spill] sm:$0xff] %v8281_v30  ;;  %vm4775_vm1 = vcmp.lt.s32.totalorder %v4774_v25, %v4631_v27  ;;  %vm4593_vm4 = vcmp.eq.f32.partialorder %v9411_v37, %v8285_v41  ;;  %vm4594_vm5 = vcmp.eq.f32.partialorder %v9412_v17, %v8285_v41  ;;  %v9413_v63 = vld [vmem:[#allocation13_spill] sm:$0xff]  ;;  %v3341_v24 = vpop.f32.mrf.mxu0  ;;  %v8307_v4 = vadd.f32 %v8228_v61, %v3333_v45  ;;  %v9419_v61 = vld [vmem:[#allocation51_spill] sm:$0xff] }
 0x297   : > { %9409 = vst [vmem:[#allocation12_spill] sm:$0xff] %v8288_v62  ;;  %9410 = vst [vmem:[#allocation28_spill] sm:$0xff] %v8291_v57  ;;  %v8297_v30 = vsel %vm4775_vm1, %v4774_v25, %v4631_v27  ;;  %vm4595_vm6 = vcmp.eq.f32.partialorder %v9413_v63, %v8285_v41  ;;  %v4632_v32 = vsel %vm4593_vm4, %v8003_v6, 384  ;;  %v4633_v8 = vsel %vm4594_vm5, %v8018_v48, 384  ;;  %4763 = vmin.xlane.f32.xlu1 %v8291_v57  ;;  %v8309_v0 = vpop.f32.mrf.mxu1  ;;  %v9418_v57 = vld [vmem:[#allocation46_spill] sm:$0xff] }
 0x298   : > { %v4778_v60 = vshra.s32 %v8297_v30, 16  ;;  %v4634_v37 = vsel %vm4595_vm6, %v8031_v21, 384  ;;  %vm4791_vm2 = vcmp.lt.s32.totalorder %v4632_v32, %v4633_v8  ;;  %9414 = vst [vmem:[#allocation18_spill] sm:$0xff] %v8307_v4  ;;  %v8311_v23 = vpop.xlane.xlu1 %4555  ;;  %v3340_v27 = vadd.f32 %v3339_v56, %v7968_v26  ;;  %v3346_v63 = vpop.f32.mrf.mxu0 }
 0x299   : > { %9415 = vst [vmem:[#allocation33_spill] sm:$0xff] %v8311_v23  ;;  %v4792_v34 = vsel %vm4791_vm2, %v4632_v32, %v4633_v8  ;;  %v8314_v25 = vadd.f32 %v3492_v15, %v3335_v5  ;;  %v3342_v17 = vadd.f32 %v3341_v24, %v7974_v43  ;;  %vm4596_vm9 = vcmp.eq.f32.partialorder %v9418_v57, %v8311_v23  ;;  %v3513_v45 = vpop.f32.mrf.mxu1  ;;  %v9420_v32 = vld [vmem:[#allocation19_spill] sm:$0xff] }
 0x29a   : > { %v8317_v62 = vcvt.s32.f32 %v4778_v60  ;;  %vm4793_vm7 = vcmp.lt.s32.totalorder %v4792_v34, %v4634_v37  ;;  %vm4597_vm10 = vcmp.eq.f32.partialorder %v9419_v61, %v8311_v23  ;;  %vm4598_vm11 = vcmp.eq.f32.partialorder %v9420_v32, %v8311_v23  ;;  %v3348_v15 = vpop.f32.mrf.mxu0 }
 0x29b   : > { %9416 = vst [vmem:[#allocation24_spill] sm:$0xff] %v8314_v25  ;;  %v8323_v4 = vsel %vm4793_vm7, %v4792_v34, %v4634_v37  ;;  %v4635_v26 = vsel %vm4596_vm9, %v8003_v6, 384  ;;  %v4636_v43 = vsel %vm4597_vm10, %v8018_v48, 384  ;;  %v4637_v57 = vsel %vm4598_vm11, %v8031_v21, 384  ;;  %v8335_v8 = vpop.f32.mrf.mxu1 }
 0x29c   : > { %9417 = vst [vmem:[#allocation39_spill] sm:$0xff] %v8317_v62  ;;  %4781 = vmin.xlane.f32.xlu0 %v8317_v62  ;;  %v4796_v5 = vshra.s32 %v8323_v4, 16  ;;  %vm4809_vm12 = vcmp.lt.s32.totalorder %v4635_v26, %v4636_v43  ;;  %v8333_v56 = vadd.f32 %v8256_v31, %v3340_v27  ;;  %v8337_v24 = vpop.xlane.xlu0 %4559  ;;  %v3347_v37 = vadd.f32 %v3346_v63, %v7980_v53  ;;  %v3353_v32 = vpop.f32.mrf.mxu0  ;;  %v9425_v62 = vld [vmem:[#allocation52_spill] sm:$0xff]  ;;  %v9426_v31 = vld [vmem:[#allocation57_spill] sm:$0xff] }
 0x29d   : > { %9422 = vst [vmem:[#allocation42_spill] sm:$0xff] %v8337_v24  ;;  %v4810_v60 = vsel %vm4809_vm12, %v4635_v26, %v4636_v43  ;;  %v8340_v34 = vadd.f32 %v3499_v39, %v3342_v17  ;;  %v3349_v61 = vadd.f32 %v3348_v15, %v7986_v59  ;;  %vm4599_vm14 = vcmp.eq.f32.partialorder %v9425_v62, %v8337_v24  ;;  %v3520_v27 = vpop.f32.mrf.mxu1  ;;  %v9427_v26 = vld [vmem:[#allocation23_spill] sm:$0xff] }
 0x29e   : > { %9421 = vst [vmem:[#allocation29_spill] sm:$0xff] %v8333_v56  ;;  %v8343_v25 = vcvt.s32.f32 %v4796_v5  ;;  %vm4811_vm13 = vcmp.lt.s32.totalorder %v4810_v60, %v4637_v57  ;;  %vm4600_vm15 = vcmp.eq.f32.partialorder %v9426_v31, %v8337_v24  ;;  %vm4601_vm0 = vcmp.eq.f32.partialorder %v9427_v26, %v8337_v24  ;;  %v3355_v39 = vpop.f32.mrf.mxu0 }
 0x29f   : > { %9423 = vst [vmem:[#allocation34_spill] sm:$0xff] %v8340_v34  ;;  %v8349_v56 = vsel %vm4811_vm13, %v4810_v60, %v4637_v57  ;;  %v4638_v53 = vsel %vm4599_vm14, %v8003_v6, 384  ;;  %v4639_v59 = vsel %vm4600_vm15, %v8018_v48, 384  ;;  %v4640_v62 = vsel %vm4601_vm0, %v8031_v21, 384  ;;  %v3525_v43 = vpop.f32.mrf.mxu1 }
 0x2a0   : > { %9424 = vst [vmem:[#allocation48_spill] sm:$0xff] %v8343_v25  ;;  %4799 = vmin.xlane.f32.xlu1 %v8343_v25  ;;  %v4814_v17 = vshra.s32 %v8349_v56, 16  ;;  %vm4827_vm1 = vcmp.lt.s32.totalorder %v4638_v53, %v4639_v59  ;;  %v8359_v63 = vadd.f32 %v8283_v10, %v3347_v37  ;;  %v8361_v15 = vpop.xlane.xlu1 %4563  ;;  %v3354_v57 = vadd.f32 %v3353_v32, %v7992_v55  ;;  %v3360_v26 = vpop.f32.mrf.mxu0  ;;  %v9432_v25 = vld [vmem:[#allocation58_spill] sm:$0xff] }
 0x2a1   : > { %9429 = vst [vmem:[#allocation54_spill] sm:$0xff] %v8361_v15  ;;  %v4828_v5 = vsel %vm4827_vm1, %v4638_v53, %v4639_v59  ;;  %v8364_v60 = vadd.f32 %v3506_v40, %v3349_v61  ;;  %v3356_v31 = vadd.f32 %v3355_v39, %v7998_v42  ;;  %vm4602_vm5 = vcmp.eq.f32.partialorder %v9432_v25, %v8361_v15  ;;  %v9433_v10 = vld [vmem:[#allocation62_spill] sm:$0xff]  ;;  %v3527_v37 = vpop.f32.mrf.mxu1  ;;  %v9434_v53 = vld [vmem:[#allocation27_spill] sm:$0xff] }
 0x2a2   : > { %9428 = vst [vmem:[#allocation37_spill] sm:$0xff] %v8359_v63  ;;  %v8367_v34 = vcvt.s32.f32 %v4814_v17  ;;  %vm4829_vm4 = vcmp.lt.s32.totalorder %v4828_v5, %v4640_v62  ;;  %vm4603_vm6 = vcmp.eq.f32.partialorder %v9433_v10, %v8361_v15  ;;  %vm4604_vm2 = vcmp.eq.f32.partialorder %v9434_v53, %v8361_v15  ;;  %v3362_v40 = vpop.f32.mrf.mxu0 }
 0x2a3   : > { %9430 = vst [vmem:[#allocation44_spill] sm:$0xff] %v8364_v60  ;;  %v8373_v63 = vsel %vm4829_vm4, %v4828_v5, %v4640_v62  ;;  %v4641_v55 = vsel %vm4602_vm5, %v8003_v6, 384  ;;  %v4642_v42 = vsel %vm4603_vm6, %v8018_v48, 384  ;;  %v4643_v25 = vsel %vm4604_vm2, %v8031_v21, 384  ;;  %v3532_v59 = vpop.f32.mrf.mxu1 }
 0x2a4   : > { %9431 = vst [vmem:[#allocation60_spill] sm:$0xff] %v8367_v34  ;;  %4817 = vmin.xlane.f32.xlu0 %v8367_v34  ;;  %v4832_v61 = vshra.s32 %v8373_v63, 16  ;;  %vm4845_vm7 = vcmp.lt.s32.totalorder %v4641_v55, %v4642_v42  ;;  %v8383_v32 = vadd.f32 %v8309_v0, %v3354_v57  ;;  %v8385_v39 = vpop.xlane.xlu0 %4567  ;;  %v3361_v62 = vadd.f32 %v3360_v26, %v8007_v47  ;;  %v3367_v53 = vpop.f32.mrf.mxu0  ;;  %v9438_v34 = vld [vmem:[#allocation63_spill] sm:$0xff]  ;;  %v9439_v0 = vld [vmem:[#allocation66_spill] sm:$0xff] }
 0x2a5   : > { %9436 = vst [vmem:[#allocation65_spill] sm:$0xff] %v8385_v39  ;;  %v4846_v17 = vsel %vm4845_vm7, %v4641_v55, %v4642_v42  ;;  %v8388_v5 = vadd.f32 %v3513_v45, %v3356_v31  ;;  %v3363_v10 = vadd.f32 %v3362_v40, %v8013_v19  ;;  %vm4605_vm10 = vcmp.eq.f32.partialorder %v9438_v34, %v8385_v39  ;;  %v3534_v57 = vpop.f32.mrf.mxu1  ;;  %v9440_v55 = vld [vmem:[#allocation32_spill] sm:$0xff] }
 0x2a6   : > { %9435 = vst [vmem:[#allocation49_spill] sm:$0xff] %v8383_v32  ;;  %v8391_v60 = vcvt.s32.f32 %v4832_v61  ;;  %vm4847_vm9 = vcmp.lt.s32.totalorder %v4846_v17, %v4643_v25  ;;  %vm4606_vm11 = vcmp.eq.f32.partialorder %v9439_v0, %v8385_v39  ;;  %vm4607_vm12 = vcmp.eq.f32.partialorder %v9440_v55, %v8385_v39  ;;  %v3369_v45 = vpop.f32.mrf.mxu0 }
 0x2a7   : > { %9437 = vst [vmem:[#allocation55_spill] sm:$0xff] %v8388_v5  ;;  %v8397_v32 = vsel %vm4847_vm9, %v4846_v17, %v4643_v25  ;;  %v4644_v47 = vsel %vm4605_vm10, %v8003_v6, 384  ;;  %v4645_v19 = vsel %vm4606_vm11, %v8018_v48, 384  ;;  %v4646_v34 = vsel %vm4607_vm12, %v8031_v21, 384  ;;  %v3539_v42 = vpop.f32.mrf.mxu1 }
 0x2a8   : > { %4835 = vmin.xlane.f32.xlu1 %v8391_v60  ;;  %v4850_v31 = vshra.s32 %v8397_v32, 16  ;;  %vm4863_vm13 = vcmp.lt.s32.totalorder %v4644_v47, %v4645_v19  ;;  %v8407_v26 = vadd.f32 %v8335_v8, %v3361_v62  ;;  %v3368_v61 = vadd.f32 %v3367_v53, %v8024_v9  ;;  %v3374_v0 = vpop.f32.mrf.mxu0 }
 0x2a9   : > { %v4864_v40 = vsel %vm4863_vm13, %v4644_v47, %v4645_v19  ;;  %v8410_v25 = vadd.f32 %v3520_v27, %v3363_v10  ;;  %v3370_v17 = vadd.f32 %v3369_v45, %v8049_v51  ;;  %v3375_v5 = vadd.f32 %v3374_v0, %v8053_v35  ;;  %v3541_v48 = vpop.f32.mrf.mxu1 }
 0x2aa   : > { %v8413_v55 = vcvt.s32.f32 %v4850_v31  ;;  %vm4865_vm14 = vcmp.lt.s32.totalorder %v4864_v40, %v4646_v34  ;;  %v8418_v6 = vadd.f32 %v3525_v43, %v3368_v61  ;;  %v3376_v62 = vpop.f32.mrf.mxu0  ;;  %v8445_v61 = vld [vmem:[#allocation2 + $0x18] sm:$0xff] }
 0x2ab   : > { %v8416_v21 = vsel %vm4865_vm14, %v4864_v40, %v4646_v34  ;;  %v8420_v8 = vadd.f32 %v3527_v37, %v3370_v17  ;;  %v3377_v51 = vadd.f32 %v3376_v62, %v8091_v46  ;;  %v8425_v27 = vadd.f32 %v3532_v59, %v3375_v5  ;;  %v3546_v10 = vpop.f32.mrf.mxu1  ;;  %v8432_v37 = vld [vmem:[#allocation2 + $0x8] sm:$0xff]  ;;  %v8440_v5 = vld [vmem:[#allocation2 + $0x10] sm:$0xff]  ;;  %9443 = vst [vmem:[#allocation7_spill] sm:$0xff] %v8445_v61  ;;  %v8447_v17 = vld [vmem:[#allocation2 + $0x20] sm:$0xff] }
 0x2ac   : > { %4853 = vmin.xlane.f32.xlu0 %v8413_v55  ;;  %v4868_v9 = vshra.s32 %v8416_v21, 16  ;;  %v3381_v53 = vpop.f32.mrf.mxu0  ;;  %9441 = vst [vmem:[#allocation61_spill] sm:$0xff] %v8432_v37  ;;  %vm5025_vm15 = vcmp.lt.f32.partialorder %v8061_v11, %v8432_v37  ;;  %9442 = vst [vmem:[#allocation10_spill] sm:$0xff] %v8440_v5  ;;  %vm5026_vm0 = vcmp.lt.f32.partialorder %v8097_v1, %v8440_v5 }
 0x2ad   : > { %v3382_v35 = vadd.f32 %v3381_v53, %v8126_v58  ;;  %v8430_v19 = vadd.f32 %v3534_v57, %v3377_v51  ;;  %v3548_v43 = vpop.f32.mrf.mxu1  ;;  %9444 = vst [vmem:[#allocation50_spill] sm:$0xff] %v8447_v17  ;;  %v8463_v51 = vld [vmem:[#allocation2 + $0x38] sm:$0xff]  ;;  %v8465_v53 = vld [vmem:[#allocation2 + $0x40] sm:$0xff]  ;;  %vm5027_vm1 = vcmp.lt.f32.partialorder %v8132_v49, %v8445_v61  ;;  %vm5028_vm4 = vcmp.lt.f32.partialorder %v8167_v54, %v8447_v17 }
 0x2ae   : > { %v8427_v47 = vcvt.s32.f32 %v4868_v9  ;;  %v3383_v45 = vpop.f32.mrf.mxu0  ;;  %9447 = vst [vmem:[#allocation15_spill] sm:$0xff] %v8463_v51  ;;  %9448 = vst [vmem:[#allocation56_spill] sm:$0xff] %v8465_v53  ;;  %vm5031_vm2 = vcmp.lt.f32.partialorder %v8258_v7, %v8463_v51  ;;  %vm5032_vm7 = vcmp.lt.f32.partialorder %v8285_v41, %v8465_v53 }
 0x2af   : > { %v3384_v31 = vadd.f32 %v3383_v45, %v8136_v16  ;;  %v8436_v34 = vadd.f32 %v3539_v42, %v3382_v35  ;;  %v3819_v46 = vpop.f32.mrf.mxu1  ;;  %v8449_v16 = vld [vmem:[#allocation2 + $0x28] sm:$0xff] }
 0x2b0   : > { %4871 = vmin.xlane.f32.xlu1 %v8427_v47  ;;  %v3388_v59 = vpop.f32.mrf.mxu0  ;;  %9445 = vst [vmem:[#allocation21_spill] sm:$0xff] %v8449_v16  ;;  %vm5029_vm5 = vcmp.lt.f32.partialorder %v8200_v38, %v8449_v16 }
 0x2b1   : > { %v3389_v58 = vadd.f32 %v3388_v59, %v8161_v33  ;;  %v8443_v57 = vadd.f32 %v3541_v48, %v3384_v31  ;;  %v5914_v40 = vpop.f32.mrf.mxu1  ;;  %v5038_v48 = vsel %vm5025_vm15, %v8061_v11, %v8432_v37  ;;  %v8461_v33 = vld [vmem:[#allocation2 + $0x30] sm:$0xff]  ;;  %v5068_v11 = vld [vmem:[#allocation3 + $0x20] sm:$0xff] }
 0x2b2   : > { %v3390_v0 = vpop.f32.mrf.mxu0  ;;  %9446 = vst [vmem:[#allocation25_spill] sm:$0xff] %v8461_v33  ;;  %5052 = vst.msk [vmem:[#allocation2 + $0x8] sm:$0xff] %vm319_vm3, %v5038_v48  ;;  %v5041_v40 = vsel %vm5028_vm4, %v8167_v54, %v8447_v17  ;;  %vm5030_vm6 = vcmp.lt.f32.partialorder %v8230_v3, %v8461_v33 }
 0x2b3   : > { %v3391_v42 = vadd.f32 %v3390_v0, %v8170_v29  ;;  %v8452_v62 = vadd.f32 %v3546_v10, %v3389_v58  ;;  %v3825_v9 = vpop.f32.mrf.mxu1  ;;  %v5039_v29 = vsel %vm5026_vm0, %v8097_v1, %v8440_v5  ;;  %v8477_v10 = vld [vmem:[#allocation2 + $0x48] sm:$0xff]  ;;  %v5040_v58 = vsel %vm5027_vm1, %v8132_v49, %v8445_v61  ;;  %v8494_v0 = vld [vmem:[#allocation2 + $0x50] sm:$0xff]  ;;  %5055 = vst.msk [vmem:[#allocation2 + $0x20] sm:$0xff] %vm319_vm3, %v5041_v40 }
 0x2b4   : > { %v3623_v35 = vpop.f32.mrf.mxu0  ;;  %9449 = vst [vmem:[#allocation26_spill] sm:$0xff] %v8477_v10  ;;  %5053 = vst.msk [vmem:[#allocation2 + $0x10] sm:$0xff] %vm319_vm3, %v5039_v29  ;;  %v5043_v29 = vsel %vm5030_vm6, %v8230_v3, %v8461_v33  ;;  %vm9225_vm9 = vcmp.lt.f32.partialorder %v8311_v23, %v8477_v10  ;;  %vm9224_vm10 = vcmp.lt.f32.partialorder %v8337_v24, %v8494_v0 }
 0x2b5   : > { %v8479_v45 = vadd.f32 %v3548_v43, %v3391_v42  ;;  %v8481_v31 = vadd.f32 %v3819_v46, %v3623_v35  ;;  %v5917_v59 = vpop.f32.mrf.mxu1  ;;  %9450 = vst [vmem:[#allocation30_spill] sm:$0xff] %v8494_v0  ;;  %v8496_v43 = vld [vmem:[#allocation2 + $0x58] sm:$0xff]  ;;  %v8498_v46 = vld [vmem:[#allocation2 + $0x60] sm:$0xff]  ;;  %5054 = vst.msk [vmem:[#allocation2 + $0x18] sm:$0xff] %vm319_vm3, %v5040_v58  ;;  %v5042_v35 = vsel %vm5029_vm5, %v8200_v38, %v8449_v16 }
 0x2b6   : > { %9451 = vst [vmem:[#allocation11_spill] sm:$0xff] %v8496_v43  ;;  %9452 = vst [vmem:[#allocation31_spill] sm:$0xff] %v8498_v46  ;;  %v5873_v42 = vpop.f32.mrf.mxu0  ;;  %v5044_v59 = vsel %vm5031_vm2, %v8258_v7, %v8463_v51  ;;  %v5045_v58 = vsel %vm5032_vm7, %v8285_v41, %v8465_v53  ;;  %vm9223_vm11 = vcmp.lt.f32.partialorder %v8361_v15, %v8496_v43 }
 0x2b7   : > { %v3831_v48 = vpop.f32.mrf.mxu1  ;;  %5056 = vst.msk [vmem:[#allocation2 + $0x28] sm:$0xff] %vm319_vm3, %v5042_v35  ;;  %5057 = vst.msk [vmem:[#allocation2 + $0x30] sm:$0xff] %vm319_vm3, %v5043_v29  ;;  %vm9222_vm12 = vcmp.lt.f32.partialorder %v8385_v39, %v8498_v46  ;;  %v5046_v29 = vsel %vm9225_vm9, %v8311_v23, %v8477_v10 }
 0x2b8   : > { %v3633_v40 = vpop.f32.mrf.mxu0  ;;  %5058 = vst.msk [vmem:[#allocation2 + $0x38] sm:$0xff] %vm319_vm3, %v5044_v59  ;;  %5059 = vst.msk [vmem:[#allocation2 + $0x40] sm:$0xff] %vm319_vm3, %v5045_v58  ;;  %v5047_v59 = vsel %vm9224_vm10, %v8337_v24, %v8494_v0 }
 0x2b9   : > { %v8542_v42 = vadd.f32 %v3825_v9, %v3633_v40  ;;  %v5920_v35 = vpop.f32.mrf.mxu1  ;;  %v5048_v9 = vsel %vm9223_vm11, %v8361_v15, %v8496_v43  ;;  %5060 = vst.msk [vmem:[#allocation2 + $0x48] sm:$0xff] %vm319_vm3, %v5046_v29  ;;  %5061 = vst.msk [vmem:[#allocation2 + $0x50] sm:$0xff] %vm319_vm3, %v5047_v59  ;;  %v5049_v40 = vsel %vm9222_vm12, %v8385_v39, %v8498_v46 }
 0x2ba   : > { %v5876_v58 = vpop.f32.mrf.mxu0  ;;  %5062 = vst.msk [vmem:[#allocation2 + $0x58] sm:$0xff] %vm319_vm3, %v5048_v9  ;;  %5063 = vst.msk [vmem:[#allocation2 + $0x60] sm:$0xff] %vm319_vm3, %v5049_v40 }
 0x2bb   : > { %v3837_v35 = vpop.f32.mrf.mxu1 }
 0x2bc   : > { %v3643_v0 = vpop.f32.mrf.mxu0 }
 0x2bd   : > { %v8568_v24 = vadd.f32 %v3831_v48, %v3643_v0  ;;  %v5923_v43 = vpop.f32.mrf.mxu1 }
 0x2be   : > { %v5879_v58 = vpop.f32.mrf.mxu0 }
 0x2bf   : > { %v3843_v15 = vpop.f32.mrf.mxu1 }
 0x2c0   : > { %v3653_v29 = vpop.f32.mrf.mxu0 }
 0x2c1   : > { %v8570_v10 = vadd.f32 %v3837_v35, %v3653_v29  ;;  %v5926_v59 = vpop.f32.mrf.mxu1 }
 0x2c2   : > { %v5882_v9 = vpop.f32.mrf.mxu0 }
 0x2c3   : > { %v3849_v23 = vpop.f32.mrf.mxu1 }
 0x2c4   : > { %v3663_v53 = vpop.f32.mrf.mxu0 }
 0x2c5   : > { %v8572_v41 = vadd.f32 %v3843_v15, %v3663_v53  ;;  %v5929_v51 = vpop.f32.mrf.mxu1 }
 0x2c6   : > { %v5885_v46 = vpop.f32.mrf.mxu0 }
 0x2c7   : > { %v3855_v39 = vpop.f32.mrf.mxu1 }
 0x2c8   : > { %v3673_v7 = vpop.f32.mrf.mxu0 }
 0x2c9   : > { %v8574_v40 = vadd.f32 %v3849_v23, %v3673_v7  ;;  %v5932_v0 = vpop.f32.mrf.mxu1 }
 0x2ca   : > { %v5888_v48 = vpop.f32.mrf.mxu0 }
 0x2cb   : > { %v3861_v43 = vpop.f32.mrf.mxu1 }
 0x2cc   : > { %v3683_v58 = vpop.f32.mrf.mxu0 }
 0x2cd   : > { %v8576_v33 = vadd.f32 %v3855_v39, %v3683_v58  ;;  %v5935_v35 = vpop.f32.mrf.mxu1 }
 0x2ce   : > { %v5891_v29 = vpop.f32.mrf.mxu0 }
 0x2cf   : > { %v3867_v59 = vpop.f32.mrf.mxu1 }
 0x2d0   : > { %v3693_v9 = vpop.f32.mrf.mxu0 }
 0x2d1   : > { %v8578_v3 = vadd.f32 %v3861_v43, %v3693_v9  ;;  %v5938_v15 = vpop.f32.mrf.mxu1 }
 0x2d2   : > { %v5894_v53 = vpop.f32.mrf.mxu0 }
 0x2d3   : > { %v3873_v51 = vpop.f32.mrf.mxu1 }
 0x2d4   : > { %v3703_v46 = vpop.f32.mrf.mxu0 }
 0x2d5   : > { %v8580_v16 = vadd.f32 %v3867_v59, %v3703_v46  ;;  %v5941_v7 = vpop.f32.mrf.mxu1 }
 0x2d6   : > { %v5897_v23 = vpop.f32.mrf.mxu0 }
 0x2d7   : > { %v3879_v0 = vpop.f32.mrf.mxu1 }
 0x2d8   : > { %v3713_v48 = vpop.f32.mrf.mxu0 }
 0x2d9   : > { %v8582_v38 = vadd.f32 %v3873_v51, %v3713_v48  ;;  %v5944_v39 = vpop.f32.mrf.mxu1 }
 0x2da   : > { %v5900_v58 = vpop.f32.mrf.mxu0 }
 0x2db   : > { %v3885_v35 = vpop.f32.mrf.mxu1 }
 0x2dc   : > { %v3723_v29 = vpop.f32.mrf.mxu0 }
 0x2dd   : > { %v8584_v17 = vadd.f32 %v3879_v0, %v3723_v29  ;;  %v5947_v43 = vpop.f32.mrf.mxu1 }
 0x2de   : > { %v5903_v9 = vpop.f32.mrf.mxu0 }
 0x2df   : > { %v3891_v15 = vpop.f32.mrf.mxu1 }
 0x2e0   : > { %v3733_v53 = vpop.f32.mrf.mxu0 }
 0x2e1   : > { %v8586_v54 = vadd.f32 %v3885_v35, %v3733_v53  ;;  %v5950_v59 = vpop.f32.mrf.mxu1 }
 0x2e2   : > { %v5906_v46 = vpop.f32.mrf.mxu0 }
 0x2e3   : > { %v4123_v7 = vpop.f32.mrf.mxu1 }
 0x2e4   : > { %v3743_v23 = vpop.f32.mrf.mxu0 }
 0x2e5   : > { %v8588_v61 = vadd.f32 %v3891_v15, %v3743_v23  ;;  %v5996_v51 = vpop.f32.mrf.mxu1 }
 0x2e6   : > { %v5909_v48 = vpop.f32.mrf.mxu0 }
 0x2e7   : > { %v4131_v39 = vpop.f32.mrf.mxu1 }
 0x2e8   : > { %v3965_v58 = vpop.f32.mrf.mxu0 }
 0x2e9   : > { %v3966_v49 = vadd.f32 %v3965_v58, %v8481_v31  ;;  %v5999_v0 = vpop.f32.mrf.mxu1 }
 0x2ea   : > { %v5955_v29 = vpop.f32.mrf.mxu0 }
 0x2eb   : > { %v8591_v43 = vadd.f32 %v4123_v7, %v3966_v49  ;;  %v4139_v9 = vpop.f32.mrf.mxu1 }
 0x2ec   : > { %v3972_v5 = vpop.f32.mrf.mxu0 }
 0x2ed   : > { %v3973_v35 = vadd.f32 %v3972_v5, %v8542_v42  ;;  %v6002_v53 = vpop.f32.mrf.mxu1 }
 0x2ee   : > { %v5958_v59 = vpop.f32.mrf.mxu0 }
 0x2ef   : > { %v8594_v46 = vadd.f32 %v4131_v39, %v3973_v35  ;;  %v4147_v15 = vpop.f32.mrf.mxu1 }
 0x2f0   : > { %v3979_v23 = vpop.f32.mrf.mxu0 }
 0x2f1   : > { %v3980_v51 = vadd.f32 %v3979_v23, %v8568_v24  ;;  %v6005_v48 = vpop.f32.mrf.mxu1 }
 0x2f2   : > { %v5961_v1 = vpop.f32.mrf.mxu0 }
 0x2f3   : > { %v8597_v37 = vadd.f32 %v4139_v9, %v3980_v51  ;;  %v4155_v31 = vpop.f32.mrf.mxu1 }
 0x2f4   : > { %v3986_v58 = vpop.f32.mrf.mxu0 }
 0x2f5   : > { %v3987_v49 = vadd.f32 %v3986_v58, %v8570_v10  ;;  %v6008_v7 = vpop.f32.mrf.mxu1 }
 0x2f6   : > { %v5964_v0 = vpop.f32.mrf.mxu0 }
 0x2f7   : > { %v8600_v29 = vadd.f32 %v4147_v15, %v3987_v49  ;;  %v4163_v5 = vpop.f32.mrf.mxu1 }
 0x2f8   : > { %v3993_v42 = vpop.f32.mrf.mxu0 }
 0x2f9   : > { %v3994_v39 = vadd.f32 %v3993_v42, %v8572_v41  ;;  %v6011_v35 = vpop.f32.mrf.mxu1 }
 0x2fa   : > { %v5967_v53 = vpop.f32.mrf.mxu0 }
 0x2fb   : > { %v8603_v59 = vadd.f32 %v4155_v31, %v3994_v39  ;;  %v4171_v24 = vpop.f32.mrf.mxu1  ;;  %v4651_v31 = vand.u32 65535, %v8084_v36 }
 0x2fc   : > { %v4000_v1 = vpop.f32.mrf.mxu0 }
 0x2fd   : > { %v4001_v9 = vadd.f32 %v4000_v1, %v8574_v40  ;;  %v6014_v23 = vpop.f32.mrf.mxu1 }
 0x2fe   : > { %v5970_v51 = vpop.f32.mrf.mxu0 }
 0x2ff   : > { %v8606_v48 = vadd.f32 %v4163_v5, %v4001_v9  ;;  %v4179_v10 = vpop.f32.mrf.mxu1  ;;  %v4653_v9 = vcvt.s32.f32 %v4651_v31 }
 0x300   : > { %v4007_v58 = vpop.f32.mrf.mxu0 }
 0x301   : > { %v4008_v15 = vadd.f32 %v4007_v58, %v8576_v33  ;;  %v6017_v49 = vpop.f32.mrf.mxu1  ;;  %v4669_v33 = vand.u32 65535, %v8115_v52 }
 0x302   : > { %v5973_v7 = vpop.f32.mrf.mxu0 }
 0x303   : > { %v8609_v0 = vadd.f32 %v4171_v24, %v4008_v15  ;;  %v4187_v41 = vpop.f32.mrf.mxu1  ;;  %v4671_v49 = vcvt.s32.f32 %v4669_v33  ;;  %v4687_v7 = vand.u32 65535, %v8150_v2 }
 0x304   : > { %v4014_v42 = vpop.f32.mrf.mxu0 }
 0x305   : > { %v4015_v39 = vadd.f32 %v4014_v42, %v8578_v3  ;;  %v6020_v35 = vpop.f32.mrf.mxu1 }
 0x306   : > { %v5976_v40 = vpop.f32.mrf.mxu0 }
 0x307   : > { %v8613_v53 = vadd.f32 %v4179_v10, %v4015_v39  ;;  %v4195_v5 = vpop.f32.mrf.mxu1  ;;  %v4689_v40 = vcvt.s32.f32 %v4687_v7 }
 0x308   : > { %v8615_v1 = vpop.xlane.xlu1 %4655  ;;  %v4021_v23 = vpop.f32.mrf.mxu0 }
 0x309   : > { %vm4657_vm13 = vcmp.eq.f32.partialorder %v8105_v14, %v8615_v1  ;;  %v4022_v24 = vadd.f32 %v4021_v23, %v8580_v16  ;;  %v6023_v36 = vpop.f32.mrf.mxu1 }
 0x30a   : > { %v4658_v51 = vsel %vm4657_vm13, %v4653_v9, inf  ;;  %v5979_v58 = vpop.f32.mrf.mxu0  ;;  %v4705_v9 = vand.u32 65535, %v8185_v20 }
 0x30b   : > { %4659 = vmin.xlane.f32.xlu0 %v4658_v51  ;;  %v8621_v3 = vadd.f32 %v4187_v41, %v4022_v24  ;;  %v4203_v10 = vpop.f32.mrf.mxu1  ;;  %v4723_v58 = vand.u32 65535, %v8216_v50 }
 0x30c   : > { %v8623_v15 = vpop.xlane.xlu0 %4673  ;;  %v4028_v31 = vpop.f32.mrf.mxu0  ;;  %v4707_v51 = vcvt.s32.f32 %v4705_v9 }
 0x30d   : > { %vm4675_vm14 = vcmp.eq.f32.partialorder %v8140_v18, %v8623_v15  ;;  %v4029_v14 = vadd.f32 %v4028_v31, %v8582_v38  ;;  %v6026_v52 = vpop.f32.mrf.mxu1 }
 0x30e   : > { %v4676_v16 = vsel %vm4675_vm14, %v4671_v49, inf  ;;  %v5982_v42 = vpop.f32.mrf.mxu0  ;;  %v4725_v52 = vcvt.s32.f32 %v4723_v58 }
 0x30f   : > { %4677 = vmin.xlane.f32.xlu1 %v4676_v16  ;;  %v8629_v39 = vadd.f32 %v4195_v5, %v4029_v14  ;;  %v4211_v41 = vpop.f32.mrf.mxu1  ;;  %v4741_v16 = vand.u32 65535, %v8244_v12  ;;  %v9453_v12 = vld [vmem:[#allocation17_spill] sm:$0xff] }
 0x310   : > { %v8631_v35 = vpop.xlane.xlu1 %4691  ;;  %v4035_v33 = vpop.f32.mrf.mxu0 }
 0x311   : > { %vm4693_vm13 = vcmp.eq.f32.partialorder %v8175_v28, %v8631_v35  ;;  %v4036_v18 = vadd.f32 %v4035_v33, %v8584_v17  ;;  %v6029_v2 = vpop.f32.mrf.mxu1 }
 0x312   : > { %v4694_v38 = vsel %vm4693_vm13, %v4689_v40, inf  ;;  %v5985_v23 = vpop.f32.mrf.mxu0  ;;  %v4759_v2 = vand.u32 65535, %v8271_v44  ;;  %v9454_v44 = vld [vmem:[#allocation28_spill] sm:$0xff] }
 0x313   : > { %4695 = vmin.xlane.f32.xlu0 %v4694_v38  ;;  %v8637_v24 = vadd.f32 %v4203_v10, %v4036_v18  ;;  %v4219_v5 = vpop.f32.mrf.mxu1  ;;  %v4743_v18 = vcvt.s32.f32 %v4741_v16 }
 0x314   : > { %v8639_v36 = vpop.xlane.xlu0 %4709  ;;  %v4042_v49 = vpop.f32.mrf.mxu0 }
 0x315   : > { %vm4711_vm14 = vcmp.eq.f32.partialorder %v8208_v22, %v8639_v36  ;;  %v4043_v28 = vadd.f32 %v4042_v49, %v8586_v54  ;;  %v6032_v20 = vpop.f32.mrf.mxu1 }
 0x316   : > { %v4712_v17 = vsel %vm4711_vm14, %v4707_v51, inf  ;;  %v5988_v7 = vpop.f32.mrf.mxu0  ;;  %v4777_v20 = vand.u32 65535, %v8297_v30  ;;  %v9455_v30 = vld [vmem:[#allocation39_spill] sm:$0xff] }
 0x317   : > { %4713 = vmin.xlane.f32.xlu1 %v4712_v17  ;;  %v8645_v31 = vadd.f32 %v4211_v41, %v4043_v28  ;;  %v4437_v10 = vpop.f32.mrf.mxu1  ;;  %v4761_v28 = vcvt.s32.f32 %v4759_v2 }
 0x318   : > { %v8647_v14 = vpop.xlane.xlu1 %4727  ;;  %v4049_v42 = vpop.f32.mrf.mxu0 }
 0x319   : > { %vm4729_vm13 = vcmp.eq.f32.partialorder %v8238_v13, %v8647_v14  ;;  %v4050_v22 = vadd.f32 %v4049_v42, %v8588_v61  ;;  %v6078_v50 = vpop.f32.mrf.mxu1 }
 0x31a   : > { %v4730_v54 = vsel %vm4729_vm13, %v4725_v52, inf  ;;  %v5991_v40 = vpop.f32.mrf.mxu0  ;;  %v4779_v50 = vcvt.s32.f32 %v4777_v20 }
 0x31b   : > { %4731 = vmin.xlane.f32.xlu0 %v4730_v54  ;;  %v8653_v9 = vadd.f32 %v4219_v5, %v4050_v22  ;;  %v4443_v41 = vpop.f32.mrf.mxu1  ;;  %v4795_v54 = vand.u32 65535, %v8323_v4  ;;  %v9456_v4 = vld [vmem:[#allocation48_spill] sm:$0xff] }
 0x31c   : > { %v4293_v38 = vpop.f32.mrf.mxu0 }
 0x31d   : > { %v8655_v33 = vpop.xlane.xlu0 %4745  ;;  %v4294_v13 = vadd.f32 %v4293_v38, %v8591_v43  ;;  %v6081_v23 = vpop.f32.mrf.mxu1 }
 0x31e   : > { %vm4747_vm14 = vcmp.eq.f32.partialorder %v9453_v12, %v8655_v33  ;;  %v6037_v51 = vpop.f32.mrf.mxu0  ;;  %v4797_v23 = vcvt.s32.f32 %v4795_v54 }
 0x31f   : > { %v4748_v61 = vsel %vm4747_vm14, %v4743_v18, inf  ;;  %v8661_v58 = vadd.f32 %v4437_v10, %v4294_v13  ;;  %v4449_v5 = vpop.f32.mrf.mxu1 }
 0x320   : > { %4749 = vmin.xlane.f32.xlu1 %v4748_v61  ;;  %v8663_v49 = vpop.xlane.xlu1 %4763  ;;  %v4299_v17 = vpop.f32.mrf.mxu0  ;;  %v4813_v61 = vand.u32 65535, %v8349_v56  ;;  %v9457_v56 = vld [vmem:[#allocation60_spill] sm:$0xff] }
 0x321   : > { %vm4765_vm13 = vcmp.eq.f32.partialorder %v9454_v44, %v8663_v49  ;;  %v4300_v7 = vadd.f32 %v4299_v17, %v8594_v46  ;;  %v6084_v52 = vpop.f32.mrf.mxu1 }
 0x322   : > { %v4766_v43 = vsel %vm4765_vm13, %v4761_v28, inf  ;;  %v6040_v16 = vpop.f32.mrf.mxu0  ;;  %v4815_v52 = vcvt.s32.f32 %v4813_v61 }
 0x323   : > { %4767 = vmin.xlane.f32.xlu0 %v4766_v43  ;;  %v8669_v42 = vadd.f32 %v4443_v41, %v4300_v7  ;;  %v4455_v10 = vpop.f32.mrf.mxu1  ;;  %v4831_v43 = vand.u32 65535, %v8373_v63 }
 0x324   : > { %v4305_v40 = vpop.f32.mrf.mxu0 }
 0x325   : > { %v8671_v22 = vpop.xlane.xlu0 %4781  ;;  %v4306_v18 = vadd.f32 %v4305_v40, %v8597_v37  ;;  %v6087_v2 = vpop.f32.mrf.mxu1 }
 0x326   : > { %vm4783_vm14 = vcmp.eq.f32.partialorder %v9455_v30, %v8671_v22  ;;  %v6043_v38 = vpop.f32.mrf.mxu0  ;;  %v4833_v2 = vcvt.s32.f32 %v4831_v43 }
 0x327   : > { %v4784_v46 = vsel %vm4783_vm14, %v4779_v50, inf  ;;  %v8677_v12 = vadd.f32 %v4449_v5, %v4306_v18  ;;  %v4461_v41 = vpop.f32.mrf.mxu1 }
 0x328   : > { %4785 = vmin.xlane.f32.xlu1 %v4784_v46  ;;  %v4311_v51 = vpop.f32.mrf.mxu0  ;;  %v4849_v46 = vand.u32 65535, %v8397_v32 }
 0x329   : > { %v8679_v13 = vpop.xlane.xlu1 %4799  ;;  %v4312_v28 = vadd.f32 %v4311_v51, %v8600_v29  ;;  %v6090_v20 = vpop.f32.mrf.mxu1 }
 0x32a   : > { %vm4801_vm13 = vcmp.eq.f32.partialorder %v9456_v4, %v8679_v13  ;;  %v6046_v17 = vpop.f32.mrf.mxu0  ;;  %v4867_v20 = vand.u32 65535, %v8416_v21 }
 0x32b   : > { %v4802_v37 = vsel %vm4801_vm13, %v4797_v23, inf  ;;  %v8685_v44 = vadd.f32 %v4455_v10, %v4312_v28  ;;  %v4467_v5 = vpop.f32.mrf.mxu1  ;;  %v4851_v28 = vcvt.s32.f32 %v4849_v46 }
 0x32c   : > { %4803 = vmin.xlane.f32.xlu0 %v4802_v37  ;;  %v4317_v16 = vpop.f32.mrf.mxu0 }
 0x32d   : > { %v8687_v7 = vpop.xlane.xlu0 %4817  ;;  %v4318_v50 = vadd.f32 %v4317_v16, %v8603_v59  ;;  %v6093_v54 = vpop.f32.mrf.mxu1  ;;  %v4869_v16 = vcvt.s32.f32 %v4867_v20 }
 0x32e   : > { %vm4819_vm14 = vcmp.eq.f32.partialorder %v9457_v56, %v8687_v7  ;;  %v6049_v40 = vpop.f32.mrf.mxu0 }
 0x32f   : > { %v4820_v29 = vsel %vm4819_vm14, %v4815_v52, inf  ;;  %v8693_v30 = vadd.f32 %v4461_v41, %v4318_v50  ;;  %v4473_v10 = vpop.f32.mrf.mxu1 }
 0x330   : > { %4821 = vmin.xlane.f32.xlu1 %v4820_v29  ;;  %v4323_v38 = vpop.f32.mrf.mxu0 }
 0x331   : > { %v8695_v18 = vpop.xlane.xlu1 %4835  ;;  %v4324_v63 = vadd.f32 %v4323_v38, %v8606_v48  ;;  %v6096_v23 = vpop.f32.mrf.mxu1 }
 0x332   : > { %vm4837_vm13 = vcmp.eq.f32.partialorder %v8391_v60, %v8695_v18  ;;  %v6052_v61 = vpop.f32.mrf.mxu0 }
 0x333   : > { %v4838_v59 = vsel %vm4837_vm13, %v4833_v2, inf  ;;  %v8701_v51 = vadd.f32 %v4467_v5, %v4324_v63  ;;  %v4479_v41 = vpop.f32.mrf.mxu1 }
 0x334   : > { %4839 = vmin.xlane.f32.xlu0 %v4838_v59  ;;  %v4329_v37 = vpop.f32.mrf.mxu0 }
 0x335   : > { %v8703_v4 = vpop.xlane.xlu0 %4853  ;;  %v4330_v60 = vadd.f32 %v4329_v37, %v8609_v0  ;;  %v6099_v32 = vpop.f32.mrf.mxu1 }
 0x336   : > { %vm4855_vm14 = vcmp.eq.f32.partialorder %v8413_v55, %v8703_v4  ;;  %v6055_v17 = vpop.f32.mrf.mxu0 }
 0x337   : > { %v4856_v48 = vsel %vm4855_vm14, %v4851_v28, inf  ;;  %v8709_v52 = vadd.f32 %v4473_v10, %v4330_v60  ;;  %v4485_v5 = vpop.f32.mrf.mxu1 }
 0x338   : > { %4857 = vmin.xlane.f32.xlu1 %v4856_v48  ;;  %v4335_v56 = vpop.f32.mrf.mxu0 }
 0x339   : > { %v8711_v43 = vpop.xlane.xlu1 %4871  ;;  %v4336_v21 = vadd.f32 %v4335_v56, %v8613_v53  ;;  %v6102_v50 = vpop.f32.mrf.mxu1 }
 0x33a   : > { %vm4873_vm13 = vcmp.eq.f32.partialorder %v8427_v47, %v8711_v43  ;;  %v6058_v54 = vpop.f32.mrf.mxu0 }
 0x33b   : > { %v4874_v55 = vsel %vm4873_vm13, %v4869_v16, inf  ;;  %v8716_v0 = vadd.f32 %v4479_v41, %v4336_v21  ;;  %v4491_v29 = vpop.f32.mrf.mxu1  ;;  %v4680_v54 = vcvt.f32.s32 %v8623_v15 }
 0x33c   : > { %4875 = vmin.xlane.f32.xlu0 %v4874_v55  ;;  %v4341_v40 = vpop.f32.mrf.mxu0 }
 0x33d   : > { %v4342_v10 = vadd.f32 %v4341_v40, %v8621_v3  ;;  %v6105_v2 = vpop.f32.mrf.mxu1 }
 0x33e   : > { %v6061_v46 = vpop.f32.mrf.mxu0 }
 0x33f   : > { %v8719_v38 = vadd.f32 %v4485_v5, %v4342_v10  ;;  %v4497_v63 = vpop.f32.mrf.mxu1  ;;  %v4681_v46 = vshll.u32 %v4680_v54, 16 }
 0x340   : > { %v4347_v23 = vpop.f32.mrf.mxu0 }
 0x341   : > { %v4348_v47 = vadd.f32 %v4347_v23, %v8629_v39  ;;  %v6108_v59 = vpop.f32.mrf.mxu1 }
 0x342   : > { %v6064_v53 = vpop.f32.mrf.mxu0  ;;  %v9459_v59 = vld [vmem:[#allocation43_spill] sm:$0xff] }
 0x343   : > { %v8722_v61 = vadd.f32 %v4491_v29, %v4348_v47  ;;  %v4503_v28 = vpop.f32.mrf.mxu1  ;;  %v9458_v47 = vld [vmem:[#allocation38_spill] sm:$0xff]  ;;  %v9461_v53 = vld [vmem:[#allocation59_spill] sm:$0xff] }
 0x344   : > { %v4353_v20 = vpop.f32.mrf.mxu0 }
 0x345   : > { %v4354_v41 = vadd.f32 %v4353_v20, %v8637_v24  ;;  %v6111_v37 = vpop.f32.mrf.mxu1  ;;  %v4662_v24 = vcvt.f32.s32 %v8615_v1  ;;  %v9462_v1 = vld [vmem:[#allocation67_spill] sm:$0xff] }
 0x346   : > { %v6067_v60 = vpop.f32.mrf.mxu0 }
 0x347   : > { %v8725_v32 = vadd.f32 %v4497_v63, %v4354_v41  ;;  %v4509_v3 = vpop.f32.mrf.mxu1  ;;  %v4663_v40 = vshll.u32 %v4662_v24, 16 }
 0x348   : > { %v4359_v48 = vpop.f32.mrf.mxu0 }
 0x349   : > { %v4360_v17 = vadd.f32 %v4359_v48, %v8645_v31  ;;  %v6114_v5 = vpop.f32.mrf.mxu1  ;;  %v4698_v31 = vcvt.f32.s32 %v8631_v35 }
 0x34a   : > { %v6070_v16 = vpop.f32.mrf.mxu0  ;;  %v9463_v5 = vld [vmem:[#allocation5_spill] sm:$0xff] }
 0x34b   : > { %v8728_v56 = vadd.f32 %v4503_v28, %v4360_v17  ;;  %v4699_v60 = vshll.u32 %v4698_v31, 16  ;;  %v9466_v31 = vld [vmem:[#allocation6_spill] sm:$0xff] }
 0x34c   : > { %v4365_v39 = vpop.f32.mrf.mxu0 }
 0x34d   : > { %v4366_v21 = vadd.f32 %v4365_v39, %v8653_v9  ;;  %v9460_v9 = vld [vmem:[#allocation69_spill] sm:$0xff]  ;;  %v9464_v39 = vld [vmem:[#allocation8_spill] sm:$0xff] }
 0x34e   : > { %v6073_v50 = vpop.f32.mrf.mxu0 }
 0x34f   : > { %v8731_v55 = vadd.f32 %v4509_v3, %v4366_v21  ;;  %v4716_v3 = vcvt.f32.s32 %v8639_v36  ;;  %v4734_v36 = vcvt.f32.s32 %v8647_v14  ;;  %v4752_v14 = vcvt.f32.s32 %v8655_v33 }
 0x350   : > { %v4770_v33 = vcvt.f32.s32 %v8663_v49  ;;  %v4788_v49 = vcvt.f32.s32 %v8671_v22  ;;  %v4806_v22 = vcvt.f32.s32 %v8679_v13  ;;  %v4824_v13 = vcvt.f32.s32 %v8687_v7 }
 0x351   : > { %v4717_v54 = vshll.u32 %v4716_v3, 16  ;;  %v4842_v7 = vcvt.f32.s32 %v8695_v18  ;;  %v4860_v18 = vcvt.f32.s32 %v8703_v4  ;;  %v4878_v4 = vcvt.f32.s32 %v8711_v43 }
 0x394   : > { %v4660_v29 = vpop.xlane.xlu0 %4659 }
 0x395   : > { %v4661_v10 = vcvt.f32.s32 %v4660_v29 }
 0x397   : > { %v4664_v2 = vadd.s32 %v4663_v40, %v4661_v10 }
 0x398   : > { %v4678_v63 = vpop.xlane.xlu1 %4677 }
 0x399   : > { %v4679_v23 = vcvt.f32.s32 %v4678_v63  ;;  %vm4881_vm14 = vcmp.eq.s32.totalorder %v9458_v47, %v4664_v2  ;;  %vm4882_vm13 = vcmp.eq.s32.totalorder %v9459_v59, %v4664_v2  ;;  %vm4883_vm12 = vcmp.eq.s32.totalorder %v9460_v9, %v4664_v2  ;;  %v9465_v2 = vld [vmem:[#allocation4_spill] sm:$0xff] }
 0x39a   : > { %v4920_v28 = vsel %vm4881_vm14, %v9461_v53, inf  ;;  %v4921_v20 = vsel %vm4882_vm13, %v9462_v1, inf  ;;  %v4922_v15 = vsel %vm4883_vm12, %v8661_v58, inf }
 0x39b   : > { %v4682_v41 = vadd.s32 %v4681_v46, %v4679_v23  ;;  %v4959_v37 = vmin.f32 %v4920_v28, %v4921_v20  ;;  %v4735_v28 = vshll.u32 %v4734_v36, 16 }
 0x39c   : > { %v4696_v35 = vpop.xlane.xlu0 %4695 }
 0x39d   : > { %v4697_v48 = vcvt.f32.s32 %v4696_v35  ;;  %v4960_v17 = vmin.f32 %v4959_v37, %v4922_v15  ;;  %vm4884_vm11 = vcmp.eq.s32.totalorder %v9458_v47, %v4682_v41  ;;  %vm4885_vm10 = vcmp.eq.s32.totalorder %v9459_v59, %v4682_v41 }
 0x39e   : > { %vm4886_vm9 = vcmp.eq.s32.totalorder %v9460_v9, %v4682_v41  ;;  %v4923_v16 = vsel %vm4884_vm11, %v9463_v5, inf  ;;  %v4924_v21 = vsel %vm4885_vm10, %v9464_v39, inf  ;;  %v9467_v41 = vld [vmem:[#allocation9_spill] sm:$0xff] }
 0x39f   : > { %v4700_v50 = vadd.s32 %v4699_v60, %v4697_v48  ;;  %4961 = vmin.xlane.f32.xlu1 %v4960_v17  ;;  %v4925_v58 = vsel %vm4886_vm9, %v8669_v42, inf  ;;  %v4963_v24 = vmin.f32 %v4923_v16, %v4924_v21  ;;  %v9468_v60 = vld [vmem:[#allocation12_spill] sm:$0xff]  ;;  %v4753_v17 = vshll.u32 %v4752_v14, 16  ;;  %v9469_v21 = vld [vmem:[#allocation18_spill] sm:$0xff] }
 0x3a0   : > { %v4714_v29 = vpop.xlane.xlu1 %4713 }
 0x3a1   : > { %v4715_v40 = vcvt.f32.s32 %v4714_v29  ;;  %v4964_v10 = vmin.f32 %v4963_v24, %v4925_v58  ;;  %vm4887_vm12 = vcmp.eq.s32.totalorder %v9458_v47, %v4700_v50  ;;  %vm4888_vm14 = vcmp.eq.s32.totalorder %v9459_v59, %v4700_v50  ;;  %v9470_v58 = vld [vmem:[#allocation24_spill] sm:$0xff] }
 0x3a2   : > { %vm4889_vm13 = vcmp.eq.s32.totalorder %v9460_v9, %v4700_v50  ;;  %v4926_v46 = vsel %vm4887_vm12, %v9465_v2, inf  ;;  %v4927_v63 = vsel %vm4888_vm14, %v9466_v31, inf  ;;  %v4771_v29 = vshll.u32 %v4770_v33, 16 }
 0x3a3   : > { %v4718_v23 = vadd.s32 %v4717_v54, %v4715_v40  ;;  %4965 = vmin.xlane.f32.xlu0 %v4964_v10  ;;  %v4928_v42 = vsel %vm4889_vm13, %v8677_v12, inf  ;;  %v4967_v53 = vmin.f32 %v4926_v46, %v4927_v63  ;;  %v9471_v46 = vld [vmem:[#allocation29_spill] sm:$0xff]  ;;  %v9472_v63 = vld [vmem:[#allocation34_spill] sm:$0xff] }
 0x3a4   : > { %v4732_v1 = vpop.xlane.xlu0 %4731 }
 0x3a5   : > { %v4733_v20 = vcvt.f32.s32 %v4732_v1  ;;  %v4968_v15 = vmin.f32 %v4967_v53, %v4928_v42  ;;  %vm4890_vm9 = vcmp.eq.s32.totalorder %v9458_v47, %v4718_v23  ;;  %vm4891_vm10 = vcmp.eq.s32.totalorder %v9459_v59, %v4718_v23 }
 0x3a6   : > { %vm4892_vm11 = vcmp.eq.s32.totalorder %v9460_v9, %v4718_v23  ;;  %v4929_v37 = vsel %vm4890_vm9, %v9467_v41, inf  ;;  %v4930_v3 = vsel %vm4891_vm10, %v9468_v60, inf }
 0x3a7   : > { %v4736_v35 = vadd.s32 %v4735_v28, %v4733_v20  ;;  %4969 = vmin.xlane.f32.xlu1 %v4968_v15  ;;  %v4931_v12 = vsel %vm4892_vm11, %v8685_v44, inf  ;;  %v4971_v48 = vmin.f32 %v4929_v37, %v4930_v3  ;;  %v4789_v28 = vshll.u32 %v4788_v49, 16  ;;  %v9473_v15 = vld [vmem:[#allocation37_spill] sm:$0xff]  ;;  %v9474_v37 = vld [vmem:[#allocation44_spill] sm:$0xff] }
 0x3a9   : > { %v4750_v5 = vpop.xlane.xlu1 %4749  ;;  %v4972_v39 = vmin.f32 %v4971_v48, %v4931_v12  ;;  %vm4893_vm12 = vcmp.eq.s32.totalorder %v9458_v47, %v4736_v35  ;;  %vm4894_vm14 = vcmp.eq.s32.totalorder %v9459_v59, %v4736_v35  ;;  %vm4895_vm13 = vcmp.eq.s32.totalorder %v9460_v9, %v4736_v35 }
 0x3aa   : > { %v4751_v16 = vcvt.f32.s32 %v4750_v5  ;;  %v4932_v50 = vsel %vm4893_vm12, %v9469_v21, inf  ;;  %v4933_v24 = vsel %vm4894_vm14, %v9470_v58, inf  ;;  %v4934_v44 = vsel %vm4895_vm13, %v8693_v30, inf  ;;  %v9475_v5 = vld [vmem:[#allocation49_spill] sm:$0xff] }
 0x3ab   : > { %4973 = vmin.xlane.f32.xlu0 %v4972_v39  ;;  %v4975_v36 = vmin.f32 %v4932_v50, %v4933_v24  ;;  %v4807_v12 = vshll.u32 %v4806_v22, 16  ;;  %v9476_v39 = vld [vmem:[#allocation55_spill] sm:$0xff]  ;;  %v4825_v24 = vshll.u32 %v4824_v13, 16 }
 0x3ac   : > { %v4754_v54 = vadd.s32 %v4753_v17, %v4751_v16  ;;  %v4768_v40 = vpop.xlane.xlu0 %4767  ;;  %v5064_v13 = vld [vmem:[#allocation3] sm:$0xff] }
 0x3ad   : > { %v4769_v10 = vcvt.f32.s32 %v4768_v40  ;;  %v4976_v2 = vmin.f32 %v4975_v36, %v4934_v44 }
 0x3ae   : > { %vm4896_vm9 = vcmp.eq.s32.totalorder %v9458_v47, %v4754_v54  ;;  %vm4897_vm10 = vcmp.eq.s32.totalorder %v9459_v59, %v4754_v54  ;;  %vm4898_vm11 = vcmp.eq.s32.totalorder %v9460_v9, %v4754_v54 }
 0x3af   : > { %v4935_v31 = vsel %vm4896_vm9, %v9471_v46, inf  ;;  %v4936_v23 = vsel %vm4897_vm10, %v9472_v63, inf  ;;  %v4772_v42 = vadd.s32 %v4771_v29, %v4769_v10  ;;  %4977 = vmin.xlane.f32.xlu1 %v4976_v2  ;;  %v4937_v30 = vsel %vm4898_vm11, %v8701_v51, inf }
 0x3b0   : > { %v4979_v53 = vmin.f32 %v4935_v31, %v4936_v23  ;;  %v4843_v2 = vshll.u32 %v4842_v7, 16 }
 0x3b1   : > { %v4786_v14 = vpop.xlane.xlu1 %4785  ;;  %vm4899_vm12 = vcmp.eq.s32.totalorder %v9458_v47, %v4772_v42  ;;  %vm4900_vm14 = vcmp.eq.s32.totalorder %v9459_v59, %v4772_v42  ;;  %vm4901_vm13 = vcmp.eq.s32.totalorder %v9460_v9, %v4772_v42 }
 0x3b2   : > { %v4787_v1 = vcvt.f32.s32 %v4786_v14  ;;  %v4980_v20 = vmin.f32 %v4979_v53, %v4937_v30  ;;  %v4938_v41 = vsel %vm4899_vm12, %v9473_v15, inf  ;;  %v4939_v60 = vsel %vm4900_vm14, %v9474_v37, inf }
 0x3b3   : > { %v4940_v51 = vsel %vm4901_vm13, %v8709_v52, inf  ;;  %v4983_v35 = vmin.f32 %v4938_v41, %v4939_v60  ;;  %v4861_v30 = vshll.u32 %v4860_v18, 16 }
 0x3b4   : > { %v4790_v3 = vadd.s32 %v4789_v28, %v4787_v1  ;;  %4981 = vmin.xlane.f32.xlu0 %v4980_v20  ;;  %v4879_v20 = vshll.u32 %v4878_v4, 16 }
 0x3b5   : > { %v4804_v48 = vpop.xlane.xlu0 %4803  ;;  %v4984_v33 = vmin.f32 %v4983_v35, %v4940_v51 }
 0x3b6   : > { %v4805_v17 = vcvt.f32.s32 %v4804_v48  ;;  %vm4902_vm9 = vcmp.eq.s32.totalorder %v9458_v47, %v4790_v3  ;;  %vm4903_vm10 = vcmp.eq.s32.totalorder %v9459_v59, %v4790_v3  ;;  %vm4904_vm11 = vcmp.eq.s32.totalorder %v9460_v9, %v4790_v3 }
 0x3b7   : > { %v4941_v16 = vsel %vm4902_vm9, %v9475_v5, inf  ;;  %v4942_v21 = vsel %vm4903_vm10, %v9476_v39, inf  ;;  %4985 = vmin.xlane.f32.xlu1 %v4984_v33  ;;  %v4943_v52 = vsel %vm4904_vm11, %v8716_v0, inf  ;;  %v5066_v33 = vld [vmem:[#allocation3 + $0x10] sm:$0xff] }
 0x3b8   : > { %v4808_v50 = vadd.s32 %v4807_v12, %v4805_v17  ;;  %v4987_v58 = vmin.f32 %v4941_v16, %v4942_v21  ;;  %v5067_v21 = vld [vmem:[#allocation3 + $0x18] sm:$0xff]  ;;  %v9495_v16 = vld [vmem:[#allocation33_spill] sm:$0xff] }
 0x3b9   : > { %v4822_v54 = vpop.xlane.xlu1 %4821 }
 0x3ba   : > { %v4823_v44 = vcvt.f32.s32 %v4822_v54  ;;  %v4988_v36 = vmin.f32 %v4987_v58, %v4943_v52  ;;  %vm4905_vm12 = vcmp.eq.s32.totalorder %v9458_v47, %v4808_v50  ;;  %vm4906_vm14 = vcmp.eq.s32.totalorder %v9459_v59, %v4808_v50 }
 0x3bb   : > { %vm4907_vm13 = vcmp.eq.s32.totalorder %v9460_v9, %v4808_v50  ;;  %v4944_v29 = vsel %vm4905_vm12, %v8407_v26, inf  ;;  %v4945_v49 = vsel %vm4906_vm14, %v8410_v25, inf }
 0x3bc   : > { %v4826_v40 = vadd.s32 %v4825_v24, %v4823_v44  ;;  %4989 = vmin.xlane.f32.xlu0 %v4988_v36  ;;  %v4946_v0 = vsel %vm4907_vm13, %v8719_v38, inf  ;;  %v4991_v10 = vmin.f32 %v4944_v29, %v4945_v49 }
 0x3bd   : > { %v4840_v46 = vpop.xlane.xlu0 %4839 }
 0x3be   : > { %v4841_v31 = vcvt.f32.s32 %v4840_v46  ;;  %v4992_v63 = vmin.f32 %v4991_v10, %v4946_v0  ;;  %vm4908_vm9 = vcmp.eq.s32.totalorder %v9458_v47, %v4826_v40  ;;  %vm4909_vm10 = vcmp.eq.s32.totalorder %v9459_v59, %v4826_v40  ;;  %v5069_v0 = vld [vmem:[#allocation3 + $0x28] sm:$0xff] }
 0x3bf   : > { %vm4910_vm11 = vcmp.eq.s32.totalorder %v9460_v9, %v4826_v40  ;;  %v4947_v26 = vsel %vm4908_vm9, %v8418_v6, inf  ;;  %v4948_v25 = vsel %vm4909_vm10, %v8420_v8, inf }
 0x3c0   : > { %v4844_v23 = vadd.s32 %v4843_v2, %v4841_v31  ;;  %4993 = vmin.xlane.f32.xlu1 %v4992_v63  ;;  %v4949_v38 = vsel %vm4910_vm11, %v8722_v61, inf  ;;  %v4995_v42 = vmin.f32 %v4947_v26, %v4948_v25  ;;  %v5070_v25 = vld [vmem:[#allocation3 + $0x30] sm:$0xff]  ;;  %v9498_v31 = vld [vmem:[#allocation42_spill] sm:$0xff] }
 0x3c1   : > { %v4858_v53 = vpop.xlane.xlu1 %4857  ;;  %v9499_v63 = vld [vmem:[#allocation30_spill] sm:$0xff] }
 0x3c2   : > { %v4859_v28 = vcvt.f32.s32 %v4858_v53  ;;  %v4996_v22 = vmin.f32 %v4995_v42, %v4949_v38  ;;  %vm4911_vm12 = vcmp.eq.s32.totalorder %v9458_v47, %v4844_v23  ;;  %vm4912_vm14 = vcmp.eq.s32.totalorder %v9459_v59, %v4844_v23 }
 0x3c3   : > { %vm4913_vm13 = vcmp.eq.s32.totalorder %v9460_v9, %v4844_v23  ;;  %v4950_v6 = vsel %vm4911_vm12, %v8425_v27, inf  ;;  %v4951_v8 = vsel %vm4912_vm14, %v8430_v19, inf }
 0x3c4   : > { %v4862_v14 = vadd.s32 %v4861_v30, %v4859_v28  ;;  %4997 = vmin.xlane.f32.xlu0 %v4996_v22  ;;  %v4952_v61 = vsel %vm4913_vm13, %v8725_v32, inf  ;;  %v4999_v1 = vmin.f32 %v4950_v6, %v4951_v8  ;;  %v5071_v22 = vld [vmem:[#allocation3 + $0x38] sm:$0xff] }
 0x3c5   : > { %v4876_v43 = vpop.xlane.xlu0 %4875 }
 0x3c6   : > { %v4877_v15 = vcvt.f32.s32 %v4876_v43  ;;  %v5000_v41 = vmin.f32 %v4999_v1, %v4952_v61  ;;  %vm4914_vm9 = vcmp.eq.s32.totalorder %v9458_v47, %v4862_v14  ;;  %vm4915_vm10 = vcmp.eq.s32.totalorder %v9459_v59, %v4862_v14 }
 0x3c7   : > { %vm4916_vm11 = vcmp.eq.s32.totalorder %v9460_v9, %v4862_v14  ;;  %v4953_v37 = vsel %vm4914_vm9, %v8436_v34, inf  ;;  %v4954_v27 = vsel %vm4915_vm10, %v8443_v57, inf  ;;  %v9490_v14 = vlaneseq }
 0x3c8   : > { %v4880_v19 = vadd.s32 %v4879_v20, %v4877_v15  ;;  %5001 = vmin.xlane.f32.xlu1 %v5000_v41  ;;  %v5003_v60 = vmin.f32 %v4953_v37, %v4954_v27  ;;  %v4955_v32 = vsel %vm4916_vm11, %v8728_v56, inf  ;;  %v5072_v37 = vld [vmem:[#allocation3 + $0x40] sm:$0xff] }
 0x3c9   : > { %v8867_v61 = vshrl.u32 %v9490_v14, 7 }
 0x3ca   : > { %v5004_v3 = vmin.f32 %v5003_v60, %v4955_v32  ;;  %vm4917_vm12 = vcmp.eq.s32.totalorder %v9458_v47, %v4880_v19  ;;  %vm4918_vm14 = vcmp.eq.s32.totalorder %v9459_v59, %v4880_v19  ;;  %vm4919_vm13 = vcmp.eq.s32.totalorder %v9460_v9, %v4880_v19  ;;  %v5065_v59 = vld [vmem:[#allocation3 + $0x8] sm:$0xff] }
 0x3cb   : > { %v4956_v51 = vsel %vm4917_vm12, %v8452_v62, inf  ;;  %v4957_v35 = vsel %vm4918_vm14, %v8479_v45, inf  ;;  %v4958_v57 = vsel %vm4919_vm13, %v8731_v55, inf  ;;  %v5225_v27 = vadd.s32 8, %v8867_v61 }
 0x3cc   : > { %5005 = vmin.xlane.f32.xlu0 %v5004_v3  ;;  %v5007_v34 = vmin.f32 %v4956_v51, %v4957_v35  ;;  %v8877_v19 = vstv %s5237_s13  ;;  %v5226_v60 = vadd.s32 16, %v8867_v61  ;;  %v5227_v56 = vadd.s32 24, %v8867_v61 }
 0x3cd   : > { %v5232_v58 = vadd.s32 64, %v8867_v61 }
 0x3ce   : > { %v5008_v12 = vmin.f32 %v5007_v34, %v4958_v57 }
 0x3d0   : > { %5009 = vmin.xlane.f32.xlu1 %v5008_v12  ;;  %v5073_v12 = vld [vmem:[#allocation3 + $0x48] sm:$0xff] }
 0x428   : > { %v4962_v48 = vpop.xlane.xlu1 %4961 }
 0x429   : > { %v5077_v47 = vsel %vm5024_vm8, %v4962_v48, %v5064_v13  ;;  %v8890_v13 = vadd.s32 %v8877_v19, %v8867_v61  ;;  %v8893_v48 = vadd.s32 %v8877_v19, %v5225_v27  ;;  %v9502_v27 = vld [vmem:[#allocation11_spill] sm:$0xff] }
 0x42a   : > { %5090 = vst.msk [vmem:[#allocation3] sm:$0xff] %vm319_vm3, %v5077_v47  ;;  %v8897_v47 = vadd.s32 %v8877_v19, %v5226_v60 }
 0x42c   : > { %v4966_v9 = vpop.xlane.xlu0 %4965 }
 0x42d   : > { %v5078_v45 = vsel %vm5025_vm15, %v4966_v9, %v5065_v59  ;;  %v5228_v59 = vadd.s32 32, %v8867_v61  ;;  %v5229_v9 = vadd.s32 40, %v8867_v61  ;;  %vm5252_vm15 = vcmp.lt.s32.totalorder %v8890_v13, 200 }
 0x42e   : > { %5091 = vst.msk [vmem:[#allocation3 + $0x8] sm:$0xff] %vm319_vm3, %v5078_v45 }
 0x42f   : > { %v8923_v36 = vadd.s32 %v8877_v19, %v5229_v9 }
 0x430   : > { %v4970_v55 = vpop.xlane.xlu1 %4969 }
 0x431   : > { %v5079_v39 = vsel %vm5026_vm0, %v4970_v55, %v5066_v33  ;;  %v5106_v44 = vld [vmem:[#allocation3] sm:$0xff]  ;;  %v5230_v33 = vadd.s32 48, %v8867_v61  ;;  %v5231_v55 = vadd.s32 56, %v8867_v61  ;;  %vm5253_vm0 = vcmp.lt.s32.totalorder %v8893_v48, 200 }
 0x432   : > { %5092 = vst.msk [vmem:[#allocation3 + $0x10] sm:$0xff] %vm319_vm3, %v5079_v39  ;;  %v8846_v2 = vmax.f32 %v5106_v44, 0.0  ;;  %v9496_v39 = vld [vmem:[#allocation26_spill] sm:$0xff]  ;;  %v8920_v44 = vadd.s32 %v8877_v19, %v5228_v59 }
 0x433   : > { %vm9497_vm8 = vcmp.lt.f32.partialorder %v9495_v16, %v9496_v39 }
 0x434   : > { %v4974_v50 = vpop.xlane.xlu0 %4973  ;;  %v5137_v20 = vand.u32 2147483648, %v8846_v2  ;;  %vm5256_vm14 = vcmp.lt.s32.totalorder %v8920_v44, 200 }
 0x435   : > { %v5080_v24 = vsel %vm5027_vm1, %v4974_v50, %v5067_v21  ;;  %v5107_v7 = vld [vmem:[#allocation3 + $0x8] sm:$0xff]  ;;  %vm5254_vm1 = vcmp.lt.s32.totalorder %v8897_v47, 200 }
 0x436   : > { %5093 = vst.msk [vmem:[#allocation3 + $0x18] sm:$0xff] %vm319_vm3, %v5080_v24  ;;  %v8844_v10 = vmax.f32 %v5107_v7, 0.0  ;;  %v5074_v24 = vld [vmem:[#allocation3 + $0x50] sm:$0xff]  ;;  %v8915_v7 = vadd.s32 %v8877_v19, %v5227_v56 }
 0x438   : > { %v4978_v54 = vpop.xlane.xlu1 %4977  ;;  %6142 = vrsqrt.f32 %v8844_v10  ;;  %vm5143_vm9 = vcmp.eq.f32.partialorder %v8844_v10, 0.0  ;;  %vm5255_vm10 = vcmp.lt.s32.totalorder %v8915_v7, 200 }
 0x439   : > { %v5081_v49 = vsel %vm5028_vm4, %v4978_v54, %v5068_v11  ;;  %v5108_v40 = vld [vmem:[#allocation3 + $0x10] sm:$0xff]  ;;  %6144 = vrsqrt.f32 %v8846_v2  ;;  %vm9500_vm4 = vcmp.lt.f32.partialorder %v9498_v31, %v9499_v63 }
 0x43a   : > { %5094 = vst.msk [vmem:[#allocation3 + $0x20] sm:$0xff] %vm319_vm3, %v5081_v49  ;;  %v8848_v46 = vmax.f32 %v5108_v40, 0.0  ;;  %v8928_v40 = vadd.s32 %v8877_v19, %v5230_v33 }
 0x43c   : > { %6146 = vrsqrt.f32 %v8848_v46  ;;  %vm5150_vm12 = vcmp.eq.f32.partialorder %v8848_v46, 0.0 }
 0x43d   : > { %v4982_v18 = vpop.xlane.xlu0 %4981  ;;  %v5109_v23 = vld [vmem:[#allocation3 + $0x18] sm:$0xff] }
 0x43e   : > { %v5082_v26 = vsel %vm5029_vm5, %v4982_v18, %v5069_v0  ;;  %v8860_v28 = vmax.f32 %v5109_v23, 0.0  ;;  %v8931_v0 = vadd.s32 %v8877_v19, %v5231_v55  ;;  %vm5141_vm5 = vcmp.eq.f32.partialorder %v8844_v10, inf  ;;  %v9504_v55 = vld [vmem:[#allocation65_spill] sm:$0xff] }
 0x43f   : > { %5095 = vst.msk [vmem:[#allocation3 + $0x28] sm:$0xff] %vm319_vm3, %v5082_v26 }
 0x440   : > { %v4986_v38 = vpop.xlane.xlu1 %4985  ;;  %6148 = vrsqrt.f32 %v8860_v28  ;;  %vm5155_vm13 = vcmp.eq.f32.partialorder %v8860_v28, inf }
 0x441   : > { %v5110_v42 = vld [vmem:[#allocation3 + $0x20] sm:$0xff]  ;;  %v5083_v53 = vsel %vm5030_vm6, %v4986_v38, %v5070_v25  ;;  %v8938_v25 = vadd.s32 %v8877_v19, %v5232_v58  ;;  %v5233_v38 = vadd.s32 72, %v8867_v61  ;;  %vm5134_vm6 = vcmp.eq.f32.partialorder %v8846_v2, inf }
 0x442   : > { %5096 = vst.msk [vmem:[#allocation3 + $0x30] sm:$0xff] %vm319_vm3, %v5083_v53  ;;  %v8864_v6 = vmax.f32 %v5110_v42, 0.0  ;;  %v5075_v42 = vld [vmem:[#allocation3 + $0x58] sm:$0xff]  ;;  %v5234_v53 = vadd.s32 80, %v8867_v61 }
 0x443   : > { %v8969_v56 = vadd.s32 %v8877_v19, %v5233_v38 }
 0x444   : > { %6150 = vrsqrt.f32 %v8864_v6 }
 0x445   : > { %v4990_v8 = vpop.xlane.xlu0 %4989  ;;  %v6143_v17 = vpop.eup %6142 }
 0x446   : > { %v5111_v1 = vld [vmem:[#allocation3 + $0x28] sm:$0xff]  ;;  %v5084_v15 = vsel %vm5031_vm2, %v4990_v8, %v5071_v22  ;;  %v6145_v45 = vpop.eup %6144  ;;  %v5140_v11 = vmul.f32 %v6143_v17, %v8844_v10  ;;  %vm5136_vm2 = vcmp.eq.f32.partialorder %v8846_v2, 0.0  ;;  %v5144_v8 = vand.u32 2147483648, %v8844_v10 }
 0x447   : > { %v8873_v41 = vmax.f32 %v5111_v1, 0.0  ;;  %5097 = vst.msk [vmem:[#allocation3 + $0x38] sm:$0xff] %vm319_vm3, %v5084_v15  ;;  %v5133_v54 = vmul.f32 %v6145_v45, %v8846_v2  ;;  %v8972_v17 = vadd.s32 %v8877_v19, %v5234_v53  ;;  %v5158_v45 = vand.u32 2147483648, %v8860_v28 }
 0x448   : > { %v5142_v4 = vsel %vm5141_vm5, %v8844_v10, %v5140_v11 }
 0x449   : > { %v4994_v32 = vpop.xlane.xlu1 %4993  ;;  %v5112_v3 = vld [vmem:[#allocation3 + $0x30] sm:$0xff]  ;;  %6152 = vrsqrt.f32 %v8873_v41  ;;  %v6147_v50 = vpop.eup %6146  ;;  %v5135_v22 = vsel %vm5134_vm6, %v8846_v2, %v5133_v54  ;;  %vm5164_vm6 = vcmp.eq.f32.partialorder %v8864_v6, 0.0 }
 0x44a   : > { %v5085_v34 = vsel %vm5032_vm7, %v4994_v32, %v5072_v37  ;;  %v8885_v57 = vmax.f32 %v5112_v3, 0.0  ;;  %v5147_v49 = vmul.f32 %v6147_v50, %v8848_v46  ;;  %vm5148_vm7 = vcmp.eq.f32.partialorder %v8848_v46, inf  ;;  %v9501_v37 = vld [vmem:[#allocation54_spill] sm:$0xff] }
 0x44b   : > { %5098 = vst.msk [vmem:[#allocation3 + $0x40] sm:$0xff] %vm319_vm3, %v5085_v34  ;;  %vm9503_vm11 = vcmp.lt.f32.partialorder %v9501_v37, %v9502_v27  ;;  %v5145_v32 = vsel %vm5143_vm9, %v5144_v8, %v5142_v4  ;;  %v5151_v3 = vand.u32 2147483648, %v8848_v46  ;;  %v5076_v34 = vld [vmem:[#allocation3 + $0x60] sm:$0xff] }
 0x44c   : > { %6154 = vrsqrt.f32 %v8885_v57  ;;  %v5149_v43 = vsel %vm5148_vm7, %v8848_v46, %v5147_v49  ;;  %v5266_v46 = vsel %vm5253_vm0, %v5145_v32, 0.0  ;;  %vm5162_vm0 = vcmp.eq.f32.partialorder %v8864_v6, inf }
 0x44d   : > { %v4998_v62 = vpop.xlane.xlu0 %4997  ;;  %v6149_v30 = vpop.eup %6148  ;;  %v5152_v59 = vsel %vm5150_vm12, %v5151_v3, %v5149_v43  ;;  %v5279_v13 = vsel %vm319_vm3, %v5266_v46, 0.0  ;;  %vm5259_vm7 = vcmp.lt.s32.totalorder %v8931_v0, 200  ;;  %vm5176_vm9 = vcmp.eq.f32.partialorder %v8885_v57, inf }
 0x44e   : > { %v5113_v5 = vld [vmem:[#allocation3 + $0x38] sm:$0xff]  ;;  %v5086_v21 = vsel %vm9497_vm8, %v4998_v62, %v5073_v12  ;;  %v5154_v51 = vmul.f32 %v6149_v30, %v8860_v28  ;;  %v5138_v12 = vsel %vm5136_vm2, %v5137_v20, %v5135_v22  ;;  %vm5157_vm8 = vcmp.eq.f32.partialorder %v8860_v28, 0.0 }
 0x44f   : > { %v8907_v52 = vmax.f32 %v5113_v5, 0.0  ;;  %5099 = vst.msk [vmem:[#allocation3 + $0x48] sm:$0xff] %vm319_vm3, %v5086_v21  ;;  %v9505_v5 = vld [vmem:[#allocation31_spill] sm:$0xff]  ;;  %v5265_v39 = vsel %vm5252_vm15, %v5138_v12, 0.0  ;;  %v5267_v58 = vsel %vm5254_vm1, %v5152_v59, 0.0  ;;  %vm5258_vm2 = vcmp.lt.s32.totalorder %v8928_v40, 200 }
 0x450   : > { %vm9506_vm5 = vcmp.lt.f32.partialorder %v9504_v55, %v9505_v5  ;;  %v5156_v21 = vsel %vm5155_vm13, %v8860_v28, %v5154_v51  ;;  %v5278_v47 = vsel %vm319_vm3, %v5265_v39, 0.0  ;;  %vm5169_vm15 = vcmp.eq.f32.partialorder %v8873_v41, inf }
 0x451   : > { %6156 = vrsqrt.f32 %v8907_v52  ;;  %v5002_v29 = vpop.xlane.xlu1 %5001  ;;  %v6151_v1 = vpop.eup %6150  ;;  %v5159_v49 = vsel %vm5157_vm8, %v5158_v45, %v5156_v21  ;;  %vm5171_vm1 = vcmp.eq.f32.partialorder %v8873_v41, 0.0  ;;  %v5281_v31 = vsel %vm319_vm3, %v5267_v58, 0.0 }
 0x452   : > { %v5114_v18 = vld [vmem:[#allocation3 + $0x40] sm:$0xff]  ;;  %v5087_v26 = vsel %vm9500_vm4, %v5002_v29, %v5074_v24  ;;  %v5161_v9 = vmul.f32 %v6151_v1, %v8864_v6  ;;  %vm5257_vm4 = vcmp.lt.s32.totalorder %v8923_v36, 200  ;;  %v5165_v24 = vand.u32 2147483648, %v8864_v6 }
 0x453   : > { %v8940_v23 = vmax.f32 %v5114_v18, 0.0  ;;  %5100 = vst.msk [vmem:[#allocation3 + $0x50] sm:$0xff] %vm319_vm3, %v5087_v26  ;;  %v5172_v30 = vand.u32 2147483648, %v8873_v41  ;;  %v5268_v4 = vsel %vm5255_vm10, %v5159_v49, 0.0  ;;  %vm5178_vm12 = vcmp.eq.f32.partialorder %v8885_v57, 0.0 }
 0x454   : > { %v5163_v11 = vsel %vm5162_vm0, %v8864_v6, %v5161_v9  ;;  %vm5183_vm13 = vcmp.eq.f32.partialorder %v8907_v52, inf  ;;  %v5283_v37 = vsel %vm319_vm3, %v5268_v4, 0.0  ;;  %vm5185_vm8 = vcmp.eq.f32.partialorder %v8907_v52, 0.0 }
 0x455   : > { %6158 = vrsqrt.f32 %v8940_v23  ;;  %v5006_v14 = vpop.xlane.xlu0 %5005  ;;  %v5166_v28 = vsel %vm5164_vm6, %v5165_v24, %v5163_v11  ;;  %vm5190_vm10 = vcmp.eq.f32.partialorder %v8940_v23, inf  ;;  %v5193_v51 = vand.u32 2147483648, %v8940_v23 }
 0x456   : > { %v5115_v15 = vld [vmem:[#allocation3 + $0x48] sm:$0xff]  ;;  %v5088_v60 = vsel %vm9503_vm11, %v5006_v14, %v5075_v42  ;;  %v6153_v10 = vpop.eup %6152  ;;  %v5280_v42 = vadd.f32 %v5279_v13, %v5278_v47  ;;  %vm5260_vm11 = vcmp.lt.s32.totalorder %v8938_v25, 200  ;;  %v5179_v14 = vand.u32 2147483648, %v8885_v57 }
 0x457   : > { %v8961_v35 = vmax.f32 %v5115_v15, 0.0  ;;  %5101 = vst.msk [vmem:[#allocation3 + $0x58] sm:$0xff] %vm319_vm3, %v5088_v60  ;;  %v5168_v50 = vmul.f32 %v6153_v10, %v8873_v41  ;;  %v5269_v7 = vsel %vm5256_vm14, %v5166_v28, 0.0  ;;  %vm5192_vm14 = vcmp.eq.f32.partialorder %v8940_v23, 0.0 }
 0x458   : > { %v5282_v8 = vadd.f32 %v5281_v31, %v5280_v42  ;;  %v5285_v32 = vsel %vm319_vm3, %v5269_v7, 0.0  ;;  %vm5261_vm0 = vcmp.lt.s32.totalorder %v8969_v56, 200  ;;  %vm5262_vm6 = vcmp.lt.s32.totalorder %v8972_v17, 200 }
 0x459   : > { %6160 = vrsqrt.f32 %v8961_v35  ;;  %v5010_v62 = vpop.xlane.xlu1 %5009  ;;  %v6155_v2 = vpop.eup %6154  ;;  %v5170_v63 = vsel %vm5169_vm15, %v8873_v41, %v5168_v50  ;;  %v5186_v41 = vand.u32 2147483648, %v8907_v52  ;;  %v5200_v9 = vand.u32 2147483648, %v8961_v35 }
 0x45a   : > { %v5116_v33 = vld [vmem:[#allocation3 + $0x50] sm:$0xff]  ;;  %v5089_v16 = vsel %vm9506_vm5, %v5010_v62, %v5076_v34  ;;  %v5175_v54 = vmul.f32 %v6155_v2, %v8885_v57  ;;  %v5173_v6 = vsel %vm5171_vm1, %v5172_v30, %v5170_v63  ;;  %v5235_v34 = vadd.s32 88, %v8867_v61 }
 0x45b   : > { %v8989_v48 = vmax.f32 %v5116_v33, 0.0  ;;  %5102 = vst.msk [vmem:[#allocation3 + $0x60] sm:$0xff] %vm319_vm3, %v5089_v16  ;;  %v5284_v10 = vadd.f32 %v5283_v37, %v5282_v8  ;;  %vm5199_vm5 = vcmp.eq.f32.partialorder %v8961_v35, 0.0  ;;  %v5236_v39 = vadd.s32 96, %v8867_v61 }
 0x45c   : > { %v5177_v53 = vsel %vm5176_vm9, %v8885_v57, %v5175_v54  ;;  %v5270_v57 = vsel %vm5257_vm4, %v5173_v6, 0.0  ;;  %vm5197_vm4 = vcmp.eq.f32.partialorder %v8961_v35, inf  ;;  %v5250_v0 = vadd.s32 %v8877_v19, %v5235_v34 }
 0x45d   : > { %6162 = vrsqrt.f32 %v8989_v48  ;;  %v5180_v27 = vsel %vm5178_vm12, %v5179_v14, %v5177_v53  ;;  %v5287_v36 = vsel %vm319_vm3, %v5270_v57, 0.0  ;;  %v5286_v62 = vadd.f32 %v5285_v32, %v5284_v10 }
 0x45e   : > { %v6157_v29 = vpop.eup %6156  ;;  %v5117_v18 = vld [vmem:[#allocation3 + $0x58] sm:$0xff]  ;;  %v5271_v12 = vsel %vm5258_vm2, %v5180_v27, 0.0  ;;  %vm5204_vm2 = vcmp.eq.f32.partialorder %v8989_v48, inf  ;;  %vm5206_vm15 = vcmp.eq.f32.partialorder %v8989_v48, 0.0  ;;  %vm5263_vm1 = vcmp.lt.s32.totalorder %v5250_v0, 200 }
 0x45f   : > { %v5182_v26 = vmul.f32 %v6157_v29, %v8907_v52  ;;  %v9011_v38 = vmax.f32 %v5117_v18, 0.0  ;;  %v5288_v33 = vadd.f32 %v5287_v36, %v5286_v62  ;;  %v5251_v47 = vadd.s32 %v8877_v19, %v5236_v39 }
 0x461   : > { %6164 = vrsqrt.f32 %v9011_v38  ;;  %v5184_v20 = vsel %vm5183_vm13, %v8907_v52, %v5182_v26  ;;  %v5214_v61 = vand.u32 2147483648, %v9011_v38  ;;  %vm5213_vm9 = vcmp.eq.f32.partialorder %v9011_v38, 0.0 }
 0x462   : > { %v6159_v22 = vpop.eup %6158  ;;  %v5118_v1 = vld [vmem:[#allocation3 + $0x60] sm:$0xff]  ;;  %v5187_v3 = vsel %vm5185_vm8, %v5186_v41, %v5184_v20 }
 0x463   : > { %v5189_v43 = vmul.f32 %v6159_v22, %v8940_v23  ;;  %v9031_v15 = vmax.f32 %v5118_v1, 0.0  ;;  %v5272_v2 = vsel %vm5259_vm7, %v5187_v3, 0.0  ;;  %vm5211_vm7 = vcmp.eq.f32.partialorder %v9011_v38, inf }
 0x464   : > { %v5291_v16 = vsel %vm319_vm3, %v5272_v2, 0.0 }
 0x465   : > { %v5191_v44 = vsel %vm5190_vm10, %v8940_v23, %v5189_v43  ;;  %6166 = vrsqrt.f32 %v9031_v15  ;;  %v5289_v23 = vsel %vm319_vm3, %v5271_v12, 0.0  ;;  %vm5218_vm12 = vcmp.eq.f32.partialorder %v9031_v15, inf }
 0x466   : > { %v6161_v60 = vpop.eup %6160  ;;  %v5194_v59 = vsel %vm5192_vm14, %v5193_v51, %v5191_v44  ;;  %v5290_v56 = vadd.f32 %v5289_v23, %v5288_v33  ;;  %v5221_v19 = vand.u32 2147483648, %v9031_v15  ;;  %vm5220_vm13 = vcmp.eq.f32.partialorder %v9031_v15, 0.0 }
 0x467   : > { %v5196_v52 = vmul.f32 %v6161_v60, %v8961_v35  ;;  %v5273_v55 = vsel %vm5260_vm11, %v5194_v59, 0.0  ;;  %vm5264_vm11 = vcmp.lt.s32.totalorder %v5251_v47, 200  ;;  %vm5309_vm10 = vcmask 0  }
 0x468   : > { %v5293_v58 = vsel %vm319_vm3, %v5273_v55, 0.0  ;;  %v5292_v13 = vadd.f32 %v5291_v16, %v5290_v56 }
 0x469   : > { %v5198_v46 = vsel %vm5197_vm4, %v8961_v35, %v5196_v52  ;;  %v5207_v35 = vand.u32 2147483648, %v8989_v48 }
 0x46a   : > { %v6163_v40 = vpop.eup %6162  ;;  %v5201_v45 = vsel %vm5199_vm5, %v5200_v9, %v5198_v46 }
 0x46b   : > { %v5203_v5 = vmul.f32 %v6163_v40, %v8989_v48  ;;  %v5274_v21 = vsel %vm5261_vm0, %v5201_v45, 0.0 }
 0x46c   : > { %v5295_v29 = vsel %vm319_vm3, %v5274_v21, 0.0 }
 0x46d   : > { %v5205_v50 = vsel %vm5204_vm2, %v8989_v48, %v5203_v5  ;;  %v5294_v48 = vadd.f32 %v5293_v58, %v5292_v13 }
 0x46e   : > { %v6165_v25 = vpop.eup %6164  ;;  %v5208_v24 = vsel %vm5206_vm15, %v5207_v35, %v5205_v50 }
 0x46f   : > { %v5275_v11 = vsel %vm5262_vm6, %v5208_v24, 0.0  ;;  %v5210_v54 = vmul.f32 %v6165_v25, %v9011_v38  ;;  %v5296_v63 = vadd.f32 %v5295_v29, %v5294_v48 }
 0x470   : > { %v5297_v17 = vsel %vm319_vm3, %v5275_v11, 0.0 }
 0x471   : > { %v5212_v49 = vsel %vm5211_vm7, %v9011_v38, %v5210_v54  ;;  %v5298_v30 = vadd.f32 %v5297_v17, %v5296_v63 }
 0x472   : > { %v6167_v18 = vpop.eup %6166  ;;  %v5215_v31 = vsel %vm5213_vm9, %v5214_v61, %v5212_v49 }
 0x473   : > { %v5276_v26 = vsel %vm5263_vm1, %v5215_v31, 0.0  ;;  %v5217_v42 = vmul.f32 %v6167_v18, %v9031_v15 }
 0x474   : > { %v5299_v28 = vsel %vm319_vm3, %v5276_v26, 0.0 }
 0x475   : > { %v5219_v38 = vsel %vm5218_vm12, %v9031_v15, %v5217_v42  ;;  %v5300_v53 = vadd.f32 %v5299_v28, %v5298_v30 }
 0x476   : > { %v5222_v4 = vsel %vm5220_vm13, %v5221_v19, %v5219_v38 }
 0x477   : > { %v5277_v22 = vsel %vm5264_vm11, %v5222_v4, 0.0 }
 0x478   : > { %v5301_v8 = vsel %vm319_vm3, %v5277_v22, 0.0 }
 0x479   : > { %v5302_v6 = vadd.f32 %v5301_v8, %v5300_v53 }
 0x47b   : > { %v5303_v14 = vrot.slane %v5302_v6, 4 }
 0x47d   : > { %v5304_v1 = vadd.f32 %v5303_v14, %v5302_v6 }
 0x47f   : > { %v5305_v7 = vrot.slane %v5304_v1, 2 }
 0x481   : > { %v5306_v20 = vadd.f32 %v5305_v7, %v5304_v1 }
 0x483   : > { %v5307_v43 = vrot.slane %v5306_v20, 1 }
 0x485   : > { %v5308_v37 = vadd.f32 %v5307_v43, %v5306_v20 }
 0x487   : > { %5310 = vst.msk [vmem:[%s314_s20] sm:$0x1] %vm5309_vm10, %v5308_v37 }
 0x488 PF: > { %s14_s17 = sadd.s32 1, %s6190_s17   ;;  %s9507_s15 = smov %s6186_s16 }
 0x489   : > { %p11_p6 = scmp.ge.s32.totalorder %s14_s17, 4   ;;  %s9508_s16 = smov %s9510_s18 }
 0x48b   :  { %13 = sbr.rel (!%p11_p6) target bundleno = 2 (0x2), region = 85 }

</bundles_post_ra>
